<compile_context>
chip_gen: v7x
topology: tpu7x:2x2x1
jax: 0.10.0
libtpu: 0.0.40
codegen_flags: <defaults>
</compile_context>

<pallas_src>
import functools

import jax
import jax.numpy as jnp
from jax import lax
from jax.experimental import pallas as pl
from jax.experimental.pallas import tpu as pltpu


# ----------------------------------------------------------------------------
# Pallas kernel: one (head, block-of-KC-chunks) tile of the chunkwise mLSTM.
# ----------------------------------------------------------------------------
def _mlstm_chunkwise_kernel(
    q_ref, kt_ref, va_ref, grow_ref, gcol_ref, c0_ref, n0_ref, m0_ref,   # inputs
    h_ref, cT_ref, nT_ref, mT_ref,                                       # outputs
    caug_ref,                                                            # VMEM scratch
    *, eps: float, compute_dtype, approx_reciprocal: bool,
):
    cb = pl.program_id(1)
    KC, L, DQK = q_ref.shape
    DHV = h_ref.shape[2]
    qk_scale = float(DQK) ** -0.5

    # ---- (re)initialize the recurrent state at the first block of each head ----
    @pl.when(cb == 0)
    def _():
        caug_ref[:, :DHV] = c0_ref[...]          # C state
        caug_ref[:, DHV:] = n0_ref[...]          # n state (as an extra C column)
        mT_ref[...] = m0_ref[...]                # running max state

    row = lax.broadcasted_iota(jnp.int32, (L, L), 0)
    col = lax.broadcasted_iota(jnp.int32, (L, L), 1)
    causal = col <= row

    def chunk_body(j, carry):
        q = q_ref[j]                  # (L, DQK)     bf16
        kt = kt_ref[j]                # (DQK, L)     bf16, pre-transposed
        va = va_ref[j]                # (L, DHV+1)   bf16, last column == 1
        w_row = grow_ref[j]           # (1, L)       f32:  w = i - b
        gc = gcol_ref[j]              # (L, 4)       f32 cols: [b, cummax(w), w, 0]
        b_col = gc[:, 0:1]            # (L, 1)  cumulative log-forget within chunk
        cw_col = gc[:, 1:2]           # (L, 1)  running max_{s<=t}(i_s - b_s)
        m = mT_ref[...]               # (1, 1)  f32 running max state

        # ---- intra-chunk (parallel) part -------------------------------------
        mc = jnp.maximum(cw_col, m)                                    # (L, 1)
        matD = jnp.where(causal, jnp.exp(w_row - mc), 0.0)             # (L, L)
        s = jnp.dot(q, kt, preferred_element_type=jnp.float32)         # (L, L)
        intra = s * (qk_scale * matD)                                  # f32

        q_scale = qk_scale * jnp.exp(m - mc)                           # (L, 1)
        caug = caug_ref[...]                                           # (DQK, DHV+1) f32
        haug = (
            jnp.dot(q, caug.astype(compute_dtype),
                    preferred_element_type=jnp.float32) * q_scale
            + jnp.dot(intra.astype(compute_dtype), va,
                      preferred_element_type=jnp.float32)
        )                                                              # (L, DHV+1)
        numer = haug[:, :DHV]                                          # (L, DHV)
        denom = jnp.maximum(jnp.abs(haug[:, DHV:]),
                            jnp.exp(-(b_col + mc))) + eps              # (L, 1)
        if approx_reciprocal:
            h = numer * pl.reciprocal(denom, approx=True)
        else:
            h = numer / denom
        h_ref[j] = h.astype(h_ref.dtype)

        # ---- inter-chunk recurrent state update ------------------------------
        b_last = gc[L - 1:L, 0:1]                                      # (1, 1)
        wmax = gc[L - 1:L, 1:2]                                        # (1, 1) = max(w)
        mm = jnp.maximum(m, wmax)
        scale_old = jnp.exp(m - mm)
        kbar_t = kt.astype(jnp.float32) * jnp.exp(w_row - mm)          # (DQK, L)
        caug_ref[...] = scale_old * caug + jnp.dot(
            kbar_t.astype(compute_dtype), va,
            preferred_element_type=jnp.float32)                        # [C|n] update
        mT_ref[...] = b_last + mm
        return carry

    unroll = 2 if (KC > 1 and KC % 2 == 0) else 1
    lax.fori_loop(0, KC, chunk_body, 0, unroll=unroll)

    # ---- emit final states once per head (buffer is resident across cb) -------
    @pl.when(cb == pl.num_programs(1) - 1)
    def _():
        cT_ref[...] = caug_ref[:, :DHV]
        nT_ref[...] = caug_ref[:, DHV:]


# ----------------------------------------------------------------------------
# Wrapper == mLSTMBackend.forward (train mode, chunkwise--native_autograd)
# ----------------------------------------------------------------------------
def mlstm_backend_forward(q, k, v, i, f,
                          c_initial=None, n_initial=None, m_initial=None,
                          *, chunk_size=128, chunks_per_block=None, eps=1e-6,
                          return_last_states=True,
                          autocast_kernel_dtype=jnp.bfloat16,
                          approx_reciprocal=True):
    B, NH, S, DQK = q.shape
    DHV = v.shape[-1]
    assert S % chunk_size == 0, "train mode requires S % chunk_size == 0"
    L = chunk_size
    NC = S // L
    BH = B * NH

    if chunks_per_block is None:
        # Largest divisor of NC with KC*L <= ~2048 rows per grid step
        # (amortizes per-step overhead; stays well under the v7x VMEM budget).
        target_rows = 2048
        chunks_per_block = 1
        for kc in range(min(NC, max(1, target_rows // L)), 0, -1):
            if NC % kc == 0:
                chunks_per_block = kc
                break
    KC = chunks_per_block
    assert NC % KC == 0, "num_chunks must be divisible by chunks_per_block"
    NCB = NC // KC

    cdt = autocast_kernel_dtype if autocast_kernel_dtype is not None else q.dtype
    out_dtype = cdt  # h in the autocast compute dtype (lane-dense bf16 stores)

    # --- matmul operands, chunk-major, autocast to the kernel compute dtype ---
    qf = q.reshape(BH, NC, L, DQK).astype(cdt)
    ktf = jnp.swapaxes(k.reshape(BH, NC, L, DQK), -1, -2).astype(cdt)   # (BH,NC,DQK,L)
    vf = v.reshape(BH, NC, L, DHV).astype(cdt)
    va = jnp.concatenate([vf, jnp.ones((BH, NC, L, 1), cdt)], axis=-1)  # [v | 1]

    # --- gate preprocessing in fp32 (once, in XLA), both lane layouts ---------
    ig = i.reshape(BH, NC, L).astype(jnp.float32)
    fl = jax.nn.log_sigmoid(f.reshape(BH, NC, L).astype(jnp.float32))
    b = jnp.cumsum(fl, axis=-1)                     # per-chunk cumulative log-forget
    w = ig - b                                      # i - b
    cw = lax.cummax(w, axis=2)                      # running max_{s<=t}(i_s - b_s)
    g_row = w[:, :, None, :]                                        # (BH, NC, 1, L)
    g_col = jnp.stack([b, cw, w, jnp.zeros_like(b)], axis=-1)       # (BH, NC, L, 4)

    c0 = (jnp.zeros((BH, DQK, DHV), jnp.float32) if c_initial is None
          else c_initial.reshape(BH, DQK, DHV).astype(jnp.float32))
    n0 = (jnp.zeros((BH, DQK, 1), jnp.float32) if n_initial is None
          else n_initial.reshape(BH, DQK, 1).astype(jnp.float32))
    m0 = (jnp.zeros((BH, 1, 1), jnp.float32) if m_initial is None
          else m_initial.reshape(BH, 1, 1).astype(jnp.float32))

    kernel = functools.partial(_mlstm_chunkwise_kernel, eps=eps,
                               compute_dtype=cdt,
                               approx_reciprocal=approx_reciprocal)

    out_shapes = (
        jax.ShapeDtypeStruct((BH, NC, L, DHV), out_dtype),       # h
        jax.ShapeDtypeStruct((BH, DQK, DHV), jnp.float32),       # c_last
        jax.ShapeDtypeStruct((BH, DQK, 1), jnp.float32),         # n_last
        jax.ShapeDtypeStruct((BH, 1, 1), jnp.float32),           # m_last
    )

    grid_spec = pltpu.PrefetchScalarGridSpec(
        num_scalar_prefetch=0,
        grid=(BH, NCB),
        in_specs=[
            pl.BlockSpec((None, KC, L, DQK), lambda h, c: (h, c, 0, 0)),       # q
            pl.BlockSpec((None, KC, DQK, L), lambda h, c: (h, c, 0, 0)),       # k^T
            pl.BlockSpec((None, KC, L, DHV + 1), lambda h, c: (h, c, 0, 0)),   # [v|1]
            pl.BlockSpec((None, KC, 1, L), lambda h, c: (h, c, 0, 0)),         # gates (row)
            pl.BlockSpec((None, KC, L, 4), lambda h, c: (h, c, 0, 0)),         # gates (col)
            pl.BlockSpec((None, DQK, DHV), lambda h, c: (h, 0, 0)),            # c_initial
            pl.BlockSpec((None, DQK, 1), lambda h, c: (h, 0, 0)),              # n_initial
            pl.BlockSpec((None, 1, 1), lambda h, c: (h, 0, 0)),                # m_initial
        ],
        out_specs=[
            pl.BlockSpec((None, KC, L, DHV), lambda h, c: (h, c, 0, 0)),       # h
            pl.BlockSpec((None, DQK, DHV), lambda h, c: (h, 0, 0)),            # c_last
            pl.BlockSpec((None, DQK, 1), lambda h, c: (h, 0, 0)),              # n_last
            pl.BlockSpec((None, 1, 1), lambda h, c: (h, 0, 0)),                # m_last
        ],
        scratch_shapes=[pltpu.VMEM((DQK, DHV + 1), jnp.float32)],              # [C | n]
    )

    h, cT, nT, mT = pl.pallas_call(
        kernel,
        out_shape=out_shapes,
        grid_spec=grid_spec,
        compiler_params=pltpu.CompilerParams(
            # Head axis parallel (megacore); chunk-block axis MUST stay the
            # innermost, sequential ("arbitrary") axis for the recurrence.
            dimension_semantics=("parallel", "arbitrary"),
            vmem_limit_bytes=48 * 1024 * 1024),
    )(qf, ktf, va, g_row, g_col, c0, n0, m0)

    h = h.reshape(B, NH, S, DHV)
    if not return_last_states:
        return h
    c_last = cT.reshape(B, NH, DQK, DHV)
    n_last = nT.reshape(B, NH, DQK)
    m_last = mT.reshape(B, NH, 1)
    return h, (c_last, n_last, m_last)


# ----------------------------------------------------------------------------
# Pure-JAX fp32 reference (same chunkwise--native math) for a sanity check.
# ----------------------------------------------------------------------------
def _reference(q, k, v, i, f, chunk_size, eps):
    B, NH, S, DQK = q.shape
    DHV = v.shape[-1]
    BH = B * NH
    L = chunk_size
    NC = S // L
    qk_scale = float(DQK) ** -0.5

    qf = q.reshape(BH, S, DQK).astype(jnp.float32)
    kf = k.reshape(BH, S, DQK).astype(jnp.float32)
    vf = v.reshape(BH, S, DHV).astype(jnp.float32)
    ig = i.reshape(BH, S).astype(jnp.float32)
    fl = jax.nn.log_sigmoid(f.reshape(BH, S).astype(jnp.float32))

    idx = jnp.arange(L)
    mask = idx[:, None] >= idx[None, :]

    C = jnp.zeros((BH, DQK, DHV), jnp.float32)
    N = jnp.zeros((BH, DQK), jnp.float32)
    M = jnp.zeros((BH,), jnp.float32)
    hs = []
    ein = functools.partial(jnp.einsum, precision=lax.Precision.HIGHEST)
    for c in range(NC):
        sl = slice(c * L, (c + 1) * L)
        qc, kc, vc = qf[:, sl], kf[:, sl], vf[:, sl]
        ic, flc = ig[:, sl], fl[:, sl]
        b = jnp.cumsum(flc, axis=-1)
        logD = b[:, :, None] - b[:, None, :] + ic[:, None, :]
        logD = jnp.where(mask[None], logD, -jnp.inf)
        m_comb = jnp.maximum(b + M[:, None], logD.max(-1))
        Smat = ein('btd,bsd->bts', qc, kc) * qk_scale
        intra = Smat * jnp.exp(logD - m_comb[:, :, None])
        q_bar = qc * (qk_scale * jnp.exp(b + M[:, None] - m_comb))[:, :, None]
        numer = ein('btd,bdh->bth', q_bar, C) + ein('bts,bsh->bth', intra, vc)
        denom = ein('btd,bd->bt', q_bar, N) + intra.sum(-1)
        denom = jnp.maximum(jnp.abs(denom), jnp.exp(-m_comb)) + eps
        hs.append(numer / denom[:, :, None])
        g = b[:, -1]
        vecA = (g[:, None] - b) + ic
        m_next = jnp.maximum(g + M, vecA.max(-1))
        k_bar = kc * jnp.exp(vecA - m_next[:, None])[:, :, None]
        scale_old = jnp.exp(g + M - m_next)
        C = scale_old[:, None, None] * C + ein('bsd,bsh->bdh', k_bar, vc)
        N = scale_old[:, None] * N + k_bar.sum(1)
        M = m_next
    h = jnp.concatenate(hs, axis=1).reshape(B, NH, S, DHV).astype(q.dtype)
    return h, (C.reshape(B, NH, DQK, DHV), N.reshape(B, NH, DQK),
               M.reshape(B, NH, 1))


if __name__ == "__main__":
    B, NH, S, DQK, DHV = 2, 2, 512, 64, 64
    CHUNK = 128

    key = jax.random.PRNGKey(0)
    kq, kk, kv, ki, kf_ = jax.random.split(key, 5)
    q = jax.random.normal(kq, (B, NH, S, DQK), jnp.float32)
    k = jax.random.normal(kk, (B, NH, S, DQK), jnp.float32)
    v = jax.random.normal(kv, (B, NH, S, DHV), jnp.float32)
    i = jax.random.normal(ki, (B, NH, S), jnp.float32)
    f = jax.random.normal(kf_, (B, NH, S), jnp.float32) + 1.0

    # Full run: chunks_per_block=2 -> grid (BH, 2) exercises the cross-grid-step
    # state carry through the VMEM scratch and the resident m block.
    h, (c_last, n_last, m_last) = mlstm_backend_forward(
        q, k, v, i, f, chunk_size=CHUNK, chunks_per_block=2,
        eps=1e-6, return_last_states=True)
    jax.block_until_ready((h, c_last, n_last, m_last))

    # Split run: second half seeded with the first half's returned states.
    # Must reproduce the full run (state hand-off semantics of the module).
    h1, (c1, n1, m1) = mlstm_backend_forward(
        q[:, :, :S // 2], k[:, :, :S // 2], v[:, :, :S // 2],
        i[:, :, :S // 2], f[:, :, :S // 2], chunk_size=CHUNK, eps=1e-6)
    h2, (c2, n2, m2) = mlstm_backend_forward(
        q[:, :, S // 2:], k[:, :, S // 2:], v[:, :, S // 2:],
        i[:, :, S // 2:], f[:, :, S // 2:],
        c_initial=c1, n_initial=n1, m_initial=m1, chunk_size=CHUNK, eps=1e-6)
    h_split = jnp.concatenate([h1, h2], axis=2)
    jax.block_until_ready(h_split)

    # Reference: fp32 math on the same bf16-rounded q/k/v (autocast semantics).
    qb = q.astype(jnp.bfloat16).astype(jnp.float32)
    kb = k.astype(jnp.bfloat16).astype(jnp.float32)
    vb = v.astype(jnp.bfloat16).astype(jnp.float32)
    h_ref, (c_ref, n_ref, m_ref) = _reference(qb, kb, vb, i, f, CHUNK, 1e-6)

    def relerr(a, b):
        a = jnp.asarray(a, jnp.float32)
        b = jnp.asarray(b, jnp.float32)
        return float(jnp.max(jnp.abs(a - b)) / (jnp.max(jnp.abs(b)) + 1e-6))

    assert h.shape == (B, NH, S, DHV)
    assert c_last.shape == (B, NH, DQK, DHV)
    assert n_last.shape == (B, NH, DQK)
    assert m_last.shape == (B, NH, 1)

    assert relerr(h, h_ref) < 5e-2, f"h relerr {relerr(h, h_ref)}"
    assert relerr(c_last, c_ref) < 6e-2, f"c relerr {relerr(c_last, c_ref)}"
    assert relerr(n_last, n_ref) < 6e-2, f"n relerr {relerr(n_last, n_ref)}"
    assert relerr(m_last, m_ref) < 2e-3, f"m relerr {relerr(m_last, m_ref)}"

    assert relerr(h_split, h) < 1e-2, f"split h relerr {relerr(h_split, h)}"
    assert relerr(c2, c_last) < 1e-2, f"split c relerr {relerr(c2, c_last)}"
    assert relerr(m2, m_last) < 1e-3, f"split m relerr {relerr(m2, m_last)}"

    print("KERNEL_OK")
</pallas_src>

<mosaic_0001>
module attributes {stable_mosaic.version = 11 : i64} {
  func.func @_mlstm_chunkwise_kernel(%arg0: i32, %arg1: i32, %arg2: memref<1x2x128x64xbf16, #tpu.memory_space<vmem>>, %arg3: memref<1x2x64x128xbf16, #tpu.memory_space<vmem>>, %arg4: memref<1x2x128x65xbf16, #tpu.memory_space<vmem>>, %arg5: memref<1x2x1x128xf32, #tpu.memory_space<vmem>>, %arg6: memref<1x2x128x4xf32, #tpu.memory_space<vmem>>, %arg7: memref<1x64x64xf32, #tpu.memory_space<vmem>>, %arg8: memref<1x64x1xf32, #tpu.memory_space<vmem>>, %arg9: memref<1x1x1xf32, #tpu.memory_space<vmem>>, %arg10: memref<1x2x128x64xbf16, #tpu.memory_space<vmem>>, %arg11: memref<1x64x64xf32, #tpu.memory_space<vmem>>, %arg12: memref<1x64x1xf32, #tpu.memory_space<vmem>>, %arg13: memref<1x1x1xf32, #tpu.memory_space<vmem>>, %arg14: memref<64x65xf32, #tpu.memory_space<vmem>>) attributes {dimension_semantics = [#tpu.dimension_semantics<parallel>, #tpu.dimension_semantics<arbitrary>], iteration_bounds = array<i64: 4, 2>, scalar_prefetch = 0 : i64, scratch_operands = 1 : i64, tpu.core_type = #tpu.core_type<tc>, window_params = [{transform_indices = @transform_0, window_bounds = array<i64: 1, 2, 128, 64>}, {transform_indices = @transform_1, window_bounds = array<i64: 1, 2, 64, 128>}, {transform_indices = @transform_2, window_bounds = array<i64: 1, 2, 128, 65>}, {transform_indices = @transform_3, window_bounds = array<i64: 1, 2, 1, 128>}, {transform_indices = @transform_4, window_bounds = array<i64: 1, 2, 128, 4>}, {transform_indices = @transform_5, window_bounds = array<i64: 1, 64, 64>}, {transform_indices = @transform_6, window_bounds = array<i64: 1, 64, 1>}, {transform_indices = @transform_7, window_bounds = array<i64: 1, 1, 1>}, {transform_indices = @transform_8, window_bounds = array<i64: 1, 2, 128, 64>}, {transform_indices = @transform_9, window_bounds = array<i64: 1, 64, 64>}, {transform_indices = @transform_10, window_bounds = array<i64: 1, 64, 1>}, {transform_indices = @transform_11, window_bounds = array<i64: 1, 1, 1>}]} {
    %c0_i32 = arith.constant 0 : i32
    %0 = arith.cmpi eq, %arg1, %c0_i32 : i32
    %1 = arith.extui %0 : i1 to i32
    %c0_i32_0 = arith.constant 0 : i32
    %2 = arith.cmpi ne, %1, %c0_i32_0 : i32
    scf.if %2 {
      %c0_76 = arith.constant 0 : index
      %c0_77 = arith.constant 0 : index
      %c0_78 = arith.constant 0 : index
      %175 = vector.load %arg7[%c0_76, %c0_77, %c0_78] : memref<1x64x64xf32, #tpu.memory_space<vmem>>, vector<1x64x64xf32>
      %176 = vector.shape_cast %175 : vector<1x64x64xf32> to vector<64x64xf32>
      %c0_79 = arith.constant 0 : index
      %c0_80 = arith.constant 0 : index
      %177 = vector.load %arg14[%c0_79, %c0_80] : memref<64x65xf32, #tpu.memory_space<vmem>>, vector<64x64xf32>
      tpu.vector_store %arg14[%c0_79, %c0_80], %176 {strides = array<i32>} : memref<64x65xf32, #tpu.memory_space<vmem>>, vector<64x64xf32>,
      %c0_81 = arith.constant 0 : index
      %c0_82 = arith.constant 0 : index
      %c0_83 = arith.constant 0 : index
      %178 = vector.load %arg8[%c0_81, %c0_82, %c0_83] : memref<1x64x1xf32, #tpu.memory_space<vmem>>, vector<1x64x1xf32>
      %179 = vector.shape_cast %178 : vector<1x64x1xf32> to vector<64x1xf32>
      %c0_84 = arith.constant 0 : index
      %c64 = arith.constant 64 : index
      %180 = vector.load %arg14[%c0_84, %c64] : memref<64x65xf32, #tpu.memory_space<vmem>>, vector<64x1xf32>
      tpu.vector_store %arg14[%c0_84, %c64], %179 {strides = array<i32>} : memref<64x65xf32, #tpu.memory_space<vmem>>, vector<64x1xf32>,
      %c0_85 = arith.constant 0 : index
      %c0_86 = arith.constant 0 : index
      %c0_87 = arith.constant 0 : index
      %181 = vector.load %arg9[%c0_85, %c0_86, %c0_87] : memref<1x1x1xf32, #tpu.memory_space<vmem>>, vector<1x1x1xf32>
      %182 = vector.shape_cast %181 : vector<1x1x1xf32> to vector<1x1xf32>
      %c0_88 = arith.constant 0 : index
      %c0_89 = arith.constant 0 : index
      %c0_90 = arith.constant 0 : index
      %183 = vector.load %arg13[%c0_88, %c0_89, %c0_90] : memref<1x1x1xf32, #tpu.memory_space<vmem>>, vector<1x1x1xf32>
      %184 = vector.shape_cast %183 : vector<1x1x1xf32> to vector<1x1xf32>
      %185 = vector.shape_cast %182 : vector<1x1xf32> to vector<1x1x1xf32>
      tpu.vector_store %arg13[%c0_88, %c0_89, %c0_90], %185 {strides = array<i32>} : memref<1x1x1xf32, #tpu.memory_space<vmem>>, vector<1x1x1xf32>,
    } else {
    }
    %3 = tpu.iota {dimensions = array<i32: 0>} : vector<128x128xi32>
    %4 = tpu.iota {dimensions = array<i32: 1>} : vector<128x128xi32>
    %5 = arith.cmpi sle, %4, %3 : vector<128x128xi32>
    %c0_i32_1 = arith.constant 0 : i32
    %c0 = arith.constant 0 : index
    %6 = arith.index_cast %c0_i32_1 : i32 to index
    %c0_2 = arith.constant 0 : index
    %c0_3 = arith.constant 0 : index
    %7 = vector.load %arg2[%c0, %6, %c0_2, %c0_3] : memref<1x2x128x64xbf16, #tpu.memory_space<vmem>>, vector<1x1x128x64xbf16>
    %8 = vector.shape_cast %7 : vector<1x1x128x64xbf16> to vector<128x64xbf16>
    %c0_4 = arith.constant 0 : index
    %9 = arith.index_cast %c0_i32_1 : i32 to index
    %c0_5 = arith.constant 0 : index
    %c0_6 = arith.constant 0 : index
    %10 = vector.load %arg3[%c0_4, %9, %c0_5, %c0_6] : memref<1x2x64x128xbf16, #tpu.memory_space<vmem>>, vector<1x1x64x128xbf16>
    %11 = vector.shape_cast %10 : vector<1x1x64x128xbf16> to vector<64x128xbf16>
    %c0_7 = arith.constant 0 : index
    %12 = arith.index_cast %c0_i32_1 : i32 to index
    %c0_8 = arith.constant 0 : index
    %c0_9 = arith.constant 0 : index
    %13 = vector.load %arg4[%c0_7, %12, %c0_8, %c0_9] : memref<1x2x128x65xbf16, #tpu.memory_space<vmem>>, vector<1x1x128x65xbf16>
    %14 = vector.shape_cast %13 : vector<1x1x128x65xbf16> to vector<128x65xbf16>
    %c0_10 = arith.constant 0 : index
    %15 = arith.index_cast %c0_i32_1 : i32 to index
    %c0_11 = arith.constant 0 : index
    %c0_12 = arith.constant 0 : index
    %16 = vector.load %arg5[%c0_10, %15, %c0_11, %c0_12] : memref<1x2x1x128xf32, #tpu.memory_space<vmem>>, vector<1x1x1x128xf32>
    %17 = vector.shape_cast %16 : vector<1x1x1x128xf32> to vector<1x128xf32>
    %c0_13 = arith.constant 0 : index
    %18 = arith.index_cast %c0_i32_1 : i32 to index
    %c0_14 = arith.constant 0 : index
    %c0_15 = arith.constant 0 : index
    %19 = vector.load %arg6[%c0_13, %18, %c0_14, %c0_15] : memref<1x2x128x4xf32, #tpu.memory_space<vmem>>, vector<1x1x128x4xf32>
    %20 = vector.shape_cast %19 : vector<1x1x128x4xf32> to vector<128x4xf32>
    %21 = vector.extract_strided_slice %20 {offsets = [0, 0], sizes = [128, 1], strides = [1, 1]} : vector<128x4xf32> to vector<128x1xf32>
    %22 = vector.extract_strided_slice %20 {offsets = [0, 1], sizes = [128, 1], strides = [1, 1]} : vector<128x4xf32> to vector<128x1xf32>
    %c0_16 = arith.constant 0 : index
    %c0_17 = arith.constant 0 : index
    %c0_18 = arith.constant 0 : index
    %23 = vector.load %arg13[%c0_16, %c0_17, %c0_18] : memref<1x1x1xf32, #tpu.memory_space<vmem>>, vector<1x1x1xf32>
    %24 = vector.shape_cast %23 : vector<1x1x1xf32> to vector<1x1xf32>
    %25 = vector.broadcast %24 : vector<1x1xf32> to vector<128x1xf32>
    %26 = arith.maximumf %22, %25 : vector<128x1xf32>
    %27 = vector.broadcast %17 : vector<1x128xf32> to vector<128x128xf32>
    %28 = vector.broadcast %26 : vector<128x1xf32> to vector<128x128xf32>
    %29 = arith.subf %27, %28 : vector<128x128xf32>
    %30 = math.exp %29 : vector<128x128xf32>
    %cst = arith.constant 0.000000e+00 : f32
    %31 = vector.broadcast %cst : f32 to vector<128x128xf32>
    %32 = arith.select %5, %30, %31 : vector<128x128xi1>, vector<128x128xf32>
    %cst_19 = arith.constant dense<0.000000e+00> : vector<128x128xf32>
    %33 = tpu.matmul %8, %11, %cst_19 {dimension_numbers = #tpu.dot_dimension_numbers<[1], [0], [0], [1], [0, 0, 1, 1], [], []>} : vector<128x64xbf16>, vector<64x128xbf16>, vector<128x128xf32> -> vector<128x128xf32>
    %cst_20 = arith.constant 1.250000e-01 : f32
    %34 = vector.broadcast %cst_20 : f32 to vector<128x128xf32>
    %35 = arith.mulf %34, %32 : vector<128x128xf32>
    %36 = arith.mulf %33, %35 : vector<128x128xf32>
    %37 = vector.broadcast %24 : vector<1x1xf32> to vector<128x1xf32>
    %38 = arith.subf %37, %26 : vector<128x1xf32>
    %39 = math.exp %38 : vector<128x1xf32>
    %cst_21 = arith.constant 1.250000e-01 : f32
    %40 = vector.broadcast %cst_21 : f32 to vector<128x1xf32>
    %41 = arith.mulf %40, %39 : vector<128x1xf32>
    %c0_22 = arith.constant 0 : index
    %c0_23 = arith.constant 0 : index
    %42 = vector.load %arg14[%c0_22, %c0_23] : memref<64x65xf32, #tpu.memory_space<vmem>>, vector<64x65xf32>
    %43 = arith.truncf %42 : vector<64x65xf32> to vector<64x65xbf16>
    %cst_24 = arith.constant dense<0.000000e+00> : vector<128x65xf32>
    %44 = tpu.matmul %8, %43, %cst_24 {dimension_numbers = #tpu.dot_dimension_numbers<[1], [0], [0], [1], [0, 0, 1, 1], [], []>} : vector<128x64xbf16>, vector<64x65xbf16>, vector<128x65xf32> -> vector<128x65xf32>
    %45 = vector.broadcast %41 : vector<128x1xf32> to vector<128x65xf32>
    %46 = arith.mulf %44, %45 : vector<128x65xf32>
    %47 = arith.truncf %36 : vector<128x128xf32> to vector<128x128xbf16>
    %cst_25 = arith.constant dense<0.000000e+00> : vector<128x65xf32>
    %48 = tpu.matmul %47, %14, %cst_25 {dimension_numbers = #tpu.dot_dimension_numbers<[1], [0], [0], [1], [0, 0, 1, 1], [], []>} : vector<128x128xbf16>, vector<128x65xbf16>, vector<128x65xf32> -> vector<128x65xf32>
    %49 = arith.addf %46, %48 : vector<128x65xf32>
    %50 = vector.extract_strided_slice %49 {offsets = [0, 0], sizes = [128, 64], strides = [1, 1]} : vector<128x65xf32> to vector<128x64xf32>
    %51 = vector.extract_strided_slice %49 {offsets = [0, 64], sizes = [128, 1], strides = [1, 1]} : vector<128x65xf32> to vector<128x1xf32>
    %52 = math.absf %51 : vector<128x1xf32>
    %53 = arith.addf %21, %26 : vector<128x1xf32>
    %cst_26 = arith.constant 0.000000e+00 : f32
    %54 = vector.broadcast %cst_26 : f32 to vector<128x1xf32>
    %55 = arith.subf %54, %53 : vector<128x1xf32>
    %56 = math.exp %55 : vector<128x1xf32>
    %57 = arith.maximumf %52, %56 : vector<128x1xf32>
    %cst_27 = arith.constant 9.99999997E-7 : f32
    %58 = vector.broadcast %cst_27 : f32 to vector<128x1xf32>
    %59 = arith.addf %57, %58 : vector<128x1xf32>
    %60 = tpu.reciprocal %59 {approx = true} : vector<128x1xf32> -> vector<128x1xf32>
    %61 = vector.broadcast %60 : vector<128x1xf32> to vector<128x64xf32>
    %62 = arith.mulf %50, %61 : vector<128x64xf32>
    %63 = arith.truncf %62 : vector<128x64xf32> to vector<128x64xbf16>
    %c0_28 = arith.constant 0 : index
    %64 = arith.index_cast %c0_i32_1 : i32 to index
    %c0_29 = arith.constant 0 : index
    %c0_30 = arith.constant 0 : index
    %65 = vector.load %arg10[%c0_28, %64, %c0_29, %c0_30] : memref<1x2x128x64xbf16, #tpu.memory_space<vmem>>, vector<1x1x128x64xbf16>
    %66 = vector.shape_cast %65 : vector<1x1x128x64xbf16> to vector<128x64xbf16>
    %67 = vector.shape_cast %63 : vector<128x64xbf16> to vector<1x1x128x64xbf16>
    tpu.vector_store %arg10[%c0_28, %64, %c0_29, %c0_30], %67 {strides = array<i32>} : memref<1x2x128x64xbf16, #tpu.memory_space<vmem>>, vector<1x1x128x64xbf16>,
    %68 = vector.extract_strided_slice %20 {offsets = [127, 0], sizes = [1, 1], strides = [1, 1]} : vector<128x4xf32> to vector<1x1xf32>
    %69 = vector.extract_strided_slice %20 {offsets = [127, 1], sizes = [1, 1], strides = [1, 1]} : vector<128x4xf32> to vector<1x1xf32>
    %70 = arith.maximumf %24, %69 : vector<1x1xf32>
    %71 = arith.subf %24, %70 : vector<1x1xf32>
    %72 = math.exp %71 : vector<1x1xf32>
    %73 = arith.extf %11 : vector<64x128xbf16> to vector<64x128xf32>
    %74 = vector.broadcast %70 : vector<1x1xf32> to vector<1x128xf32>
    %75 = arith.subf %17, %74 : vector<1x128xf32>
    %76 = math.exp %75 : vector<1x128xf32>
    %77 = vector.broadcast %76 : vector<1x128xf32> to vector<64x128xf32>
    %78 = arith.mulf %73, %77 : vector<64x128xf32>
    %79 = vector.broadcast %72 : vector<1x1xf32> to vector<64x65xf32>
    %80 = arith.mulf %79, %42 : vector<64x65xf32>
    %81 = arith.truncf %78 : vector<64x128xf32> to vector<64x128xbf16>
    %cst_31 = arith.constant dense<0.000000e+00> : vector<64x65xf32>
    %82 = tpu.matmul %81, %14, %cst_31 {dimension_numbers = #tpu.dot_dimension_numbers<[1], [0], [0], [1], [0, 0, 1, 1], [], []>} : vector<64x128xbf16>, vector<128x65xbf16>, vector<64x65xf32> -> vector<64x65xf32>
    %83 = arith.addf %80, %82 : vector<64x65xf32>
    %c0_32 = arith.constant 0 : index
    %c0_33 = arith.constant 0 : index
    %84 = vector.load %arg14[%c0_32, %c0_33] : memref<64x65xf32, #tpu.memory_space<vmem>>, vector<64x65xf32>
    tpu.vector_store %arg14[%c0_32, %c0_33], %83 {strides = array<i32>} : memref<64x65xf32, #tpu.memory_space<vmem>>, vector<64x65xf32>,
    %85 = arith.addf %68, %70 : vector<1x1xf32>
    %c0_34 = arith.constant 0 : index
    %c0_35 = arith.constant 0 : index
    %c0_36 = arith.constant 0 : index
    %86 = vector.load %arg13[%c0_34, %c0_35, %c0_36] : memref<1x1x1xf32, #tpu.memory_space<vmem>>, vector<1x1x1xf32>
    %87 = vector.shape_cast %86 : vector<1x1x1xf32> to vector<1x1xf32>
    %88 = vector.shape_cast %85 : vector<1x1xf32> to vector<1x1x1xf32>
    tpu.vector_store %arg13[%c0_34, %c0_35, %c0_36], %88 {strides = array<i32>} : memref<1x1x1xf32, #tpu.memory_space<vmem>>, vector<1x1x1xf32>,
    %c1_i32 = arith.constant 1 : i32
    %c0_37 = arith.constant 0 : index
    %89 = arith.index_cast %c1_i32 : i32 to index
    %c0_38 = arith.constant 0 : index
    %c0_39 = arith.constant 0 : index
    %90 = vector.load %arg2[%c0_37, %89, %c0_38, %c0_39] : memref<1x2x128x64xbf16, #tpu.memory_space<vmem>>, vector<1x1x128x64xbf16>
    %91 = vector.shape_cast %90 : vector<1x1x128x64xbf16> to vector<128x64xbf16>
    %c0_40 = arith.constant 0 : index
    %92 = arith.index_cast %c1_i32 : i32 to index
    %c0_41 = arith.constant 0 : index
    %c0_42 = arith.constant 0 : index
    %93 = vector.load %arg3[%c0_40, %92, %c0_41, %c0_42] : memref<1x2x64x128xbf16, #tpu.memory_space<vmem>>, vector<1x1x64x128xbf16>
    %94 = vector.shape_cast %93 : vector<1x1x64x128xbf16> to vector<64x128xbf16>
    %c0_43 = arith.constant 0 : index
    %95 = arith.index_cast %c1_i32 : i32 to index
    %c0_44 = arith.constant 0 : index
    %c0_45 = arith.constant 0 : index
    %96 = vector.load %arg4[%c0_43, %95, %c0_44, %c0_45] : memref<1x2x128x65xbf16, #tpu.memory_space<vmem>>, vector<1x1x128x65xbf16>
    %97 = vector.shape_cast %96 : vector<1x1x128x65xbf16> to vector<128x65xbf16>
    %c0_46 = arith.constant 0 : index
    %98 = arith.index_cast %c1_i32 : i32 to index
    %c0_47 = arith.constant 0 : index
    %c0_48 = arith.constant 0 : index
    %99 = vector.load %arg5[%c0_46, %98, %c0_47, %c0_48] : memref<1x2x1x128xf32, #tpu.memory_space<vmem>>, vector<1x1x1x128xf32>
    %100 = vector.shape_cast %99 : vector<1x1x1x128xf32> to vector<1x128xf32>
    %c0_49 = arith.constant 0 : index
    %101 = arith.index_cast %c1_i32 : i32 to index
    %c0_50 = arith.constant 0 : index
    %c0_51 = arith.constant 0 : index
    %102 = vector.load %arg6[%c0_49, %101, %c0_50, %c0_51] : memref<1x2x128x4xf32, #tpu.memory_space<vmem>>, vector<1x1x128x4xf32>
    %103 = vector.shape_cast %102 : vector<1x1x128x4xf32> to vector<128x4xf32>
    %104 = vector.extract_strided_slice %103 {offsets = [0, 0], sizes = [128, 1], strides = [1, 1]} : vector<128x4xf32> to vector<128x1xf32>
    %105 = vector.extract_strided_slice %103 {offsets = [0, 1], sizes = [128, 1], strides = [1, 1]} : vector<128x4xf32> to vector<128x1xf32>
    %c0_52 = arith.constant 0 : index
    %c0_53 = arith.constant 0 : index
    %c0_54 = arith.constant 0 : index
    %106 = vector.load %arg13[%c0_52, %c0_53, %c0_54] : memref<1x1x1xf32, #tpu.memory_space<vmem>>, vector<1x1x1xf32>
    %107 = vector.shape_cast %106 : vector<1x1x1xf32> to vector<1x1xf32>
    %108 = vector.broadcast %107 : vector<1x1xf32> to vector<128x1xf32>
    %109 = arith.maximumf %105, %108 : vector<128x1xf32>
    %110 = vector.broadcast %100 : vector<1x128xf32> to vector<128x128xf32>
    %111 = vector.broadcast %109 : vector<128x1xf32> to vector<128x128xf32>
    %112 = arith.subf %110, %111 : vector<128x128xf32>
    %113 = math.exp %112 : vector<128x128xf32>
    %cst_55 = arith.constant 0.000000e+00 : f32
    %114 = vector.broadcast %cst_55 : f32 to vector<128x128xf32>
    %115 = arith.select %5, %113, %114 : vector<128x128xi1>, vector<128x128xf32>
    %cst_56 = arith.constant dense<0.000000e+00> : vector<128x128xf32>
    %116 = tpu.matmul %91, %94, %cst_56 {dimension_numbers = #tpu.dot_dimension_numbers<[1], [0], [0], [1], [0, 0, 1, 1], [], []>} : vector<128x64xbf16>, vector<64x128xbf16>, vector<128x128xf32> -> vector<128x128xf32>
    %cst_57 = arith.constant 1.250000e-01 : f32
    %117 = vector.broadcast %cst_57 : f32 to vector<128x128xf32>
    %118 = arith.mulf %117, %115 : vector<128x128xf32>
    %119 = arith.mulf %116, %118 : vector<128x128xf32>
    %120 = vector.broadcast %107 : vector<1x1xf32> to vector<128x1xf32>
    %121 = arith.subf %120, %109 : vector<128x1xf32>
    %122 = math.exp %121 : vector<128x1xf32>
    %cst_58 = arith.constant 1.250000e-01 : f32
    %123 = vector.broadcast %cst_58 : f32 to vector<128x1xf32>
    %124 = arith.mulf %123, %122 : vector<128x1xf32>
    %c0_59 = arith.constant 0 : index
    %c0_60 = arith.constant 0 : index
    %125 = vector.load %arg14[%c0_59, %c0_60] : memref<64x65xf32, #tpu.memory_space<vmem>>, vector<64x65xf32>
    %126 = arith.truncf %125 : vector<64x65xf32> to vector<64x65xbf16>
    %cst_61 = arith.constant dense<0.000000e+00> : vector<128x65xf32>
    %127 = tpu.matmul %91, %126, %cst_61 {dimension_numbers = #tpu.dot_dimension_numbers<[1], [0], [0], [1], [0, 0, 1, 1], [], []>} : vector<128x64xbf16>, vector<64x65xbf16>, vector<128x65xf32> -> vector<128x65xf32>
    %128 = vector.broadcast %124 : vector<128x1xf32> to vector<128x65xf32>
    %129 = arith.mulf %127, %128 : vector<128x65xf32>
    %130 = arith.truncf %119 : vector<128x128xf32> to vector<128x128xbf16>
    %cst_62 = arith.constant dense<0.000000e+00> : vector<128x65xf32>
    %131 = tpu.matmul %130, %97, %cst_62 {dimension_numbers = #tpu.dot_dimension_numbers<[1], [0], [0], [1], [0, 0, 1, 1], [], []>} : vector<128x128xbf16>, vector<128x65xbf16>, vector<128x65xf32> -> vector<128x65xf32>
    %132 = arith.addf %129, %131 : vector<128x65xf32>
    %133 = vector.extract_strided_slice %132 {offsets = [0, 0], sizes = [128, 64], strides = [1, 1]} : vector<128x65xf32> to vector<128x64xf32>
    %134 = vector.extract_strided_slice %132 {offsets = [0, 64], sizes = [128, 1], strides = [1, 1]} : vector<128x65xf32> to vector<128x1xf32>
    %135 = math.absf %134 : vector<128x1xf32>
    %136 = arith.addf %104, %109 : vector<128x1xf32>
    %cst_63 = arith.constant 0.000000e+00 : f32
    %137 = vector.broadcast %cst_63 : f32 to vector<128x1xf32>
    %138 = arith.subf %137, %136 : vector<128x1xf32>
    %139 = math.exp %138 : vector<128x1xf32>
    %140 = arith.maximumf %135, %139 : vector<128x1xf32>
    %cst_64 = arith.constant 9.99999997E-7 : f32
    %141 = vector.broadcast %cst_64 : f32 to vector<128x1xf32>
    %142 = arith.addf %140, %141 : vector<128x1xf32>
    %143 = tpu.reciprocal %142 {approx = true} : vector<128x1xf32> -> vector<128x1xf32>
    %144 = vector.broadcast %143 : vector<128x1xf32> to vector<128x64xf32>
    %145 = arith.mulf %133, %144 : vector<128x64xf32>
    %146 = arith.truncf %145 : vector<128x64xf32> to vector<128x64xbf16>
    %c0_65 = arith.constant 0 : index
    %147 = arith.index_cast %c1_i32 : i32 to index
    %c0_66 = arith.constant 0 : index
    %c0_67 = arith.constant 0 : index
    %148 = vector.load %arg10[%c0_65, %147, %c0_66, %c0_67] : memref<1x2x128x64xbf16, #tpu.memory_space<vmem>>, vector<1x1x128x64xbf16>
    %149 = vector.shape_cast %148 : vector<1x1x128x64xbf16> to vector<128x64xbf16>
    %150 = vector.shape_cast %146 : vector<128x64xbf16> to vector<1x1x128x64xbf16>
    tpu.vector_store %arg10[%c0_65, %147, %c0_66, %c0_67], %150 {strides = array<i32>} : memref<1x2x128x64xbf16, #tpu.memory_space<vmem>>, vector<1x1x128x64xbf16>,
    %151 = vector.extract_strided_slice %103 {offsets = [127, 0], sizes = [1, 1], strides = [1, 1]} : vector<128x4xf32> to vector<1x1xf32>
    %152 = vector.extract_strided_slice %103 {offsets = [127, 1], sizes = [1, 1], strides = [1, 1]} : vector<128x4xf32> to vector<1x1xf32>
    %153 = arith.maximumf %107, %152 : vector<1x1xf32>
    %154 = arith.subf %107, %153 : vector<1x1xf32>
    %155 = math.exp %154 : vector<1x1xf32>
    %156 = arith.extf %94 : vector<64x128xbf16> to vector<64x128xf32>
    %157 = vector.broadcast %153 : vector<1x1xf32> to vector<1x128xf32>
    %158 = arith.subf %100, %157 : vector<1x128xf32>
    %159 = math.exp %158 : vector<1x128xf32>
    %160 = vector.broadcast %159 : vector<1x128xf32> to vector<64x128xf32>
    %161 = arith.mulf %156, %160 : vector<64x128xf32>
    %162 = vector.broadcast %155 : vector<1x1xf32> to vector<64x65xf32>
    %163 = arith.mulf %162, %125 : vector<64x65xf32>
    %164 = arith.truncf %161 : vector<64x128xf32> to vector<64x128xbf16>
    %cst_68 = arith.constant dense<0.000000e+00> : vector<64x65xf32>
    %165 = tpu.matmul %164, %97, %cst_68 {dimension_numbers = #tpu.dot_dimension_numbers<[1], [0], [0], [1], [0, 0, 1, 1], [], []>} : vector<64x128xbf16>, vector<128x65xbf16>, vector<64x65xf32> -> vector<64x65xf32>
    %166 = arith.addf %163, %165 : vector<64x65xf32>
    %c0_69 = arith.constant 0 : index
    %c0_70 = arith.constant 0 : index
    %167 = vector.load %arg14[%c0_69, %c0_70] : memref<64x65xf32, #tpu.memory_space<vmem>>, vector<64x65xf32>
    tpu.vector_store %arg14[%c0_69, %c0_70], %166 {strides = array<i32>} : memref<64x65xf32, #tpu.memory_space<vmem>>, vector<64x65xf32>,
    %168 = arith.addf %151, %153 : vector<1x1xf32>
    %c0_71 = arith.constant 0 : index
    %c0_72 = arith.constant 0 : index
    %c0_73 = arith.constant 0 : index
    %169 = vector.load %arg13[%c0_71, %c0_72, %c0_73] : memref<1x1x1xf32, #tpu.memory_space<vmem>>, vector<1x1x1xf32>
    %170 = vector.shape_cast %169 : vector<1x1x1xf32> to vector<1x1xf32>
    %171 = vector.shape_cast %168 : vector<1x1xf32> to vector<1x1x1xf32>
    tpu.vector_store %arg13[%c0_71, %c0_72, %c0_73], %171 {strides = array<i32>} : memref<1x1x1xf32, #tpu.memory_space<vmem>>, vector<1x1x1xf32>,
    %c2_i32 = arith.constant 2 : i32
    %c1_i32_74 = arith.constant 1 : i32
    %172 = arith.cmpi eq, %arg1, %c1_i32_74 : i32
    %173 = arith.extui %172 : i1 to i32
    %c0_i32_75 = arith.constant 0 : i32
    %174 = arith.cmpi ne, %173, %c0_i32_75 : i32
    scf.if %174 {
      %c0_76 = arith.constant 0 : index
      %c0_77 = arith.constant 0 : index
      %175 = vector.load %arg14[%c0_76, %c0_77] : memref<64x65xf32, #tpu.memory_space<vmem>>, vector<64x64xf32>
      %c0_78 = arith.constant 0 : index
      %c0_79 = arith.constant 0 : index
      %c0_80 = arith.constant 0 : index
      %176 = vector.load %arg11[%c0_78, %c0_79, %c0_80] : memref<1x64x64xf32, #tpu.memory_space<vmem>>, vector<1x64x64xf32>
      %177 = vector.shape_cast %176 : vector<1x64x64xf32> to vector<64x64xf32>
      %178 = vector.shape_cast %175 : vector<64x64xf32> to vector<1x64x64xf32>
      tpu.vector_store %arg11[%c0_78, %c0_79, %c0_80], %178 {strides = array<i32>} : memref<1x64x64xf32, #tpu.memory_space<vmem>>, vector<1x64x64xf32>,
      %c0_81 = arith.constant 0 : index
      %c64 = arith.constant 64 : index
      %179 = vector.load %arg14[%c0_81, %c64] : memref<64x65xf32, #tpu.memory_space<vmem>>, vector<64x1xf32>
      %c0_82 = arith.constant 0 : index
      %c0_83 = arith.constant 0 : index
      %c0_84 = arith.constant 0 : index
      %180 = vector.load %arg12[%c0_82, %c0_83, %c0_84] : memref<1x64x1xf32, #tpu.memory_space<vmem>>, vector<1x64x1xf32>
      %181 = vector.shape_cast %180 : vector<1x64x1xf32> to vector<64x1xf32>
      %182 = vector.shape_cast %179 : vector<64x1xf32> to vector<1x64x1xf32>
      tpu.vector_store %arg12[%c0_82, %c0_83, %c0_84], %182 {strides = array<i32>} : memref<1x64x1xf32, #tpu.memory_space<vmem>>, vector<1x64x1xf32>,
    } else {
    }
    return
  }
  func.func @transform_0(%arg0: i32, %arg1: i32) -> (i32, i32, i32, i32) {
    %c0_i32 = arith.constant 0 : i32
    %c0_i32_0 = arith.constant 0 : i32
    %c0_i32_1 = arith.constant 0 : i32
    return %arg0, %arg1, %c0_i32, %c0_i32_0 : i32, i32, i32, i32
  }
  func.func @transform_1(%arg0: i32, %arg1: i32) -> (i32, i32, i32, i32) {
    %c0_i32 = arith.constant 0 : i32
    %c0_i32_0 = arith.constant 0 : i32
    %c0_i32_1 = arith.constant 0 : i32
    return %arg0, %arg1, %c0_i32, %c0_i32_0 : i32, i32, i32, i32
  }
  func.func @transform_2(%arg0: i32, %arg1: i32) -> (i32, i32, i32, i32) {
    %c0_i32 = arith.constant 0 : i32
    %c0_i32_0 = arith.constant 0 : i32
    %c0_i32_1 = arith.constant 0 : i32
    return %arg0, %arg1, %c0_i32, %c0_i32_0 : i32, i32, i32, i32
  }
  func.func @transform_3(%arg0: i32, %arg1: i32) -> (i32, i32, i32, i32) {
    %c0_i32 = arith.constant 0 : i32
    %c0_i32_0 = arith.constant 0 : i32
    %c0_i32_1 = arith.constant 0 : i32
    return %arg0, %arg1, %c0_i32, %c0_i32_0 : i32, i32, i32, i32
  }
  func.func @transform_4(%arg0: i32, %arg1: i32) -> (i32, i32, i32, i32) {
    %c0_i32 = arith.constant 0 : i32
    %c0_i32_0 = arith.constant 0 : i32
    %c0_i32_1 = arith.constant 0 : i32
    return %arg0, %arg1, %c0_i32, %c0_i32_0 : i32, i32, i32, i32
  }
  func.func @transform_5(%arg0: i32, %arg1: i32) -> (i32, i32, i32) {
    %c0_i32 = arith.constant 0 : i32
    %c0_i32_0 = arith.constant 0 : i32
    %c0_i32_1 = arith.constant 0 : i32
    return %arg0, %c0_i32, %c0_i32_0 : i32, i32, i32
  }
  func.func @transform_6(%arg0: i32, %arg1: i32) -> (i32, i32, i32) {
    %c0_i32 = arith.constant 0 : i32
    %c0_i32_0 = arith.constant 0 : i32
    %c0_i32_1 = arith.constant 0 : i32
    return %arg0, %c0_i32, %c0_i32_0 : i32, i32, i32
  }
  func.func @transform_7(%arg0: i32, %arg1: i32) -> (i32, i32, i32) {
    %c0_i32 = arith.constant 0 : i32
    %c0_i32_0 = arith.constant 0 : i32
    %c0_i32_1 = arith.constant 0 : i32
    return %arg0, %c0_i32, %c0_i32_0 : i32, i32, i32
  }
  func.func @transform_8(%arg0: i32, %arg1: i32) -> (i32, i32, i32, i32) {
    %c0_i32 = arith.constant 0 : i32
    %c0_i32_0 = arith.constant 0 : i32
    %c0_i32_1 = arith.constant 0 : i32
    return %arg0, %arg1, %c0_i32, %c0_i32_0 : i32, i32, i32, i32
  }
  func.func @transform_9(%arg0: i32, %arg1: i32) -> (i32, i32, i32) {
    %c0_i32 = arith.constant 0 : i32
    %c0_i32_0 = arith.constant 0 : i32
    %c0_i32_1 = arith.constant 0 : i32
    return %arg0, %c0_i32, %c0_i32_0 : i32, i32, i32
  }
  func.func @transform_10(%arg0: i32, %arg1: i32) -> (i32, i32, i32) {
    %c0_i32 = arith.constant 0 : i32
    %c0_i32_0 = arith.constant 0 : i32
    %c0_i32_1 = arith.constant 0 : i32
    return %arg0, %c0_i32, %c0_i32_0 : i32, i32, i32
  }
  func.func @transform_11(%arg0: i32, %arg1: i32) -> (i32, i32, i32) {
    %c0_i32 = arith.constant 0 : i32
    %c0_i32_0 = arith.constant 0 : i32
    %c0_i32_1 = arith.constant 0 : i32
    return %arg0, %c0_i32, %c0_i32_0 : i32, i32, i32
  }
}

</mosaic_0001>

<bundles_post_ra>
// kernel: tpu_custom_call.1
= control target key start
LH: loop header
LB: loop body
LE: loop exit
PB: predicated region body
PF: predicated region fallthrough
CT: control target
= control target key end

     0   :  { %s7005_s0 = inlined_call_operand.vmem [shape: bf16[4,4,128,64], index: 0, kind: input, shape index: {}]   ;;  %s7006_s1 = inlined_call_operand.vmem [shape: bf16[4,4,64,128], index: 1, kind: input, shape index: {}]   ;;  %s7007_s2 = inlined_call_operand.vmem [shape: bf16[4,4,128,65], index: 2, kind: input, shape index: {}]   ;;  %s7008_s3 = inlined_call_operand.vmem [shape: f32[4,4,1,128], index: 3, kind: input, shape index: {}]   ;;  %s7009_s4 = inlined_call_operand.vmem [shape: f32[4,4,128,4], index: 4, kind: input, shape index: {}]   ;;  %s7010_s5 = inlined_call_operand.vmem [shape: f32[4,64,64], index: 5, kind: input, shape index: {}]   ;;  %s7011_s6 = inlined_call_operand.vmem [shape: f32[4,64,1], index: 6, kind: input, shape index: {}]   ;;  %s7012_s7 = inlined_call_operand.vmem [shape: f32[4,1,1], index: 7, kind: input, shape index: {}]   ;;  %s7013_s8 = inlined_call_operand.vmem [shape: bf16[4,4,128,64], index: 8, kind: output, shape index: {0}]   ;;  %s7014_s9 = inlined_call_operand.hbm [shape: f32[4,64,64], index: 9, kind: output, shape index: {1}]   ;;  %s7015_s10 = inlined_call_operand.vmem [shape: f32[4,64,1], index: 10, kind: output, shape index: {2}]   ;;  %s7016_s11 = inlined_call_operand.vmem [shape: f32[4,1,1], index: 11, kind: output, shape index: {3}]  }
   0x1   :  { %7078 = sst [smem:[#allocation53_spill]] %s7005_s0 }
   0x2   :  { %7079 = sst [smem:[#allocation54_spill]] %s7006_s1 }
   0x3   :  { %7080 = sst [smem:[#allocation55_spill]] %s7007_s2 }
   0x4   :  { %7081 = sst [smem:[#allocation56_spill]] %s7008_s3 }
   0x5   :  { %7082 = sst [smem:[#allocation57_spill]] %s7009_s4 }
   0x6   :  { %7083 = sst [smem:[#allocation58_spill]] %s7014_s9 }
   0x7   :  { %7084 = sst [smem:[#allocation59_spill]] %s7015_s10 }
   0x8   :  { %7085 = sst [smem:[#allocation60_spill]] %s7016_s11 }
   0x9   :  { %17 = vsyncpa [#allocation4], 0 }
   0xa   :  { %19 = vsyncpa [#allocation4 + $0x1], 0  ;;  %s5313_s17 = smov 0   ;;  %s5315_s18 = smov 0  }
   0xb   :  { %s5317_s19 = smov 0   ;;  %s5319_s20 = smov 0  }
   0xc   :  { %s5321_s21 = smov 0   ;;  %s5323_s22 = smov 0  }
   0xd   :  { %s5325_s23 = smov 0   ;;  %s5327_s24 = smov 0  }
   0xe LB: > { %7086 = sst [smem:[#allocation6_spill]] %s5211_s17  ;;  %s4119_s25 = sadd.s32 4294967295, %s5239_s24   ;;  %s5239_s24 = sphi %s5327_s24, %s25_s24   ;;  %s5235_s23 = sphi %s5325_s23, %s7202_s23   ;;  %s5231_s22 = sphi %s5323_s22, %s7201_s22   ;;  %s5227_s21 = sphi %s5321_s21, %s7200_s21   ;;  %s5223_s20 = sphi %s5319_s20, %s7199_s20   ;;  %s5219_s19 = sphi %s5317_s19, %s7198_s19   ;;  %s5215_s18 = sphi %s5315_s18, %s7197_s18   ;;  %s5211_s17 = sphi %s5313_s17, %s7196_s17  }
   0xf   : > { %7087 = sst [smem:[#allocation7_spill]] %s5215_s18  ;;  %s4120_s26 = sadd.s32 4294967294, %s5239_s24  }
  0x10   : > { %7088 = sst [smem:[#allocation8_spill]] %s5219_s19  ;;  %s34_s27 = sadd.s32 1, %s5231_s22 }
  0x11   : > { %7089 = sst [smem:[#allocation9_spill]] %s5223_s20  ;;  %p35_p0 = scmp.ge.s32.totalorder %s34_s27, 2 }
  0x12   : > { %7090 = sst [smem:[#allocation10_spill]] %s5227_s21  ;;  %s37_s28 = sadd.s32 1, %s5235_s23 }
  0x13   : > { %7091 = sst [smem:[#allocation11_spill]] %s5231_s22  ;;  %p300_p1 = scmp.ne.s32.totalorder %s5219_s19, %s5215_s18 }
  0x14   : > { %7092 = sst [smem:[#allocation12_spill]] %s5235_s23  ;;  %p301_p2 = scmp.eq.s32.totalorder %s4119_s25, 7 }
  0x15   : > { %7093 = sst [smem:[#allocation13_spill]] %s5239_s24  ;;  %s7204_s27 = smov (%p35_p0, %s34_s27), 0 }
  0x16   : > { %7094 = sst [smem:[#allocation14_spill]] %s7204_s27  ;;  %s7206_s28 = smov (!%p35_p0, %s37_s28), %s5235_s23 }
  0x17   : > { %p5362_p3 = por %p301_p2, %p300_p1  ;;  %p306_p4 = scmp.ne.s32.totalorder %s5215_s18, %s5211_s17 }
  0x18   : > { %p39_p5 = scmp.ge.s32.totalorder %s7206_s28, 4  ;;  %p307_p6 = scmp.eq.s32.totalorder %s4120_s26, 7 }
  0x19   : > { %s7095_s29 = scalar_select %p5362_p3, 1, 0 }
  0x1a   : > { %p4123_p7 = scmp.ge.s32.totalorder %s5239_s24, 1  ;;  %p467_p8 = scmp.lt.s32.totalorder %s5239_s24, 9 }
  0x1b   : > { %7096 = sst [smem:[#allocation15_spill]] %s7095_s29  ;;  %s7208_s28 = smov (%p39_p5, %s7206_s28), 0 }
  0x1c   : > { %7097 = sst [smem:[#allocation16_spill]] %s7208_s28  ;;  %p5372_p9 = por %p307_p6, %p306_p4 }
  0x1d   : > { %p468_p10 = pnand %p4123_p7, %p467_p8  ;;  %s287_s12 = ssub.s32 %s5235_s23, %s7208_s28 }
  0x1e   : > { %s7098_s30 = scalar_select %p5372_p9, 1, 0 }
  0x1f   : > { %s290_s13 = sadd.s32 1, %s5219_s19  ;;  %p288_p11 = scmp.eq.s32.totalorder %s287_s12, 0 }
  0x20   : > { %7099 = sst [smem:[#allocation17_spill]] %s7098_s30  ;;  %471 = sbr.rel (%p468_p10) target bundleno = 1351 (0x547), region = 52 }
  0x21   : > { %s5380_s14 = scalar_select %p288_p11, %s5219_s19, %s290_s13  }
  0x23   : > { %7100 = sst [smem:[#allocation18_spill]] %s5380_s14 }
  0x27   : > { %s7022_s15 = sand.u32 1, %s5215_s18   ;;  %s4125_s16 = sshll.u32 %s5223_s20, 1 }
  0x28   : > { %s4124_s25 = sshll.u32 %s7022_s15, 6  ;;  %p582_p12 = scmp.lt.s32.totalorder %s5227_s21, 3 }
  0x29   : > { %p584_p13 = scmp.lt.s32.totalorder %s4125_s16, 3  ;;  %s7101_s0 = sld [smem:[#allocation53_spill]] }
  0x2a   : > { %s5388_s26 = scalar_select %p582_p12, %s5227_s21, 3 }
  0x2b   : > { %s7210_s16 = smov (!%p584_p13, %s4125_s16), 3  ;;  %s7102_s1 = sld [smem:[#allocation54_spill]] }
  0x2c   : > { %s4127_s12 = sshll.u32 %s5388_s26, 6  ;;  %s4131_s13 = sshll.u32 %s5388_s26, 5 }
  0x2d   : > { %s4126_s28 = sshll.u32 %s7210_s16, 4  ;;  %s4130_s27 = sshll.u32 %s7210_s16, 3 }
  0x2e   : > { %s588_s23 = sadd.s32 %s4127_s12, %s4126_s28  ;;  %s599_s22 = sadd.s32 %s4131_s13, %s4130_s27 }
  0x2f   : > { %s4128_s14 = sshll.u32 %s588_s23, 2  ;;  %s4132_s19 = sshll.u32 %s599_s22, 2 }
  0x30   : > { %s5395_s17 = scalar_lea.vmem %s7101_s0, %s4128_s14  ;;  %s7103_s2 = sld [smem:[#allocation55_spill]] }
  0x31   : > { %s5400_s29 = scalar_lea.vmem %s7102_s1, %s4132_s19  ;;  %s4138_s28 = sshll.u32 %s5388_s26, 2 }
  0x32   : > { %s620_s27 = sadd.s32 %s4138_s28, %s7210_s16  ;;  %s4142_s13 = sshll.u32 %s588_s23, 3 }
  0x33   : > { %s7104_s3 = sld [smem:[#allocation56_spill]]  ;;  %s7105_s4 = sld [smem:[#allocation57_spill]] }
  0x34   : > { %s5421_s24 = scalar_lea.vmem %s7010_s5, %s4127_s12  ;;  %s5426_s16 = scalar_lea.vmem %s7011_s6, %s4127_s12 }
  0x35   : > { %s646_s11 = scalar_lea.vmem %s7012_s7, %s5388_s26  ;;  %s5435_s30 = scalar_lea.vmem %s7013_s8, %s4128_s14 }
  0x36   : > { %s5405_s20 = scalar_lea.vmem %s7103_s2, %s4128_s14  ;;  %s7106_s1 = sld [smem:[#allocation59_spill]] }
  0x37   : > { %s5448_s21 = scalar_lea.vmem [#allocation3], %s4124_s25 }
  0x39   : > { %s5411_s10 = scalar_lea.vmem %s7104_s3, %s620_s27  ;;  %s5416_s0 = scalar_lea.vmem %s7105_s4, %s4142_s13 }
  0x3a   : > { %s7107_s3 = sld [smem:[#allocation60_spill]]  ;;  %s7108_s4 = sld [smem:[#allocation9_spill]] }
  0x3c   : > { %s5440_s9 = scalar_lea.vmem %s7106_s1, %s4127_s12 }
  0x40   : > { %s5446_s18 = scalar_lea.vmem %s7107_s3, %s5388_s26  ;;  %p4153_p0 = scmp.ne.s32.totalorder %s7108_s4, 0 }
  0x41   : > { %v690_v0 = vld [vmem:[%s5426_s16 + $0x10] sm:$0xff] (!%p4153_p0)  ;;  %v688_v1 = vld [vmem:[%s5426_s16] sm:$0xff] (!%p4153_p0)  ;;  %s5241_s1 = smov (!%p4153_p0), 64   ;;  %vm679_vm0 = vcmask (!%p4153_p0), 523264   ;;  %v691_v2 = vld [vmem:[%s5426_s16 + $0x18] sm:$0xff] (!%p4153_p0)  ;;  %vm738_vm1 = vcmask (!%p4153_p0), 0  }
  0x42   : > { %670 = sbr.rel (%p4153_p0) target bundleno = 194 (0xc2), region = 56  ;;  %708 = vrot.lane.b32.xlu1 (!%p4153_p0), %v690_v0, %s5241_s1  ;;  %704 = vrot.lane.b32.xlu0 (!%p4153_p0), %v688_v1, %s5241_s1  ;;  %v689_v3 = vld [vmem:[%s5426_s16 + $0x8] sm:$0xff] (!%p4153_p0)  ;;  %v673_v4 = vld [vmem:[%s5421_s24 + $0x10] sm:$0xff] (!%p4153_p0)  ;;  %vm728_vm2 = vcmask (!%p4153_p0), 531968  }
  0x43   : > { %v671_v5 = vld [vmem:[%s5421_s24] sm:$0xff] (!%p4153_p0)  ;;  %v674_v6 = vld [vmem:[%s5421_s24 + $0x18] sm:$0xff] (!%p4153_p0)  ;;  %682 = vst.msk [vmem:[#allocation2 + $0x10] sm:$0xff] (!%p4153_p0), %vm679_vm0, %v673_v4  ;;  %v672_v7 = vld [vmem:[%s5421_s24 + $0x8] sm:$0xff] (!%p4153_p0) }
  0x44   : > { %680 = vst.msk [vmem:[#allocation2] sm:$0xff] (!%p4153_p0), %vm679_vm0, %v671_v5  ;;  %683 = vst.msk [vmem:[#allocation2 + $0x18] sm:$0xff] (!%p4153_p0), %vm679_vm0, %v674_v6  ;;  %v676_v8 = vld [vmem:[%s5421_s24 + $0x28] sm:$0xff] (!%p4153_p0)  ;;  %v675_v9 = vld [vmem:[%s5421_s24 + $0x20] sm:$0xff] (!%p4153_p0) }
  0x45   : > { %681 = vst.msk [vmem:[#allocation2 + $0x8] sm:$0xff] (!%p4153_p0), %vm679_vm0, %v672_v7  ;;  %685 = vst.msk [vmem:[#allocation2 + $0x28] sm:$0xff] (!%p4153_p0), %vm679_vm0, %v676_v8  ;;  %v678_v10 = vld [vmem:[%s5421_s24 + $0x38] sm:$0xff] (!%p4153_p0)  ;;  %v677_v11 = vld [vmem:[%s5421_s24 + $0x30] sm:$0xff] (!%p4153_p0) }
  0x46   : > { %710 = vrot.lane.b32.xlu1 (!%p4153_p0), %v691_v2, %s5241_s1  ;;  %706 = vrot.lane.b32.xlu0 (!%p4153_p0), %v689_v3, %s5241_s1  ;;  %684 = vst.msk [vmem:[#allocation2 + $0x20] sm:$0xff] (!%p4153_p0), %vm679_vm0, %v675_v9  ;;  %v693_v12 = vld [vmem:[%s5426_s16 + $0x28] sm:$0xff] (!%p4153_p0)  ;;  %v692_v13 = vld [vmem:[%s5426_s16 + $0x20] sm:$0xff] (!%p4153_p0)  ;;  %687 = vst.msk [vmem:[#allocation2 + $0x38] sm:$0xff] (!%p4153_p0), %vm679_vm0, %v678_v10 }
  0x47   : > { %686 = vst.msk [vmem:[#allocation2 + $0x30] sm:$0xff] (!%p4153_p0), %vm679_vm0, %v677_v11  ;;  %v737_v14 = vld [vmem:[%s646_s11] sm:$0x1] (!%p4153_p0)  ;;  %v695_v15 = vld [vmem:[%s5426_s16 + $0x38] sm:$0xff] (!%p4153_p0)  ;;  %v694_v16 = vld [vmem:[%s5426_s16 + $0x30] sm:$0xff] (!%p4153_p0) }
  0x48   : > { %739 = vst.msk [vmem:[%s5446_s18] sm:$0x1] (!%p4153_p0), %vm738_vm1, %v737_v14 }
  0x4a   : > { %714 = vrot.lane.b32.xlu1 %v693_v12, %s5241_s1  ;;  %712 = vrot.lane.b32.xlu0 %v692_v13, %s5241_s1 }
  0x4e   : > { %718 = vrot.lane.b32.xlu1 %v695_v15, %s5241_s1  ;;  %716 = vrot.lane.b32.xlu0 %v694_v16, %s5241_s1 }
  0xb4   : > { %v709_v17 = vpop.permute.xlu1 %708  ;;  %v705_v18 = vpop.permute.xlu0 %704 }
  0xb5   : > { %731 = vst.msk [vmem:[#allocation2 + $0x10] sm:$0xff] %vm728_vm2, %v709_v17  ;;  %729 = vst.msk [vmem:[#allocation2] sm:$0xff] %vm728_vm2, %v705_v18 }
  0xb8   : > { %v711_v19 = vpop.permute.xlu1 %710  ;;  %v707_v20 = vpop.permute.xlu0 %706 }
  0xb9   : > { %732 = vst.msk [vmem:[#allocation2 + $0x18] sm:$0xff] %vm728_vm2, %v711_v19  ;;  %730 = vst.msk [vmem:[#allocation2 + $0x8] sm:$0xff] %vm728_vm2, %v707_v20 }
  0xbc   : > { %v715_v21 = vpop.permute.xlu1 %714  ;;  %v713_v22 = vpop.permute.xlu0 %712 }
  0xbd   : > { %734 = vst.msk [vmem:[#allocation2 + $0x28] sm:$0xff] %vm728_vm2, %v715_v21  ;;  %733 = vst.msk [vmem:[#allocation2 + $0x20] sm:$0xff] %vm728_vm2, %v713_v22 }
  0xc0   : > { %v719_v23 = vpop.permute.xlu1 %718  ;;  %v717_v24 = vpop.permute.xlu0 %716 }
  0xc1   : > { %736 = vst.msk [vmem:[#allocation2 + $0x38] sm:$0xff] %vm728_vm2, %v719_v23  ;;  %735 = vst.msk [vmem:[#allocation2 + $0x30] sm:$0xff] %vm728_vm2, %v717_v24 }
  0xc2 PF: > { %v740_v25 = vlaneseq  ;;  %v5498_v26 = vld [vmem:[%s5400_s29] sm:$0xff]   ;;  %v5501_v27 = vld [vmem:[%s5416_s0 + $0x78] sm:$0xff]  ;;  %v5504_v28 = vld [vmem:[%s5400_s29 + $0x8] sm:$0xff]   ;;  %v5242_v31 = vmov 1966171168   ;;  %vm1072_vm3 = vcmask 523264  }
  0xc3   : > { %v5507_v29 = vld [vmem:[%s5400_s29 + $0x10] sm:$0xff]   ;;  %v2084_v32 = vunpack.c.l.s4 %v5242_v31  ;;  %v4783_v33 = vld [vmem:[%s5395_s17] sm:$0xff]   ;;  %4477 = vmatprep.subr.bf16.mxu0 %v5498_v26  ;;  %v2082_v36 = vcombine.high %v5501_v27, %v5501_v27  ;;  %v5532_v40 = vld [vmem:[%s5400_s29 + $0x18] sm:$0xff]   ;;  %v7034_v41 = vmov 1   ;;  %s5244_s4 = smov 1   ;;  %v7032_v43 = vmov 0  }
  0xc4   : > { %v5510_v30 = vshrl.u32 %v740_v25, 7  ;;  %4478 = vmatpush3.bf16.msra.mxu0 %v5498_v26  ;;  %4485 = vmatprep.mubr.msk.bf16.mxu0 %vm1072_vm3, %v4783_v33  ;;  %v4784_v47 = vld [vmem:[%s5395_s17 + $0x8] sm:$0xff]   ;;  %v4785_v48 = vld [vmem:[%s5395_s17 + $0x10] sm:$0xff]   ;;  %s5246_s14 = smov 127   ;;  %v4786_v49 = vld [vmem:[%s5395_s17 + $0x18] sm:$0xff]   ;;  %vm2249_vm4 = vcmask 7175  }
  0xc5   : > { %v2085_v37 = vunpack.c.0.s8 %v2084_v32  ;;  %4479 = vmatprep.subr.bf16.mxu0 %v5504_v28  ;;  %4509 = vmatprep.mubr.msk.bf16.mxu1 %vm1072_vm3, %v4783_v33  ;;  %v4787_v50 = vld [vmem:[%s5395_s17 + $0x20] sm:$0xff]   ;;  %v4788_v51 = vld [vmem:[%s5395_s17 + $0x28] sm:$0xff]   ;;  %v4789_v52 = vld [vmem:[%s5395_s17 + $0x30] sm:$0xff]   ;;  %s5247_s25 = smov 64  }
  0xc6   : > { %v5518_v35 = vsub.s32 0, %v5510_v30  ;;  %4768 = vset.pattern.permute.xlu1 %v7034_v41  ;;  %4767 = vset.pattern.permute.xlu0 %v7032_v43  ;;  %v4790_v53 = vld [vmem:[%s5395_s17 + $0x38] sm:$0xff]   ;;  %v1338_v54 = vld [vmem:[#allocation2] sm:$0xff]  ;;  %v1339_v55 = vld [vmem:[#allocation2 + $0x8] sm:$0xff] }
  0xc7   : > { %v5529_v39 = vsub.s32 %v2085_v37, %v5510_v30  ;;  %v1340_v56 = vld [vmem:[#allocation2 + $0x10] sm:$0xff]  ;;  %v1346_v57 = vpack.c.bf16 %v1339_v55, %v1338_v54  ;;  %v1341_v58 = vld [vmem:[#allocation2 + $0x18] sm:$0xff]  ;;  %v1342_v60 = vld [vmem:[#allocation2 + $0x20] sm:$0xff] }
  0xc8   : > { %v5514_v34 = vld [vmem:[%s5446_s18] sm:$0x1]  ;;  %7109 = vst [vmem:[#allocation19_spill] sm:$0xff] %v5518_v35  ;;  %4480 = vmatpush3.bf16.msra.mxu0 %v5504_v28  ;;  %v1347_v59 = vpack.c.bf16 %v1341_v58, %v1340_v56  ;;  %v1343_v61 = vld [vmem:[#allocation2 + $0x28] sm:$0xff]  ;;  %v1344_v0 = vld [vmem:[#allocation2 + $0x30] sm:$0xff] }
  0xc9   : > { %v5526_v38 = vrot.slane %v5514_v34, %v5518_v35  ;;  %v2089_v42 = vrot.slane %v2082_v36, %v5529_v39  ;;  %4481 = vmatprep.subr.bf16.mxu0 %v5507_v29  ;;  %v4791_v62 = vld [vmem:[%s5405_s20] sm:$0xff]   ;;  %4501 = vmatprep.subr.bf16.mxu1 %v1346_v57  ;;  %v1348_v63 = vpack.c.bf16 %v1343_v61, %v1342_v60  ;;  %v1345_v1 = vld [vmem:[#allocation2 + $0x38] sm:$0xff]  ;;  %v817_v6 = vld [vmem:[%s5416_s0 + $0x8] sm:$0xff] }
  0xca   : > { %4502 = vmatpush3.bf16.msra.mxu1 %v1346_v57  ;;  %v1349_v2 = vpack.c.bf16 %v1345_v1, %v1344_v0  ;;  %v5571_v3 = vld [vmem:[%s5416_s0] sm:$0xff]  ;;  %v819_v8 = vld [vmem:[%s5416_s0 + $0x18] sm:$0xff]  ;;  %v4792_v9 = vld [vmem:[%s5405_s20 + $0x8] sm:$0xff]  }
  0xcb   : > { %839 = vrot.lane.b32.xlu1 %v5526_v38, %s5244_s4  ;;  %v2090_v44 = vcombine.high %v2089_v42, %v2089_v42  ;;  %4503 = vmatprep.subr.bf16.mxu1 %v1347_v59  ;;  %v5594_v13 = vld [vmem:[%s5416_s0 + $0x20] sm:$0xff]  ;;  %v5601_v15 = vld [vmem:[%s5416_s0 + $0x10] sm:$0xff]  ;;  %v821_v21 = vld [vmem:[%s5416_s0 + $0x28] sm:$0xff] }
  0xcc   : > { %4482 = vmatpush3.bf16.msra.mxu0 %v5507_v29  ;;  %v4793_v16 = vld [vmem:[%s5405_s20 + $0x10] sm:$0xff]   ;;  %v4794_v22 = vld [vmem:[%s5405_s20 + $0x18] sm:$0xff]   ;;  %v5629_v31 = vld [vmem:[%s5416_s0 + $0x40] sm:$0xff] }
  0xcd   : > { %v2097_v45 = vrot.slane %v2090_v44, %v5529_v39  ;;  %4483 = vmatprep.subr.bf16.mxu0 %v5532_v40  ;;  %v5614_v20 = vld [vmem:[%s5416_s0 + $0x30] sm:$0xff]  ;;  %v823_v32 = vld [vmem:[%s5416_s0 + $0x38] sm:$0xff]  ;;  %v4795_v33 = vld [vmem:[%s5405_s20 + $0x20] sm:$0xff]  }
  0xce   : > { %4504 = vmatpush3.bf16.msra.mxu1 %v1347_v59  ;;  %v5638_v42 = vld [vmem:[%s5416_s0 + $0x50] sm:$0xff]  ;;  %v825_v44 = vld [vmem:[%s5416_s0 + $0x48] sm:$0xff]  ;;  %v4798_v55 = vld [vmem:[%s5405_s20 + $0x38] sm:$0xff]  }
  0xcf   : > { %v2098_v46 = vcombine.high %v2097_v45, %v2097_v45  ;;  %4505 = vmatprep.subr.bf16.mxu1 %v1348_v63  ;;  %v4796_v45 = vld [vmem:[%s5405_s20 + $0x28] sm:$0xff]   ;;  %v5660_v57 = vld [vmem:[%s5400_s29 + $0x20] sm:$0xff]   ;;  %v5665_v58 = vld [vmem:[%s5416_s0 + $0x70] sm:$0xff] }
  0xd0   : > { %4484 = vmatpush3.bf16.msra.mxu0 %v5532_v40  ;;  %v829_v54 = vld [vmem:[%s5416_s0 + $0x68] sm:$0xff] }
  0xd1   : > { %2099 = vrot.lane.b32.xlu0 %v2098_v46, %s5246_s14  ;;  %4525 = vmatprep.subr.bf16.mxu0 %v4791_v62 }
  0xd2   : > { %4506 = vmatpush3.bf16.msra.mxu1 %v1348_v63 }
  0xd3   : > { %4486 = vmatmul.mubr.msk.bf16.vlgmr.msra.gmra.mrb[0].mxu0 %vm1072_vm3, %v4784_v47  ;;  %4507 = vmatprep.subr.bf16.mxu1 %v1349_v2 }
  0xd4   : > { %4489 = vmatprep.mubr.msk.bf16.mxu0 %vm1072_vm3, %v4785_v48  ;;  %4526 = vmatpush3.bf16.msra.mxu0 %v4791_v62 }
  0xd5   : > { %4527 = vmatprep.subr.bf16.mxu0 %v4792_v9 }
  0xd6   : > { %4508 = vmatpush3.bf16.msra.mxu1 %v1349_v2 }
  0xd7   : > { %4557 = vmatprep.subr.bf16.mxu1 %v4791_v62 }
  0xd8   : > { %4528 = vmatpush3.bf16.msra.mxu0 %v4792_v9 }
  0xd9   : > { %4510 = vmatmul.mubr.msk.bf16.vlgmr.msra.gmra.mrb[0].mxu1 %vm1072_vm3, %v4784_v47  ;;  %4529 = vmatprep.subr.bf16.mxu0 %v4793_v16 }
  0xda   : > { %4513 = vmatprep.mubr.msk.bf16.mxu1 %vm1072_vm3, %v4785_v48  ;;  %4558 = vmatpush3.bf16.msra.mxu1 %v4791_v62  ;;  %v5646_v48 = vld [vmem:[%s5416_s0 + $0x60] sm:$0xff] }
  0xdb   : > { %4490 = vmatmul.mubr.msk.bf16.gmra.mrb[4].mxu0 %vm1072_vm3, %v4786_v49  ;;  %4559 = vmatprep.subr.bf16.mxu1 %v4792_v9 }
  0xdc   : > { %4493 = vmatprep.mubr.msk.bf16.mxu0 %vm1072_vm3, %v4787_v50  ;;  %4530 = vmatpush3.bf16.msra.mxu0 %v4793_v16 }
  0xdd   : > { %4531 = vmatprep.subr.bf16.mxu0 %v4794_v22 }
  0xde   : > { %4560 = vmatpush3.bf16.msra.mxu1 %v4792_v9 }
  0xdf   : > { %4561 = vmatprep.subr.bf16.mxu1 %v4793_v16 }
  0xe0   : > { %4532 = vmatpush3.bf16.msra.mxu0 %v4794_v22 }
  0xe1   : > { %4514 = vmatmul.mubr.msk.bf16.gmra.mrb[4].mxu1 %vm1072_vm3, %v4786_v49  ;;  %4533 = vmatprep.subr.bf16.mxu0 %v4795_v33  ;;  %v827_v49 = vld [vmem:[%s5416_s0 + $0x58] sm:$0xff] }
  0xe2   : > { %4517 = vmatprep.mubr.msk.bf16.mxu1 %vm1072_vm3, %v4787_v50  ;;  %4562 = vmatpush3.bf16.msra.mxu1 %v4793_v16  ;;  %v4797_v50 = vld [vmem:[%s5405_s20 + $0x30] sm:$0xff]  }
  0xe3   : > { %4494 = vmatmul.mubr.msk.bf16.gmra.mrb[8].mxu0 %vm1072_vm3, %v4788_v51  ;;  %4563 = vmatprep.subr.bf16.mxu1 %v4794_v22 }
  0xe4   : > { %4497 = vmatprep.mubr.msk.bf16.mxu0 %vm1072_vm3, %v4789_v52  ;;  %4534 = vmatpush3.bf16.msra.mxu0 %v4795_v33 }
  0xe5   : > { %4535 = vmatprep.subr.bf16.mxu0 %v4796_v45 }
  0xe6   : > { %4564 = vmatpush3.bf16.msra.mxu1 %v4794_v22 }
  0xe7   : > { %4565 = vmatprep.subr.bf16.mxu1 %v4795_v33 }
  0xe8   : > { %4536 = vmatpush3.bf16.msra.mxu0 %v4796_v45 }
  0xe9   : > { %4518 = vmatmul.mubr.msk.bf16.gmra.mrb[8].mxu1 %vm1072_vm3, %v4788_v51  ;;  %4537 = vmatprep.subr.bf16.mxu0 %v4797_v50 }
  0xea   : > { %4521 = vmatprep.mubr.msk.bf16.mxu1 %vm1072_vm3, %v4789_v52  ;;  %4566 = vmatpush3.bf16.msra.mxu1 %v4795_v33 }
  0xeb   : > { %4498 = vmatmul.mubr.msk.bf16.gmra.mrb[12].mxu0 %vm1072_vm3, %v4790_v53  ;;  %4567 = vmatprep.subr.bf16.mxu1 %v4796_v45 }
  0xec   : > { %4538 = vmatpush3.bf16.msra.mxu0 %v4797_v50 }
  0xed   : > { %4539 = vmatprep.subr.bf16.mxu0 %v4798_v55 }
  0xee   : > { %4568 = vmatpush3.bf16.msra.mxu1 %v4796_v45 }
  0xef   : > { %4569 = vmatprep.subr.bf16.mxu1 %v4797_v50 }
  0xf0   : > { %4540 = vmatpush3.bf16.msra.mxu0 %v4798_v55 }
  0xf1   : > { %4522 = vmatmul.mubr.msk.bf16.gmra.mrb[12].mxu1 %vm1072_vm3, %v4790_v53 }
  0xf2   : > { %4570 = vmatpush3.bf16.msra.mxu1 %v4797_v50 }
  0xf3   : > { %4571 = vmatprep.subr.bf16.mxu1 %v4798_v55 }
  0xf6   : > { %4572 = vmatpush3.bf16.msra.mxu1 %v4798_v55  ;;  %v5745_v55 = vadd.s32 8, %v5510_v30 }
  0xf7   : > { %4581 = vmatprep.subr.bf16.mxu1 %v5660_v57 }
 0x13d   : > { %v5573_v4 = vpop.permute.xlu1 %839 }
 0x13e   : > { %v5577_v5 = vmax.f32 %v5571_v3, %v5573_v4  ;;  %v5582_v7 = vmax.f32 %v817_v6, %v5573_v4  ;;  %v5591_v12 = vmax.f32 %v819_v8, %v5573_v4  ;;  %v5607_v18 = vmax.f32 %v5594_v13, %v5573_v4  ;;  %v815_v8 = vld [vmem:[%s5411_s10] sm:$0x1] }
 0x13f   : > { %v5611_v19 = vmax.f32 %v5601_v15, %v5573_v4  ;;  %v5625_v23 = vmax.f32 %v5614_v20, %v5573_v4  ;;  %v847_v24 = vmax.f32 %v821_v21, %v5573_v4  ;;  %v850_v36 = vmax.f32 %v5629_v31, %v5573_v4 }
 0x140   : > { %866 = vperm.xlu1 %4768, %v5577_v5   ;;  %v849_v37 = vmax.f32 %v823_v32, %v5573_v4  ;;  %v852_v46 = vmax.f32 %v5638_v42, %v5573_v4  ;;  %v851_v47 = vmax.f32 %v825_v44, %v5573_v4  ;;  %v854_v51 = vmax.f32 %v5646_v48, %v5573_v4 }
 0x141   : > { %v853_v53 = vmax.f32 %v827_v49, %v5573_v4  ;;  %v855_v56 = vmax.f32 %v829_v54, %v5573_v4  ;;  %v857_v59 = vmax.f32 %v5501_v27, %v5573_v4  ;;  %v856_v60 = vmax.f32 %v5665_v58, %v5573_v4 }
 0x142   : > { %v5737_v44 = vand.u32 127, %v740_v25  ;;  %v2106_v25 = vunpack.c.l.bf16 %v5498_v26 }
 0x143   : > { %v2100_v10 = vpop.permute.xlu0 %2099 }
 0x144   : > { %871 = vperm.xlu1 %4768, %v5582_v7   ;;  %v5588_v11 = vmax.f32 %v5514_v34, %v2100_v10  ;;  %vm759_vm5 = vcmp.le.s32.totalorder %v5737_v44, %v5510_v30  ;;  %vm760_vm6 = vcmp.le.s32.totalorder %v5737_v44, %v5745_v55 }
 0x146   : > { %v2246_v14 = vrot.slane %v5588_v11, %v5518_v35  ;;  %2116 = vperm.xlu0 %4767, %v5588_v11  }
 0x148   : > { %881 = vperm.xlu1 %4768, %v5591_v12   ;;  %v2248_v17 = vadd.f32 %v2246_v14, %v5501_v27  ;;  %v2103_v27 = vsub.f32 %v5514_v34, %v5588_v11 }
 0x14a   : > { %2250 = vst.msk [vmem:[%s5446_s18 - $0x7] sm:$0x80] %vm2249_vm4, %v2248_v17  ;;  %4769 = vset.pattern.permute.xlu0 %v7034_v41  ;;  %v2104_v61 = vmul.f32 1.442695, %v2103_v27  ;;  %v2108_v27 = vunpack.c.l.bf16 %v5504_v28  ;;  %v5803_v41 = vadd.s32 64, %v5510_v30 }
 0x14b   : > { %876 = vperm.xlu0 %4769, %v5611_v19  }
 0x14c   : > { %886 = vperm.xlu1 %4768, %v5607_v18   ;;  %4828 = vpow2.f32 %v2104_v61  ;;  %v2109_v61 = vunpack.c.h.bf16 %v5504_v28  ;;  %7114 = vst [vmem:[#allocation24_spill] sm:$0xff] %v5803_v41  ;;  %vm7037_vm13 = vcmp.le.s32.totalorder %v5737_v44, %v5803_v41 }
 0x14f   : > { %891 = vperm.xlu0 %4769, %v847_v24  }
 0x150   : > { %896 = vperm.xlu1 %4768, %v5625_v23  }
 0x151   : > { %v5653_v52 = vld [vmem:[%s5446_s18] ss:$0 sm:$0xff] }
 0x152   : > { %7110 = vst [vmem:[#allocation20_spill] sm:$0xff] %v5653_v52 }
 0x153   : > { %901 = vperm.xlu0 %4769, %v849_v37  }
 0x154   : > { %906 = vperm.xlu1 %4768, %v850_v36  }
 0x156   : > { %v4829_v34 = vpop.eup %4828 }
 0x157   : > { %911 = vperm.xlu0 %4769, %v851_v47   ;;  %v2144_v62 = vrot.slane %v4829_v34, %v5518_v35 }
 0x158   : > { %916 = vperm.xlu1 %4768, %v852_v46  }
 0x15b   : > { %921 = vperm.xlu0 %4769, %v853_v53  }
 0x15c   : > { %926 = vperm.xlu1 %4768, %v854_v51  }
 0x15f   : > { %931 = vperm.xlu0 %4769, %v855_v56  }
 0x160   : > { %2320 = vrot.lane.b32.xlu1 %v5653_v52, %s5244_s4 }
 0x163   : > { %936 = vperm.xlu0 %4769, %v856_v60  }
 0x164   : > { %941 = vperm.xlu1 %4768, %v857_v59  }
 0x167   : > { %1226 = vrot.lane.b32.xlu0 %v5577_v5, %s5246_s14 }
 0x168   : > { %1228 = vrot.lane.b32.xlu1 %v5582_v7, %s5246_s14 }
 0x169   : > { %4770 = vset.pattern.permute.xlu1 %v7032_v43 }
 0x16b   : > { %1230 = vrot.lane.b32.xlu0 %v5611_v19, %s5246_s14 }
 0x16c   : > { %1232 = vrot.lane.b32.xlu1 %v5591_v12, %s5246_s14  ;;  %v5722_v12 = vrot.slane %v815_v8, %v5518_v35 }
 0x16f   : > { %1234 = vrot.lane.b32.xlu0 %v5607_v18, %s5246_s14 }
 0x170   : > { %1236 = vrot.lane.b32.xlu1 %v847_v24, %s5246_s14 }
 0x173   : > { %1238 = vrot.lane.b32.xlu0 %v5625_v23, %s5246_s14 }
 0x174   : > { %1240 = vrot.lane.b32.xlu1 %v849_v37, %s5246_s14 }
 0x177   : > { %1242 = vrot.lane.b32.xlu0 %v850_v36, %s5246_s14 }
 0x178   : > { %1244 = vrot.lane.b32.xlu1 %v851_v47, %s5246_s14 }
 0x17b   : > { %1246 = vrot.lane.b32.xlu0 %v852_v46, %s5246_s14 }
 0x17c   : > { %1248 = vrot.lane.b32.xlu1 %v853_v53, %s5246_s14 }
 0x17f   : > { %1250 = vrot.lane.b32.xlu0 %v854_v51, %s5246_s14 }
 0x180   : > { %1252 = vrot.lane.b32.xlu1 %v855_v56, %s5246_s14  ;;  %v2107_v56 = vunpack.c.h.bf16 %v5498_v26 }
 0x183   : > { %1254 = vrot.lane.b32.xlu0 %v856_v60, %s5246_s14 }
 0x184   : > { %1256 = vrot.lane.b32.xlu1 %v857_v59, %s5246_s14 }
 0x188   : > { %2146 = vperm.xlu1 %4770, %v2144_v62  }
 0x1a6   : > { %v5698_v63 = vpop.f32.mrb[0].mxu0 }
 0x1a7   : > { %v5700_v0 = vpop.f32.mrb[1].mxu0 }
 0x1a8   : > { %v5702_v1 = vpop.f32.mrb[2].mxu0 }
 0x1a9   : > { %v5704_v2 = vpop.f32.mrb[3].mxu0 }
 0x1ae   : > { %v5706_v4 = vpop.f32.mrb[4].mxu0 }
 0x1af   : > { %v5708_v5 = vpop.f32.mrb[5].mxu0 }
 0x1b0   : > { %v5710_v6 = vpop.f32.mrb[6].mxu0 }
 0x1b1   : > { %v5712_v7 = vpop.f32.mrb[7].mxu0 }
 0x1b6   : > { %v5715_v9 = vpop.f32.mrb[8].mxu0 }
 0x1b7   : > { %v5717_v10 = vpop.f32.mrb[9].mxu0 }
 0x1b8   : > { %v5719_v11 = vpop.f32.mrb[10].mxu0 }
 0x1b9   : > { %v5724_v14 = vpop.f32.mrb[11].mxu0 }
 0x1be   : > { %v5727_v18 = vpop.f32.mrb[12].mxu0 }
 0x1bf   : > { %v867_v16 = vpop.permute.xlu1 %866  ;;  %v5729_v21 = vpop.f32.mrb[13].mxu0 }
 0x1c0   : > { %v944_v17 = vsub.f32 %v5722_v12, %v867_v16  ;;  %v5731_v23 = vpop.f32.mrb[14].mxu0 }
 0x1c1   : > { %v5734_v32 = vpop.f32.mrb[15].mxu0 }
 0x1c2   : > { %v960_v19 = vmul.f32 1.442695, %v944_v17 }
 0x1c3   : > { %v872_v22 = vpop.permute.xlu1 %871 }
 0x1c4   : > { %4830 = vpow2.f32 %v960_v19  ;;  %v945_v24 = vsub.f32 %v5722_v12, %v872_v22  ;;  %v5757_v19 = vadd.s32 24, %v5510_v30 }
 0x1c5   : > { %v2117_v36 = vpop.permute.xlu0 %2116 }
 0x1c6   : > { %v962_v33 = vmul.f32 1.442695, %v945_v24  ;;  %v2122_v45 = vrot.slane %v2117_v36, %v5518_v35  ;;  %vm762_vm7 = vcmp.le.s32.totalorder %v5737_v44, %v5757_v19 }
 0x1c7   : > { %v882_v37 = vpop.permute.xlu1 %881 }
 0x1c8   : > { %4832 = vpow2.f32 %v962_v33  ;;  %v947_v46 = vsub.f32 %v5722_v12, %v882_v37  ;;  %v2123_v47 = vsub.f32 %v815_v8, %v2122_v45  ;;  %v5765_v37 = vadd.s32 16, %v5510_v30 }
 0x1c9   : > { %v5768_v45 = vadd.s32 32, %v5510_v30 }
 0x1ca   : > { %v966_v49 = vmul.f32 1.442695, %v947_v46  ;;  %v2124_v51 = vmul.f32 1.442695, %v2123_v47  ;;  %v877_v53 = vpop.permute.xlu0 %876  ;;  %vm761_vm8 = vcmp.le.s32.totalorder %v5737_v44, %v5765_v37 }
 0x1cb   : > { %v887_v50 = vpop.permute.xlu1 %886  ;;  %v946_v59 = vsub.f32 %v5722_v12, %v877_v53  ;;  %7111 = vst [vmem:[#allocation21_spill] sm:$0xff] %v5768_v45  ;;  %vm763_vm9 = vcmp.le.s32.totalorder %v5737_v44, %v5768_v45 }
 0x1cc   : > { %4834 = vpow2.f32 %v966_v49  ;;  %v948_v54 = vsub.f32 %v5722_v12, %v887_v50 }
 0x1cd   : > { %4836 = vpow2.f32 %v2124_v51  ;;  %v964_v8 = vmul.f32 1.442695, %v946_v59 }
 0x1ce   : > { %v4831_v60 = vpop.eup %4830  ;;  %v968_v34 = vmul.f32 1.442695, %v948_v54  ;;  %v892_v24 = vpop.permute.xlu0 %891 }
 0x1cf   : > { %v897_v16 = vpop.permute.xlu1 %896  ;;  %v992_v17 = vsel %vm759_vm5, %v4831_v60, 0.0  ;;  %v949_v36 = vsub.f32 %v5722_v12, %v892_v24  ;;  %v5778_v60 = vadd.s32 48, %v5510_v30 }
 0x1d0   : > { %4838 = vpow2.f32 %v968_v34  ;;  %v950_v33 = vsub.f32 %v5722_v12, %v897_v16  ;;  %v1194_v51 = vmul.f32 0.125, %v992_v17  ;;  %v5782_v17 = vadd.s32 40, %v5510_v30 }
 0x1d1   : > { %4840 = vpow2.f32 %v964_v8  ;;  %v970_v53 = vmul.f32 1.442695, %v949_v36  ;;  %vm765_vm10 = vcmp.le.s32.totalorder %v5737_v44, %v5778_v60 }
 0x1d2   : > { %v4833_v46 = vpop.eup %4832  ;;  %v972_v50 = vmul.f32 1.442695, %v950_v33  ;;  %v902_v34 = vpop.permute.xlu0 %901  ;;  %7112 = vst [vmem:[#allocation22_spill] sm:$0xff] %v5782_v17  ;;  %v1210_v36 = vmul.f32 %v1194_v51, %v5700_v0  ;;  %vm764_vm11 = vcmp.le.s32.totalorder %v5737_v44, %v5782_v17 }
 0x1d3   : > { %v907_v54 = vpop.permute.xlu1 %906  ;;  %v993_v59 = vsel %vm760_vm6, %v4833_v46, 0.0  ;;  %v951_v24 = vsub.f32 %v5722_v12, %v902_v34  ;;  %v5800_v34 = vld [vmem:[%s5400_s29 + $0x28] sm:$0xff]  }
 0x1d4   : > { %4842 = vpow2.f32 %v972_v50  ;;  %v952_v8 = vsub.f32 %v5722_v12, %v907_v54  ;;  %v1195_v16 = vmul.f32 0.125, %v993_v59  ;;  %v5792_v54 = vadd.s32 56, %v5510_v30 }
 0x1d5   : > { %4844 = vpow2.f32 %v970_v53  ;;  %v974_v59 = vmul.f32 1.442695, %v951_v24 }
 0x1d6   : > { %v4835_v33 = vpop.eup %4834  ;;  %v976_v46 = vmul.f32 1.442695, %v952_v8  ;;  %v1211_v50 = vmul.f32 %v1195_v16, %v5704_v2  ;;  %7113 = vst [vmem:[#allocation23_spill] sm:$0xff] %v5792_v54  ;;  %v912_v51 = vpop.permute.xlu0 %911  ;;  %vm766_vm12 = vcmp.le.s32.totalorder %v5737_v44, %v5792_v54 }
 0x1d7   : > { %v995_v53 = vsel %vm762_vm7, %v4835_v33, 0.0  ;;  %v917_v43 = vpop.permute.xlu1 %916  ;;  %v4837_v0 = vpop.eup %4836  ;;  %v953_v24 = vsub.f32 %v5722_v12, %v912_v51  ;;  %v5813_v33 = vadd.s32 80, %v5510_v30 }
 0x1d8   : > { %4846 = vpow2.f32 %v976_v46  ;;  %v1543_v2 = vpack.c.bf16 %v1211_v50, %v1210_v36  ;;  %v954_v8 = vsub.f32 %v5722_v12, %v917_v43  ;;  %v5809_v16 = vrot.slane %v4837_v0, %v5518_v35 }
 0x1d9   : > { %4848 = vpow2.f32 %v974_v59  ;;  %7115 = vst [vmem:[#allocation25_spill] sm:$0xff] %v5813_v33  ;;  %v1197_v47 = vmul.f32 0.125, %v995_v53  ;;  %v978_v36 = vmul.f32 1.442695, %v953_v24  ;;  %v5826_v53 = vld [vmem:[%s5400_s29 + $0x30] sm:$0xff]   ;;  %vm769_vm14 = vcmp.le.s32.totalorder %v5737_v44, %v5813_v33 }
 0x1da   : > { %v4839_v49 = vpop.eup %4838  ;;  %v980_v46 = vmul.f32 1.442695, %v954_v8  ;;  %4541 = vmatprep.mubr.bf16.mxu0 %v1543_v2  ;;  %v2132_v0 = vmul.f32 %v5809_v16, %v2106_v25  ;;  %v2133_v59 = vmul.f32 %v5809_v16, %v2107_v56  ;;  %v5829_v2 = vadd.s32 72, %v5510_v30  ;;  %v922_v8 = vpop.permute.xlu0 %921 }
 0x1db   : > { %v4841_v43 = vpop.eup %4840  ;;  %v927_v50 = vpop.permute.xlu1 %926  ;;  %v996_v26 = vsel %vm763_vm9, %v4839_v49, 0.0  ;;  %v955_v24 = vsub.f32 %v5722_v12, %v922_v8  ;;  %v2135_v49 = vmul.f32 %v5809_v16, %v2109_v61 }
 0x1dc   : > { %7116 = vst [vmem:[#allocation26_spill] sm:$0xff] %v5829_v2  ;;  %v994_v51 = vsel %vm761_vm8, %v4841_v43, 0.0  ;;  %4850 = vpow2.f32 %v980_v46  ;;  %v956_v25 = vsub.f32 %v5722_v12, %v927_v50  ;;  %v2157_v22 = vpack.c.bf16 %v2133_v59, %v2132_v0  ;;  %v4248_v50 = vld [vmem:[%s5416_s0 + $0x88] sm:$0xff] }
 0x1dd   : > { %v1196_v56 = vmul.f32 0.125, %v994_v51  ;;  %4852 = vpow2.f32 %v978_v36  ;;  %v1213_v43 = vmul.f32 %v5702_v1, %v1197_v47  ;;  %v2134_v46 = vmul.f32 %v5809_v16, %v2108_v27  ;;  %v5855_v1 = vld [vmem:[%s5400_s29 + $0x38] sm:$0xff]  }
 0x1de   : > { %v4843_v62 = vpop.eup %4842  ;;  %v982_v8 = vmul.f32 1.442695, %v955_v24  ;;  %v984_v0 = vmul.f32 1.442695, %v956_v25  ;;  %v1198_v59 = vmul.f32 0.125, %v996_v26  ;;  %4573 = vmatprep.mubr.bf16.mxu1 %v2157_v22  ;;  %vm7038_vm15 = vcmp.le.s32.totalorder %v5737_v44, %v5829_v2  ;;  %v932_v61 = vpop.permute.xlu0 %931 }
 0x1df   : > { %v4845_v36 = vpop.eup %4844  ;;  %v1212_v51 = vmul.f32 %v5698_v63, %v1196_v56  ;;  %v5850_v45 = vpop.permute.xlu1 %2320  ;;  %v998_v28 = vsel %vm765_vm10, %v4843_v62, 0.0  ;;  %v2158_v27 = vpack.c.bf16 %v2135_v49, %v2134_v46  ;;  %v7117_v47 = vunpack.c.l.bf16 %v5507_v29 }
 0x1e0   : > { %v997_v63 = vsel %vm764_vm11, %v4845_v36, 0.0  ;;  %4854 = vpow2.f32 %v982_v8  ;;  %v957_v26 = vsub.f32 %v5722_v12, %v932_v61  ;;  %v5868_v62 = vmax.f32 %v4248_v50, %v5850_v45  ;;  %v4251_v50 = vld [vmem:[%s5416_s0 + $0xa0] sm:$0xff] }
 0x1e1   : > { %v2136_v22 = vmul.f32 %v5809_v16, %v7117_v47  ;;  %v1544_v25 = vpack.c.bf16 %v1213_v43, %v1212_v51  ;;  %v1199_v56 = vmul.f32 0.125, %v997_v63  ;;  %4574 = vmatmul.mubr.bf16.vlgmr.msra.gmra.mrb[16].mxu1 %v2158_v27  ;;  %v7118_v46 = vunpack.c.h.bf16 %v5507_v29 }
 0x1e2   : > { %v4847_v24 = vpop.eup %4846  ;;  %v5874_v36 = vadd.s32 88, %v5510_v30  ;;  %v1200_v47 = vmul.f32 0.125, %v998_v28  ;;  %v1214_v43 = vmul.f32 %v1198_v59, %v5708_v5  ;;  %v986_v51 = vmul.f32 1.442695, %v957_v26  ;;  %4582 = vmatpush3.bf16.msra.mxu1 %v5660_v57  ;;  %2352 = vperm.xlu0 %4769, %v5868_v62   ;;  %v937_v61 = vpop.permute.xlu0 %936 }
 0x1e3   : > { %v2137_v49 = vmul.f32 %v5809_v16, %v7118_v46  ;;  %v4849_v17 = vpop.eup %4848  ;;  %v1215_v8 = vmul.f32 %v1199_v56, %v5712_v7  ;;  %4542 = vmatmul.mubr.bf16.vlgmr.msra.gmra.mrb[16].mxu0 %v1544_v25  ;;  %v942_v27 = vpop.permute.xlu1 %941  ;;  %4583 = vmatprep.subr.bf16.mxu1 %v5800_v34  ;;  %v7120_v59 = vunpack.c.l.bf16 %v5532_v40  ;;  %4856 = vpow2.f32 %v984_v0 }
 0x1e4   : > { %7119 = vst [vmem:[#allocation27_spill] sm:$0xff] %v5874_v36  ;;  %v999_v29 = vsel %vm766_vm12, %v4849_v17, 0.0  ;;  %v959_v28 = vsub.f32 %v5722_v12, %v942_v27  ;;  %v958_v25 = vsub.f32 %v5722_v12, %v937_v61  ;;  %v1000_v56 = vsel %vm7037_vm13, %v4847_v24, 0.0  ;;  %v4253_v24 = vld [vmem:[%s5416_s0 + $0xb0] sm:$0xff] }
 0x1e5   : > { %v2159_v5 = vpack.c.bf16 %v2137_v49, %v2136_v22  ;;  %v2138_v57 = vmul.f32 %v5809_v16, %v7120_v59  ;;  %v1201_v7 = vmul.f32 0.125, %v999_v29  ;;  %v1545_v63 = vpack.c.bf16 %v1215_v8, %v1214_v43 }
 0x1e6   : > { %v4851_v26 = vpop.eup %4850  ;;  %v990_v17 = vmul.f32 1.442695, %v959_v28  ;;  %v5894_v46 = vmax.f32 %v4251_v50, %v5850_v45  ;;  %v7121_v22 = vunpack.c.h.bf16 %v5532_v40  ;;  %v1216_v43 = vmul.f32 %v5706_v4, %v1200_v47  ;;  %4584 = vmatpush3.bf16.msra.mxu1 %v5800_v34  ;;  %v5910_v4 = vpop.permute.xlu0 %1226 }
 0x1e7   : > { %4577 = vmatprep.mubr.bf16.mxu1 %v2159_v5  ;;  %v4853_v0 = vpop.eup %4852  ;;  %4858 = vpow2.f32 %v986_v51  ;;  %v1217_v12 = vmul.f32 %v5710_v6, %v1201_v7  ;;  %v988_v8 = vmul.f32 1.442695, %v958_v25  ;;  %4545 = vmatprep.mubr.bf16.mxu0 %v1545_v63  ;;  %v5902_v27 = vpop.permute.xlu1 %1228  ;;  %v1002_v40 = vsel %vm769_vm14, %v4851_v26, 0.0  ;;  %v5917_v51 = vld [vmem:[%s5395_s17 + $0x40] sm:$0xff]  }
 0x1e8   : > { %v2139_v49 = vmul.f32 %v5809_v16, %v7121_v22  ;;  %4860 = vpow2.f32 %v990_v17  ;;  %2367 = vperm.xlu0 %4769, %v5894_v46   ;;  %4585 = vmatprep.subr.bf16.mxu1 %v5826_v53  ;;  %vm770_vm0 = vcmp.le.s32.totalorder %v5737_v44, %v5874_v36  ;;  %v1202_v34 = vmul.f32 0.125, %v1000_v56 }
 0x1e9   : > { %v1546_v6 = vpack.c.bf16 %v1217_v12, %v1216_v43  ;;  %4862 = vpow2.f32 %v988_v8  ;;  %v1275_v47 = vsub.f32 %v5526_v38, %v5902_v27  ;;  %v1001_v50 = vsel %vm7038_vm15, %v4853_v0, 0.0  ;;  %v4804_v43 = vld [vmem:[%s5395_s17 + $0x48] sm:$0xff]  }
 0x1ea   : > { %v2160_v16 = vpack.c.bf16 %v2139_v49, %v2138_v57  ;;  %v5923_v29 = vmax.f32 %v4253_v24, %v5850_v45  ;;  %v5926_v61 = vadd.s32 96, %v5510_v30  ;;  %v4855_v28 = vpop.eup %4854  ;;  %v1204_v5 = vmul.f32 0.125, %v1002_v40  ;;  %4586 = vmatpush3.bf16.msra.mxu1 %v5826_v53  ;;  %v4255_v57 = vld [vmem:[%s5416_s0 + $0xc0] sm:$0xff]  ;;  %v5935_v63 = vpop.permute.xlu0 %1230  ;;  %v4805_v40 = vld [vmem:[%s5395_s17 + $0x50] sm:$0xff]  }
 0x1eb   : > { %v1203_v59 = vmul.f32 0.125, %v1001_v50  ;;  %4546 = vmatmul.mubr.bf16.gmra.mrb[20].mxu0 %v1546_v6  ;;  %v1003_v7 = vsel %vm770_vm0, %v4855_v28, 0.0  ;;  %4587 = vmatprep.subr.bf16.mxu1 %v5855_v1  ;;  %v5938_v25 = vadd.s32 112, %v5510_v30  ;;  %v5941_v26 = vadd.s32 120, %v5510_v30  ;;  %v5945_v49 = vpop.permute.xlu1 %1232 }
 0x1ec   : > { %4578 = vmatmul.mubr.bf16.gmra.mrb[20].mxu1 %v2160_v16  ;;  %7122 = vst [vmem:[#allocation28_spill] sm:$0xff] %v5923_v29  ;;  %7123 = vst [vmem:[#allocation29_spill] sm:$0xff] %v5926_v61  ;;  %2377 = vperm.xlu0 %4769, %v5923_v29   ;;  %v1218_v53 = vmul.f32 %v1202_v34, %v5717_v10  ;;  %v1292_v17 = vmul.f32 1.442695, %v1275_v47  ;;  %v1205_v56 = vmul.f32 0.125, %v1003_v7 }
 0x1ed   : > { %7124 = vst [vmem:[#allocation30_spill] sm:$0xff] %v5938_v25  ;;  %7125 = vst [vmem:[#allocation31_spill] sm:$0xff] %v5941_v26  ;;  %v1219_v22 = vmul.f32 %v1203_v59, %v5724_v14  ;;  %4589 = vmatprep.mubr.msk.bf16.mxu1 %vm1072_vm3, %v5917_v51  ;;  %vm771_vm1 = vcmp.le.s32.totalorder %v5737_v44, %v5926_v61  ;;  %v5952_v0 = vmax.f32 %v4255_v57, %v5850_v45  ;;  %v4857_v12 = vpop.eup %4856  ;;  %v4810_v61 = vld [vmem:[%s5395_s17 + $0x78] sm:$0xff]  }
 0x1ee   : > { %v1220_v8 = vmul.f32 %v5715_v9, %v1204_v5  ;;  %v1221_v10 = vmul.f32 %v5719_v11, %v1205_v56  ;;  %4588 = vmatpush3.bf16.msra.mxu1 %v5855_v1  ;;  %v5959_v14 = vadd.s32 104, %v5510_v30  ;;  %v1274_v16 = vsub.f32 %v5526_v38, %v5910_v4  ;;  %v5965_v6 = vpop.permute.xlu0 %1234 }
 0x1ef   : > { %7126 = vst [vmem:[#allocation32_spill] sm:$0xff] %v5952_v0  ;;  %v1547_v24 = vpack.c.bf16 %v1219_v22, %v1218_v53  ;;  %4864 = vpow2.f32 %v1292_v17  ;;  %vm773_vm2 = vcmp.le.s32.totalorder %v5737_v44, %v5938_v25  ;;  %vm774_vm13 = vcmp.le.s32.totalorder %v5737_v44, %v5941_v26  ;;  %v5975_v50 = vpop.permute.xlu1 %1236  ;;  %v4257_v17 = vld [vmem:[%s5416_s0 + $0xd0] sm:$0xff]  ;;  %v4250_v25 = vld [vmem:[%s5416_s0 + $0x98] sm:$0xff] }
 0x1f0   : > { %7127 = vst [vmem:[#allocation33_spill] sm:$0xff] %v5959_v14  ;;  %2387 = vperm.xlu0 %4769, %v5952_v0   ;;  %v1548_v47 = vpack.c.bf16 %v1221_v10, %v1220_v8  ;;  %v1004_v11 = vsel %vm771_vm1, %v4857_v12, 0.0  ;;  %vm772_vm15 = vcmp.le.s32.totalorder %v5737_v44, %v5959_v14  ;;  %v1290_v28 = vmul.f32 1.442695, %v1274_v16  ;;  %v4806_v12 = vld [vmem:[%s5395_s17 + $0x58] sm:$0xff]   ;;  %v4260_v0 = vld [vmem:[%s5416_s0 + $0xe8] sm:$0xff] }
 0x1f1   : > { %v4859_v34 = vpop.eup %4858  ;;  %4549 = vmatprep.mubr.bf16.mxu0 %v1547_v24  ;;  %v1276_v5 = vsub.f32 %v5526_v38, %v5935_v63  ;;  %v1206_v53 = vmul.f32 0.125, %v1004_v11  ;;  %v4807_v24 = vld [vmem:[%s5395_s17 + $0x60] sm:$0xff]  }
 0x1f2   : > { %v4861_v9 = vpop.eup %4860  ;;  %v5989_v56 = vpop.permute.xlu0 %1238  ;;  %4866 = vpow2.f32 %v1290_v28 }
 0x1f3   : > { %v4863_v1 = vpop.eup %4862  ;;  %4550 = vmatmul.mubr.bf16.gmra.mrb[24].mxu0 %v1548_v47  ;;  %v1007_v57 = vsel %vm774_vm13, %v4861_v9, 0.0  ;;  %v5999_v47 = vmax.f32 %v4257_v17, %v5850_v45  ;;  %v1222_v9 = vmul.f32 %v1206_v53, %v5729_v21  ;;  %v4808_v17 = vld [vmem:[%s5395_s17 + $0x68] sm:$0xff]  }
 0x1f4   : > { %4590 = vmatmul.mubr.msk.bf16.vlgmr.msra.gmra.mrb[24].mxu1 %vm1072_vm3, %v4804_v43  ;;  %v1006_v59 = vsel %vm773_vm2, %v4863_v1, 0.0  ;;  %v1209_v22 = vmul.f32 0.125, %v1007_v57  ;;  %v1005_v43 = vsel %vm772_vm15, %v4859_v34, 0.0  ;;  %v6003_v1 = vpop.permute.xlu1 %1240  ;;  %v4259_v34 = vld [vmem:[%s5416_s0 + $0xe0] sm:$0xff] }
 0x1f5   : > { %4593 = vmatprep.mubr.msk.bf16.mxu1 %vm1072_vm3, %v4805_v40  ;;  %v1208_v7 = vmul.f32 0.125, %v1006_v59  ;;  %v1207_v10 = vmul.f32 0.125, %v1005_v43  ;;  %v1294_v40 = vmul.f32 1.442695, %v1276_v5  ;;  %7128 = vst [vmem:[#allocation34_spill] sm:$0xff] %v5999_v47  ;;  %2397 = vperm.xlu0 %4769, %v5999_v47   ;;  %v6019_v57 = vmax.f32 %v4259_v34, %v5850_v45  ;;  %v4809_v43 = vld [vmem:[%s5395_s17 + $0x70] sm:$0xff]  }
 0x1f6   : > { %v1225_v16 = vmul.f32 %v5731_v23, %v1209_v22  ;;  %v6011_v5 = vpop.permute.xlu0 %1242 }
 0x1f7   : > { %v1224_v8 = vmul.f32 %v5727_v18, %v1208_v7  ;;  %v1223_v11 = vmul.f32 %v1207_v10, %v5734_v32  ;;  %v6009_v18 = vld [vmem:[%s5416_s0 + $0xf8] sm:$0xff]  ;;  %4868 = vpow2.f32 %v1294_v40  ;;  %v1278_v32 = vsub.f32 %v5526_v38, %v5965_v6  ;;  %7129 = vst [vmem:[#allocation35_spill] sm:$0xff] %v6019_v57  ;;  %v4261_v7 = vld [vmem:[%s5416_s0 + $0xf0] sm:$0xff] }
 0x1f8   : > { %v3562_v21 = vcombine.high %v6009_v18, %v6009_v18  ;;  %v6024_v22 = vpop.permute.xlu1 %1244  ;;  %v6035_v40 = vmax.f32 %v4261_v7, %v5850_v45  ;;  %v4249_v7 = vld [vmem:[%s5416_s0 + $0x90] sm:$0xff] }
 0x1f9   : > { %v1550_v59 = vpack.c.bf16 %v1225_v16, %v1224_v8  ;;  %v4865_v23 = vpop.eup %4864  ;;  %v1549_v28 = vpack.c.bf16 %v1223_v11, %v1222_v9  ;;  %2407 = vperm.xlu0 %4769, %v6019_v57   ;;  %v6028_v8 = vpop.f32.mrb[0].mxu1  ;;  %v1298_v10 = vmul.f32 1.442695, %v1278_v32  ;;  %v4247_v16 = vld [vmem:[%s5416_s0 + $0x80] sm:$0xff]  ;;  %v7131_v32 = vmov 1  }
 0x1fa   : > { %v1323_v53 = vmul.f32 0.125, %v4865_v23  ;;  %7130 = vst [vmem:[#allocation36_spill] sm:$0xff] %v6035_v40  ;;  %v6038_v9 = vpop.permute.xlu0 %1246  ;;  %v6042_v34 = vpop.f32.mrb[1].mxu1 }
 0x1fb   : > { %4553 = vmatprep.mubr.bf16.mxu0 %v1549_v28  ;;  %v6048_v23 = vpop.f32.mrb[2].mxu1  ;;  %4870 = vpow2.f32 %v1298_v10 }
 0x1fc   : > { %4594 = vmatmul.mubr.msk.bf16.gmra.mrb[28].mxu1 %vm1072_vm3, %v4806_v12  ;;  %4554 = vmatmul.mubr.bf16.gmra.mrb[28].mxu0 %v1550_v59  ;;  %v3569_v12 = vrot.slane %v3562_v21, %v5529_v39  ;;  %v4867_v11 = vpop.eup %4866  ;;  %v1283_v21 = vsub.f32 %v5526_v38, %v6024_v22 }
 0x1fd   : > { %4597 = vmatprep.mubr.msk.bf16.mxu1 %vm1072_vm3, %v4807_v24  ;;  %4613 = vmatprep.mubr.msk.bf16.mxu0 %vm1072_vm3, %v5917_v51  ;;  %v1281_v24 = vsub.f32 %v5526_v38, %v6003_v1  ;;  %v6045_v51 = vmax.f32 %v4247_v16, %v5850_v45  ;;  %v1322_v16 = vmul.f32 0.125, %v4867_v11 }
 0x1fe   : > { %1454 = vperm.xlu1 %4770, %v1323_v53   ;;  %2417 = vperm.xlu0 %4769, %v6035_v40   ;;  %v3570_v59 = vcombine.high %v3569_v12, %v3569_v12  ;;  %v6054_v53 = vpop.f32.mrb[3].mxu1  ;;  %v7132_v12 = vmov 0   ;;  %v6061_v10 = vpop.permute.xlu0 %1250  ;;  %v1308_v14 = vmul.f32 1.442695, %v1283_v21 }
 0x1ff   : > { %v1304_v28 = vmul.f32 1.442695, %v1281_v24  ;;  %v6064_v24 = vmax.f32 %v4249_v7, %v5850_v45  ;;  %v6098_v57 = vpop.f32.mrb[4].mxu1 }
 0x200   : > { %v6100_v2 = vpop.f32.mrb[5].mxu1 }
 0x201   : > { %4872 = vpow2.f32 %v1304_v28 }
 0x202   : > { %4771 = vset.pattern.permute.xlu1 %v7131_v32  ;;  %4772 = vset.pattern.permute.xlu0 %v7132_v12  ;;  %v3577_v32 = vrot.slane %v3570_v59, %v5529_v39  ;;  %4874 = vpow2.f32 %v1308_v14  ;;  %v1286_v39 = vsub.f32 %v5526_v38, %v6061_v10  ;;  %v4252_v59 = vld [vmem:[%s5416_s0 + $0xa8] sm:$0xff]  ;;  %v6078_v28 = vpop.permute.xlu0 %1254  ;;  %v4254_v14 = vld [vmem:[%s5416_s0 + $0xb8] sm:$0xff] }
 0x203   : > { %2347 = vperm.xlu1 %4771, %v6045_v51   ;;  %1449 = vperm.xlu0 %4772, %v1322_v16   ;;  %v6073_v16 = vmax.f32 %v4250_v25, %v5850_v45  ;;  %v6092_v41 = vmax.f32 %v4254_v14, %v5850_v45  ;;  %v1279_v14 = vsub.f32 %v5526_v38, %v5975_v50 }
 0x204   : > { %4598 = vmatmul.mubr.msk.bf16.gmra.mrb[32].mxu1 %vm1072_vm3, %v4808_v17  ;;  %v6056_v17 = vpop.permute.xlu1 %1248  ;;  %v3578_v7 = vcombine.high %v3577_v32, %v3577_v32  ;;  %v1314_v25 = vmul.f32 1.442695, %v1286_v39  ;;  %v4256_v39 = vld [vmem:[%s5416_s0 + $0xc8] sm:$0xff] }
 0x205   : > { %4601 = vmatprep.mubr.msk.bf16.mxu1 %vm1072_vm3, %v4809_v43  ;;  %v4869_v43 = vpop.eup %4868  ;;  %v1285_v26 = vsub.f32 %v5526_v38, %v6056_v17  ;;  %v1300_v47 = vmul.f32 1.442695, %v1279_v14 }
 0x206   : > { %v1324_v11 = vmul.f32 0.125, %v4869_v43  ;;  %v4871_v21 = vpop.eup %4870 }
 0x207   : > { %2357 = vperm.xlu1 %4771, %v6064_v24   ;;  %v1312_v40 = vmul.f32 1.442695, %v1285_v26  ;;  %v1288_v26 = vsub.f32 %v5526_v38, %v6078_v28  ;;  %v1326_v43 = vmul.f32 0.125, %v4871_v21 }
 0x208   : > { %1459 = vperm.xlu0 %4772, %v1324_v11   ;;  %v1277_v11 = vsub.f32 %v5526_v38, %v5945_v49 }
 0x209   : > { %4876 = vpow2.f32 %v1312_v40  ;;  %v1318_v40 = vmul.f32 1.442695, %v1288_v26  ;;  %v4258_v26 = vld [vmem:[%s5416_s0 + $0xd8] sm:$0xff] }
 0x20a   : > { %4878 = vpow2.f32 %v1314_v25  ;;  %v1296_v36 = vmul.f32 1.442695, %v1277_v11  ;;  %v1730_v25 = vadd.f32 %v5935_v63, %v5601_v15 }
 0x20b   : > { %2362 = vperm.xlu1 %4771, %v6073_v16   ;;  %v4873_v32 = vpop.eup %4872  ;;  %4880 = vpow2.f32 %v1318_v40 }
 0x20c   : > { %4602 = vmatmul.mubr.msk.bf16.gmra.mrb[36].mxu1 %vm1072_vm3, %v4810_v61  ;;  %3579 = vrot.lane.b32.xlu0 %v3578_v7, %s5246_s14  ;;  %v6083_v61 = vmax.f32 %v4252_v59, %v5850_v45  ;;  %v1728_v7 = vadd.f32 %v5910_v4, %v5571_v3  ;;  %v1329_v59 = vmul.f32 0.125, %v4873_v32  ;;  %v4875_v21 = vpop.eup %4874  ;;  %v6107_v3 = vpop.f32.mrb[6].mxu1  ;;  %4882 = vpow2.f32 %v1296_v36 }
 0x20d   : > { %v1331_v32 = vmul.f32 0.125, %v4875_v21  ;;  %v6113_v11 = vpop.f32.mrb[7].mxu1  ;;  %v1746_v40 = vsub.f32 0.0, %v1730_v25  ;;  %v1732_v21 = vadd.f32 %v5965_v6, %v5594_v13  ;;  %4884 = vpow2.f32 %v1300_v47 }
 0x20e   : > { %v1744_v4 = vsub.f32 0.0, %v1728_v7  ;;  %v6120_v7 = vmax.f32 %v4258_v26, %v5850_v45  ;;  %v1282_v26 = vsub.f32 %v5526_v38, %v6011_v5  ;;  %v1734_v25 = vadd.f32 %v5989_v56, %v5614_v20 }
 0x20f   : > { %2372 = vperm.xlu1 %4771, %v6083_v61   ;;  %v1764_v13 = vmul.f32 1.442695, %v1746_v40  ;;  %v1748_v6 = vsub.f32 0.0, %v1732_v21 }
 0x210   : > { %1469 = vperm.xlu0 %4772, %v1326_v43   ;;  %v6105_v43 = vmax.f32 %v4256_v39, %v5850_v45  ;;  %v6117_v39 = vpop.f32.mrb[8].mxu1  ;;  %v1760_v63 = vmul.f32 1.442695, %v1744_v4  ;;  %v6135_v4 = vmax.f32 %v4260_v0, %v5850_v45  ;;  %v1306_v47 = vmul.f32 1.442695, %v1282_v26 }
 0x211   : > { %v6122_v15 = vpop.f32.mrb[9].mxu1  ;;  %v1284_v0 = vsub.f32 %v5526_v38, %v6038_v9  ;;  %v1768_v20 = vmul.f32 1.442695, %v1748_v6  ;;  %v1738_v26 = vadd.f32 %v6038_v9, %v5638_v42 }
 0x212   : > { %v6127_v54 = vpop.f32.mrb[10].mxu1  ;;  %4886 = vpow2.f32 %v1760_v63  ;;  %v6148_v63 = vmax.f32 %v6009_v18, %v5850_v45 }
 0x213   : > { %2382 = vperm.xlu1 %4771, %v6092_v41   ;;  %v4877_v33 = vpop.eup %4876  ;;  %v6130_v29 = vpop.f32.mrb[11].mxu1 }
 0x214   : > { %1484 = vperm.xlu0 %4772, %v1329_v59   ;;  %v1280_v59 = vsub.f32 %v5526_v38, %v5989_v56  ;;  %v1333_v52 = vmul.f32 0.125, %v4877_v33  ;;  %v4879_v36 = vpop.eup %4878  ;;  %v1750_v56 = vsub.f32 0.0, %v1734_v25 }
 0x215   : > { %v1334_v33 = vmul.f32 0.125, %v4879_v36 }
 0x216   : > { %v1302_v14 = vmul.f32 1.442695, %v1280_v59  ;;  %v4881_v59 = vpop.eup %4880 }
 0x217   : > { %2392 = vperm.xlu1 %4771, %v6105_v43   ;;  %v4883_v40 = vpop.eup %4882  ;;  %v1336_v21 = vmul.f32 0.125, %v4881_v59  ;;  %v1754_v59 = vsub.f32 0.0, %v1738_v26 }
 0x218   : > { %1494 = vperm.xlu0 %4772, %v1331_v32   ;;  %v6140_v32 = vpop.f32.mrb[12].mxu1  ;;  %4888 = vpow2.f32 %v1302_v14  ;;  %v1325_v45 = vmul.f32 0.125, %v4883_v40 }
 0x219   : > { %4890 = vpow2.f32 %v1764_v13  ;;  %v6151_v36 = vpop.f32.mrb[13].mxu1  ;;  %v1780_v9 = vmul.f32 1.442695, %v1754_v59 }
 0x21a   : > { %4892 = vpow2.f32 %v1306_v47  ;;  %v1740_v47 = vadd.f32 %v6061_v10, %v5646_v48  ;;  %v6171_v26 = vpop.f32.mrb[14].mxu1 }
 0x21b   : > { %2402 = vperm.xlu1 %4771, %v6120_v7   ;;  %4894 = vpow2.f32 %v1768_v20  ;;  %v1742_v20 = vadd.f32 %v6078_v28, %v5665_v58  ;;  %v6169_v28 = vld [vmem:[%s5405_s20 + $0x48] sm:$0xff]   ;;  %7135 = vst [vmem:[#allocation39_spill] sm:$0xff] %v6171_v26 }
 0x21c   : > { %1504 = vperm.xlu0 %4772, %v1333_v52   ;;  %v1736_v52 = vadd.f32 %v6011_v5, %v5629_v31  ;;  %v1310_v31 = vmul.f32 1.442695, %v1284_v0  ;;  %v1772_v5 = vmul.f32 1.442695, %v1750_v56  ;;  %v1756_v0 = vsub.f32 0.0, %v1740_v47  ;;  %7134 = vst [vmem:[#allocation38_spill] sm:$0xff] %v6169_v28 }
 0x21d   : > { %v1758_v10 = vsub.f32 0.0, %v1742_v20  ;;  %v6186_v47 = vld [vmem:[%s5405_s20 + $0x58] sm:$0xff]   ;;  %v6211_v20 = vld [vmem:[%s5405_s20 + $0x70] sm:$0xff]  }
 0x21e   : > { %v1752_v14 = vsub.f32 0.0, %v1736_v52  ;;  %4896 = vpow2.f32 %v1310_v31  ;;  %v1784_v48 = vmul.f32 1.442695, %v1756_v0  ;;  %7138 = vst [vmem:[#allocation42_spill] sm:$0xff] %v6186_v47  ;;  %v6198_v0 = vld [vmem:[%s5405_s20 + $0x68] sm:$0xff]   ;;  %7141 = vst [vmem:[#allocation45_spill] sm:$0xff] %v6211_v20 }
 0x21f   : > { %2412 = vperm.xlu1 %4771, %v6135_v4   ;;  %4898 = vpow2.f32 %v1772_v5  ;;  %7140 = vst [vmem:[#allocation44_spill] sm:$0xff] %v6198_v0 }
 0x220   : > { %1509 = vperm.xlu0 %4772, %v1334_v33   ;;  %v4885_v33 = vpop.eup %4884  ;;  %v1776_v6 = vmul.f32 1.442695, %v1752_v14  ;;  %v6163_v14 = vld [vmem:[%s5405_s20 + $0x40] sm:$0xff]  }
 0x221   : > { %v4887_v13 = vpop.eup %4886  ;;  %v1327_v52 = vmul.f32 0.125, %v4885_v33  ;;  %7133 = vst [vmem:[#allocation37_spill] sm:$0xff] %v6163_v14  ;;  %4629 = vmatprep.subr.bf16.mxu1 %v6163_v14  ;;  %v1788_v33 = vmul.f32 1.442695, %v1758_v10 }
 0x222   : > { %v4889_v25 = vpop.eup %4888  ;;  %4900 = vpow2.f32 %v1776_v6  ;;  %4630 = vmatpush3.bf16.msra.mxu1 %v6163_v14 }
 0x223   : > { %2422 = vperm.xlu1 %4771, %v6148_v63   ;;  %v4891_v42 = vpop.eup %4890  ;;  %v1328_v56 = vmul.f32 0.125, %v4889_v25  ;;  %4902 = vpow2.f32 %v1780_v9  ;;  %4631 = vmatprep.subr.bf16.mxu1 %v6169_v28  ;;  %v6179_v25 = vld [vmem:[%s5405_s20 + $0x50] sm:$0xff]  }
 0x224   : > { %1519 = vperm.xlu0 %4772, %v1336_v21   ;;  %v4893_v40 = vpop.eup %4892  ;;  %4904 = vpow2.f32 %v1784_v48  ;;  %7137 = vst [vmem:[#allocation41_spill] sm:$0xff] %v6179_v25 }
 0x225   : > { %v4895_v21 = vpop.eup %4894  ;;  %v1330_v31 = vmul.f32 0.125, %v4893_v40  ;;  %4906 = vpow2.f32 %v1788_v33  ;;  %v5092_v33 = vld [vmem:[%s5416_s0 + $0x8] sm:$0xff] }
 0x226   : > { %4632 = vmatpush3.bf16.msra.mxu1 %v6169_v28 }
 0x227   : > { %4773 = vset.pattern.permute.xlu1 %v7132_v12  ;;  %4633 = vmatprep.subr.bf16.mxu1 %v6179_v25  ;;  %v5093_v12 = vld [vmem:[%s5416_s0 + $0x18] sm:$0xff] }
 0x228   : > { %1464 = vperm.xlu1 %4773, %v1325_v45   ;;  %1808 = vrot.lane.b32.xlu0 %v4887_v13, %s5247_s25  ;;  %v4897_v5 = vpop.eup %4896  ;;  %v6174_v45 = vpop.f32.mrb[15].mxu1 }
 0x229   : > { %v4899_v58 = vpop.eup %4898  ;;  %7136 = vst [vmem:[#allocation40_spill] sm:$0xff] %v6174_v45  ;;  %v1332_v13 = vmul.f32 0.125, %v4897_v5 }
 0x22a   : > { %4634 = vmatpush3.bf16.msra.mxu1 %v6179_v25  ;;  %v5100_v25 = vld [vmem:[%s5416_s0 + $0x78] sm:$0xff] }
 0x22b   : > { %4635 = vmatprep.subr.bf16.mxu1 %v6186_v47 }
 0x22c   : > { %1474 = vperm.xlu1 %4773, %v1327_v52   ;;  %1812 = vrot.lane.b32.xlu0 %v4891_v42, %s5247_s25  ;;  %v4901_v6 = vpop.eup %4900  ;;  %v6189_v42 = vld [vmem:[%s5405_s20 + $0x60] sm:$0xff]  }
 0x22d   : > { %v4903_v59 = vpop.eup %4902  ;;  %7139 = vst [vmem:[#allocation43_spill] sm:$0xff] %v6189_v42 }
 0x22e   : > { %v4905_v52 = vpop.eup %4904  ;;  %4636 = vmatpush3.bf16.msra.mxu1 %v6186_v47 }
 0x22f   : > { %4637 = vmatprep.subr.bf16.mxu1 %v6189_v42  ;;  %v4907_v9 = vpop.eup %4906 }
 0x230   : > { %1479 = vperm.xlu1 %4773, %v1328_v56   ;;  %1816 = vrot.lane.b32.xlu0 %v4895_v21, %s5247_s25 }
 0x232   : > { %4638 = vmatpush3.bf16.msra.mxu1 %v6189_v42 }
 0x233   : > { %4639 = vmatprep.subr.bf16.mxu1 %v6198_v0 }
 0x234   : > { %1489 = vperm.xlu1 %4773, %v1330_v31   ;;  %1820 = vrot.lane.b32.xlu0 %v4899_v58, %s5247_s25 }
 0x236   : > { %4640 = vmatpush3.bf16.msra.mxu1 %v6198_v0 }
 0x237   : > { %4641 = vmatprep.subr.bf16.mxu1 %v6211_v20 }
 0x238   : > { %1499 = vperm.xlu1 %4773, %v1332_v13   ;;  %1824 = vrot.lane.b32.xlu0 %v4901_v6, %s5247_s25  ;;  %v1729_v13 = vadd.f32 %v5092_v33, %v5902_v27  ;;  %v5094_v27 = vld [vmem:[%s5416_s0 + $0x28] sm:$0xff]  ;;  %v6271_v33 = vld [vmem:[%s5446_s18] sm:$0x1] }
 0x239   : > { %7143 = vst [vmem:[#allocation47_spill] sm:$0xff] %v6271_v33 }
 0x23a   : > { %4642 = vmatpush3.bf16.msra.mxu1 %v6211_v20 }
 0x23c   : > { %1828 = vrot.lane.b32.xlu0 %v4903_v59, %s5247_s25 }
 0x240   : > { %1832 = vrot.lane.b32.xlu0 %v4905_v52, %s5247_s25 }
 0x244   : > { %1836 = vrot.lane.b32.xlu0 %v4907_v9, %s5247_s25  ;;  %v1745_v9 = vsub.f32 0.0, %v1729_v13 }
 0x246   : > { %v1762_v45 = vmul.f32 1.442695, %v1745_v9 }
 0x248   : > { %2708 = vrot.lane.b32.xlu0 %v5868_v62, %s5246_s14  ;;  %v6218_v62 = vld [vmem:[%s5405_s20 + $0x78] sm:$0xff]  }
 0x249   : > { %7142 = vst [vmem:[#allocation46_spill] sm:$0xff] %v6218_v62  ;;  %4643 = vmatprep.subr.bf16.mxu1 %v6218_v62 }
 0x24a   : > { %4644 = vmatpush3.bf16.msra.mxu1 %v6218_v62 }
 0x24c   : > { %2712 = vrot.lane.b32.xlu0 %v6073_v16, %s5246_s14 }
 0x250   : > { %2716 = vrot.lane.b32.xlu0 %v6083_v61, %s5246_s14 }
 0x254   : > { %2720 = vrot.lane.b32.xlu0 %v6092_v41, %s5246_s14 }
 0x258   : > { %2724 = vrot.lane.b32.xlu0 %v6105_v43, %s5246_s14  ;;  %v6234_v43 = vpop.permute.xlu1 %1252 }
 0x25c   : > { %2728 = vrot.lane.b32.xlu0 %v6120_v7, %s5246_s14  ;;  %v6238_v56 = vpop.permute.xlu1 %1256 }
 0x25d   : > { %v1289_v5 = vsub.f32 %v5526_v38, %v6238_v56 }
 0x25f   : > { %v1320_v6 = vmul.f32 1.442695, %v1289_v5 }
 0x260   : > { %2732 = vrot.lane.b32.xlu0 %v6135_v4, %s5246_s14  ;;  %v6242_v4 = vpop.permute.xlu1 %2146 }
 0x261   : > { %v6226_v41 = vpop.permute.xlu0 %2352 }
 0x264   : > { %2736 = vrot.lane.b32.xlu0 %v6148_v63, %s5246_s14  ;;  %v1287_v63 = vsub.f32 %v5526_v38, %v6234_v43 }
 0x266   : > { %v1316_v31 = vmul.f32 1.442695, %v1287_v63  ;;  %v1731_v63 = vadd.f32 %v5093_v12, %v5945_v49 }
 0x267   : > { %v6230_v16 = vpop.permute.xlu0 %2367 }
 0x268   : > { %4908 = vpow2.f32 %v1316_v31  ;;  %v1747_v62 = vsub.f32 0.0, %v1731_v63  ;;  %v1733_v31 = vadd.f32 %v5094_v27, %v5975_v50  ;;  %v5096_v50 = vld [vmem:[%s5416_s0 + $0x38] sm:$0xff] }
 0x269   : > { %4910 = vpow2.f32 %v1320_v6  ;;  %v1735_v63 = vadd.f32 %v5096_v50, %v6003_v1 }
 0x26a   : > { %4912 = vpow2.f32 %v1762_v45  ;;  %v1766_v6 = vmul.f32 1.442695, %v1747_v62  ;;  %v1749_v9 = vsub.f32 0.0, %v1733_v31  ;;  %v5097_v62 = vld [vmem:[%s5416_s0 + $0x48] sm:$0xff] }
 0x26b   : > { %v6232_v61 = vpop.permute.xlu0 %2377  ;;  %v1751_v45 = vsub.f32 0.0, %v1735_v63  ;;  %v1737_v31 = vadd.f32 %v5097_v62, %v6024_v22 }
 0x26c   : > { %4914 = vpow2.f32 %v1766_v6 }
 0x26f   : > { %v6236_v7 = vpop.permute.xlu0 %2387 }
 0x272   : > { %v4909_v20 = vpop.eup %4908 }
 0x273   : > { %v4911_v0 = vpop.eup %4910 }
 0x274   : > { %v6240_v40 = vpop.permute.xlu0 %2397  ;;  %v1337_v1 = vmul.f32 0.125, %v4911_v0 }
 0x278   : > { %v6244_v21 = vpop.permute.xlu0 %2407 }
 0x27d   : > { %v6248_v48 = vpop.permute.xlu1 %1454  ;;  %v6250_v10 = vpop.permute.xlu0 %2417 }
 0x282   : > { %v6254_v58 = vpop.permute.xlu1 %2347  ;;  %v6258_v59 = vpop.permute.xlu0 %1449 }
 0x286   : > { %v6260_v52 = vpop.permute.xlu1 %2357 }
 0x287   : > { %v6264_v26 = vpop.permute.xlu0 %1459 }
 0x28a   : > { %v6266_v38 = vpop.permute.xlu1 %2362 }
 0x28b   : > { %v3580_v5 = vpop.permute.xlu0 %3579 }
 0x28c   : > { %v6274_v13 = vmax.f32 %v6271_v33, %v3580_v5  ;;  %v1335_v33 = vmul.f32 0.125, %v4909_v20  ;;  %v1753_v20 = vsub.f32 0.0, %v1737_v31 }
 0x28e   : > { %7144 = vst [vmem:[#allocation48_spill] sm:$0xff] %v6274_v13  ;;  %v6276_v49 = vpop.permute.xlu1 %2372  ;;  %v3725_v12 = vrot.slane %v6274_v13, %v5518_v35  ;;  %3596 = vperm.xlu1 %4773, %v6274_v13   ;;  %v1770_v13 = vmul.f32 1.442695, %v1749_v9  ;;  %v4913_v9 = vpop.eup %4912  ;;  %v1778_v22 = vmul.f32 1.442695, %v1753_v20 }
 0x28f   : > { %v6283_v27 = vpop.permute.xlu0 %1469  ;;  %v4915_v62 = vpop.eup %4914 }
 0x290   : > { %v3727_v5 = vadd.f32 %v6009_v18, %v3725_v12  ;;  %4916 = vpow2.f32 %v1770_v13  ;;  %v1774_v18 = vmul.f32 1.442695, %v1751_v45  ;;  %v5098_v12 = vld [vmem:[%s5416_s0 + $0x58] sm:$0xff] }
 0x292   : > { %v6286_v42 = vpop.permute.xlu1 %2382  ;;  %3728 = vst.msk [vmem:[%s5446_s18 - $0x7] sm:$0x80] %vm2249_vm4, %v3727_v5  ;;  %1514 = vperm.xlu1 %4773, %v1335_v33   ;;  %v1739_v33 = vadd.f32 %v5098_v12, %v6056_v17  ;;  %4918 = vpow2.f32 %v1774_v18  ;;  %v5099_v5 = vld [vmem:[%s5416_s0 + $0x68] sm:$0xff]  ;;  %v6310_v17 = vld [vmem:[%s5411_s10 + $0x1] sm:$0x1]  ;;  %v1743_v18 = vadd.f32 %v5100_v25, %v6238_v56  ;;  %vm2234_vm4 = vcmask 531456  }
 0x293   : > { %v6292_v47 = vpop.permute.xlu0 %1484  ;;  %v1741_v13 = vadd.f32 %v5099_v5, %v6234_v43  ;;  %7145 = vst [vmem:[#allocation49_spill] sm:$0xff] %v6310_v17  ;;  %4920 = vpow2.f32 %v1778_v22 }
 0x294   : > { %v1755_v0 = vsub.f32 0.0, %v1739_v33 }
 0x295   : > { %v1757_v12 = vsub.f32 0.0, %v1741_v13 }
 0x296   : > { %v6294_v50 = vpop.permute.xlu1 %2392  ;;  %1524 = vperm.xlu1 %4773, %v1337_v1   ;;  %v1782_v1 = vmul.f32 1.442695, %v1755_v0  ;;  %v1759_v0 = vsub.f32 0.0, %v1743_v18 }
 0x297   : > { %v6298_v6 = vpop.permute.xlu0 %1494  ;;  %v1786_v22 = vmul.f32 1.442695, %v1757_v12 }
 0x298   : > { %4922 = vpow2.f32 %v1782_v1 }
 0x299   : > { %4924 = vpow2.f32 %v1786_v22 }
 0x29a   : > { %v6300_v63 = vpop.permute.xlu1 %2402  ;;  %1810 = vrot.lane.b32.xlu1 %v4913_v9, %s5247_s25  ;;  %v4917_v43 = vpop.eup %4916  ;;  %v6320_v9 = vrot.slane %v6310_v17, %v5518_v35 }
 0x29b   : > { %v6305_v45 = vpop.permute.xlu0 %1504 }
 0x29c   : > { %v4919_v25 = vpop.eup %4918  ;;  %v2427_v1 = vsub.f32 %v6320_v9, %v6260_v52  ;;  %v2425_v18 = vsub.f32 %v6320_v9, %v6254_v58  ;;  %v2434_v55 = vsub.f32 %v6320_v9, %v6294_v50 }
 0x29d   : > { %v4921_v35 = vpop.eup %4920 }
 0x29e   : > { %v6307_v31 = vpop.permute.xlu1 %2412  ;;  %1814 = vrot.lane.b32.xlu1 %v4915_v62, %s5247_s25 }
 0x29f   : > { %v1510_v20 = vpop.permute.xlu0 %1509 }
 0x2a0   : > { %v6316_v33 = vmul.f32 %v1510_v20, %v6151_v36  ;;  %v2426_v36 = vsub.f32 %v6320_v9, %v6226_v41  ;;  %v1790_v20 = vmul.f32 1.442695, %v1759_v0  ;;  %v2428_v41 = vsub.f32 %v6320_v9, %v6266_v38 }
 0x2a1   : > { %v2429_v38 = vsub.f32 %v6320_v9, %v6230_v16  ;;  %v1529_v16 = vmul.f32 %v6028_v8, %v6264_v26 }
 0x2a2   : > { %v6322_v5 = vpop.permute.xlu1 %2422  ;;  %1818 = vrot.lane.b32.xlu1 %v4917_v43, %s5247_s25  ;;  %v2443_v43 = vmul.f32 1.442695, %v2426_v36  ;;  %4926 = vpow2.f32 %v1790_v20  ;;  %v4923_v0 = vpop.eup %4922  ;;  %v5101_v20 = vld [vmem:[#allocation2 + $0x10] sm:$0xff] }
 0x2a3   : > { %v1520_v13 = vpop.permute.xlu0 %1519  ;;  %v4925_v36 = vpop.eup %4924  ;;  %v2151_v58 = vmul.f32 %v5101_v20, %v6242_v4  ;;  %v2449_v8 = vmul.f32 1.442695, %v2429_v38 }
 0x2a4   : > { %v6326_v62 = vmul.f32 %v6140_v32, %v1520_v13  ;;  %v2431_v32 = vsub.f32 %v6320_v9, %v6232_v61  ;;  %4928 = vpow2.f32 %v2443_v43  ;;  %v2445_v13 = vmul.f32 1.442695, %v2427_v1 }
 0x2a5   : > { %v2447_v61 = vmul.f32 1.442695, %v2428_v41 }
 0x2a6   : > { %1822 = vrot.lane.b32.xlu1 %v4919_v25, %s5247_s25  ;;  %v2453_v52 = vmul.f32 1.442695, %v2431_v32  ;;  %4930 = vpow2.f32 %v2445_v13  ;;  %v5103_v32 = vld [vmem:[#allocation2 + $0x18] sm:$0xff]  ;;  %v2432_v13 = vsub.f32 %v6320_v9, %v6286_v42 }
 0x2a7   : > { %v1465_v56 = vpop.permute.xlu1 %1464  ;;  %v6331_v17 = vpop.permute.xlu0 %1808  ;;  %v2152_v41 = vmul.f32 %v5103_v32, %v6242_v4  ;;  %v2430_v32 = vsub.f32 %v6320_v9, %v6276_v49 }
 0x2a8   : > { %7146 = vst [vmem:[#allocation50_spill] sm:$0xff] %v6331_v17  ;;  %4932 = vpow2.f32 %v2453_v52  ;;  %v1530_v26 = vmul.f32 %v6048_v23, %v1465_v56  ;;  %v2455_v38 = vmul.f32 1.442695, %v2432_v13  ;;  %v5107_v13 = vld [vmem:[#allocation2 + $0x38] sm:$0xff] }
 0x2a9   : > { %4934 = vpow2.f32 %v2447_v61 }
 0x2aa   : > { %1826 = vrot.lane.b32.xlu1 %v4921_v35, %s5247_s25  ;;  %v2441_v35 = vmul.f32 1.442695, %v2425_v18  ;;  %v5104_v18 = vld [vmem:[#allocation2 + $0x8] sm:$0xff] }
 0x2ab   : > { %v6340_v12 = vpop.permute.xlu0 %1812  ;;  %v6344_v22 = vpop.permute.xlu1 %1474 }
 0x2ac   : > { %7147 = vst [vmem:[#allocation51_spill] sm:$0xff] %v6340_v12  ;;  %v5102_v12 = vld [vmem:[#allocation2] sm:$0xff]  ;;  %4936 = vpow2.f32 %v2441_v35  ;;  %v4927_v14 = vpop.eup %4926 }
 0x2ad   : > { %v2149_v17 = vmul.f32 %v5102_v12, %v6242_v4  ;;  %4938 = vpow2.f32 %v2449_v8 }
 0x2ae   : > { %1830 = vrot.lane.b32.xlu1 %v4923_v0, %s5247_s25  ;;  %v2150_v0 = vmul.f32 %v5104_v18, %v6242_v4  ;;  %v4929_v56 = vpop.eup %4928  ;;  %4940 = vpow2.f32 %v2455_v38 }
 0x2af   : > { %v6347_v25 = vpop.permute.xlu0 %1816  ;;  %v1480_v43 = vpop.permute.xlu1 %1479 }
 0x2b0   : > { %7148 = vst [vmem:[#allocation52_spill] sm:$0xff] %v6347_v25  ;;  %v1533_v8 = vmul.f32 %v6098_v57, %v1480_v43  ;;  %v1534_v57 = vmul.f32 %v6107_v3, %v6292_v47 }
 0x2b2   : > { %1834 = vrot.lane.b32.xlu1 %v4925_v36, %s5247_s25  ;;  %v1527_v36 = vmul.f32 %v6258_v59, %v6042_v34  ;;  %v2433_v34 = vsub.f32 %v6320_v9, %v6236_v7  ;;  %v1528_v59 = vmul.f32 %v6248_v48, %v6054_v53  ;;  %v5105_v48 = vld [vmem:[#allocation2 + $0x30] sm:$0xff] }
 0x2b3   : > { %v6360_v12 = vpop.permute.xlu0 %1820 }
 0x2b4   : > { %v4575_v1 = vpop.f32.mrb[16].mxu1 }
 0x2b5   : > { %v2228_v52 = vadd.f32 %v4575_v1, %v2151_v58  ;;  %v2195_v20 = vpop.f32.mrb[17].mxu1 }
 0x2b6   : > { %v2226_v25 = vadd.f32 %v2195_v20, %v2149_v17  ;;  %v4576_v18 = vpop.f32.mrb[18].mxu1  ;;  %v4543_v28 = vpop.f32.mrb[16].mxu0  ;;  %1838 = vrot.lane.b32.xlu1 %v4927_v14, %s5247_s25  ;;  %v2435_v14 = vsub.f32 %v6320_v9, %v6240_v40  ;;  %v2457_v20 = vmul.f32 1.442695, %v2433_v34 }
 0x2b7   : > { %2237 = vst.msk [vmem:[#allocation2 + $0x10] sm:$0xff] %vm2234_vm4, %v2228_v52  ;;  %v2229_v42 = vadd.f32 %v4576_v18, %v2152_v41  ;;  %v2198_v61 = vpop.f32.mrb[19].mxu1  ;;  %v6368_v58 = vadd.f32 %v4543_v28, %v1529_v16  ;;  %v1633_v35 = vpop.f32.mrb[17].mxu0  ;;  %v2451_v41 = vmul.f32 1.442695, %v2430_v32  ;;  %v2156_v52 = vmul.f32 %v5107_v13, %v6242_v4  ;;  %v5108_v18 = vld [vmem:[#allocation2 + $0x28] sm:$0xff] }
 0x2b8   : > { %2235 = vst.msk [vmem:[#allocation2] sm:$0xff] %vm2234_vm4, %v2226_v25  ;;  %v2227_v49 = vadd.f32 %v2198_v61, %v2150_v0  ;;  %v6376_v17 = vadd.f32 %v1633_v35, %v1527_v36  ;;  %v4544_v23 = vpop.f32.mrb[18].mxu0  ;;  %v6378_v1 = vpop.permute.xlu0 %1824  ;;  %v2155_v25 = vmul.f32 %v5105_v48, %v6242_v4  ;;  %v5106_v0 = vld [vmem:[#allocation2 + $0x20] sm:$0xff]  ;;  %v2154_v40 = vmul.f32 %v5108_v18, %v6242_v4 }
 0x2b9   : > { %2238 = vst.msk [vmem:[#allocation2 + $0x18] sm:$0xff] %vm2234_vm4, %v2229_v42  ;;  %v6381_v28 = vadd.f32 %v4544_v23, %v1530_v26  ;;  %v1636_v7 = vpop.f32.mrb[19].mxu0  ;;  %v2153_v16 = vmul.f32 %v5106_v0, %v6242_v4  ;;  %v6391_v36 = vpop.permute.xlu1 %1489  ;;  %v2474_v26 = vsel %vm760_vm6, %v4929_v56, 0.0  ;;  %v2436_v61 = vsub.f32 %v6320_v9, %v6300_v63 }
 0x2ba   : > { %2236 = vst.msk [vmem:[#allocation2 + $0x8] sm:$0xff] %vm2234_vm4, %v2227_v49  ;;  %v6384_v53 = vadd.f32 %v1636_v7, %v1528_v59  ;;  %2706 = vrot.lane.b32.xlu1 %v6045_v51, %s5246_s14  ;;  %v4931_v42 = vpop.eup %4930  ;;  %4942 = vpow2.f32 %v2451_v41  ;;  %v1531_v4 = vmul.f32 %v6283_v27, %v6100_v2  ;;  %v2461_v7 = vmul.f32 1.442695, %v2435_v14 }
 0x2bb   : > { %v4933_v51 = vpop.eup %4932  ;;  %v1532_v2 = vmul.f32 %v6344_v22, %v6113_v11  ;;  %v2475_v47 = vsel %vm761_vm8, %v4931_v42, 0.0  ;;  %4944 = vpow2.f32 %v2457_v20  ;;  %v2439_v14 = vsub.f32 %v6320_v9, %v6250_v10 }
 0x2bc   : > { %v6402_v35 = vpop.permute.xlu0 %1828  ;;  %v4935_v38 = vpop.eup %4934  ;;  %v2463_v0 = vmul.f32 1.442695, %v2436_v61  ;;  %4946 = vpow2.f32 %v2461_v7  ;;  %v2675_v61 = vmul.f32 0.125, %v2474_v26  ;;  %v2440_v26 = vsub.f32 %v6320_v9, %v6322_v5 }
 0x2bd   : > { %v1500_v18 = vpop.permute.xlu1 %1499  ;;  %v2476_v10 = vsel %vm762_vm7, %v4935_v38, 0.0  ;;  %vm2064_vm7 = vcmask 519168  }
 0x2be   : > { %v4547_v56 = vpop.f32.mrb[20].mxu0  ;;  %2710 = vrot.lane.b32.xlu1 %v6064_v24, %s5246_s14  ;;  %v2820_v42 = vld [vmem:[#allocation2 + $0x10] sm:$0xff]  ;;  %4948 = vpow2.f32 %v2463_v0  ;;  %v1537_v60 = vmul.f32 %v6117_v39, %v1500_v18 }
 0x2bf   : > { %v4579_v32 = vpop.f32.mrb[20].mxu1  ;;  %v6411_v48 = vadd.f32 %v4547_v56, %v1533_v8  ;;  %v1649_v41 = vpop.f32.mrb[21].mxu0  ;;  %v2818_v22 = vld [vmem:[#allocation2] sm:$0xff]  ;;  %v6442_v8 = vsel %vm765_vm10, %v4933_v51, 0.0 }
 0x2c0   : > { %v2232_v34 = vadd.f32 %v4579_v32, %v2155_v25  ;;  %v2211_v59 = vpop.f32.mrb[21].mxu1  ;;  %v4937_v25 = vpop.eup %4936  ;;  %v6418_v50 = vadd.f32 %v1649_v41, %v1531_v4  ;;  %v2459_v32 = vmul.f32 1.442695, %v2434_v55  ;;  %v2676_v4 = vmul.f32 0.125, %v2475_v47 }
 0x2c1   : > { %v2230_v49 = vadd.f32 %v2211_v59, %v2153_v16  ;;  %v4580_v23 = vpop.f32.mrb[22].mxu1  ;;  %v4548_v3 = vpop.f32.mrb[22].mxu0  ;;  %v2819_v13 = vld [vmem:[#allocation2 + $0x8] sm:$0xff]  ;;  %v2438_v59 = vsub.f32 %v6320_v9, %v6307_v31  ;;  %v2469_v31 = vmul.f32 1.442695, %v2439_v14  ;;  %v1536_v47 = vmul.f32 %v6298_v6, %v6130_v29 }
 0x2c2   : > { %2241 = vst.msk [vmem:[#allocation2 + $0x30] sm:$0xff] %vm2234_vm4, %v2232_v34  ;;  %v2233_v63 = vadd.f32 %v4580_v23, %v2156_v52  ;;  %v2214_v43 = vpop.f32.mrb[23].mxu1  ;;  %v6425_v16 = vpop.permute.xlu0 %1832  ;;  %v6428_v24 = vadd.f32 %v4548_v3, %v1534_v57  ;;  %v2821_v52 = vld [vmem:[#allocation2 + $0x18] sm:$0xff]  ;;  %v2826_v20 = vpack.c.bf16 %v2819_v13, %v2818_v22  ;;  %v2437_v34 = vsub.f32 %v6320_v9, %v6244_v21 }
 0x2c3   : > { %2239 = vst.msk [vmem:[#allocation2 + $0x20] sm:$0xff] %vm2234_vm4, %v2230_v49  ;;  %v2231_v27 = vadd.f32 %v2214_v43, %v2154_v40  ;;  %v1652_v11 = vpop.f32.mrb[23].mxu0  ;;  %v2473_v40 = vsel %vm759_vm5, %v4937_v25, 0.0  ;;  %2714 = vrot.lane.b32.xlu1 %v5894_v46, %s5246_s14  ;;  %v2827_v30 = vpack.c.bf16 %v2821_v52, %v2820_v42  ;;  %v2677_v21 = vmul.f32 0.125, %v2476_v10  ;;  %v4939_v49 = vpop.eup %4938  ;;  %v7150_v52 = vld [vmem:[#allocation20_spill] sm:$0xff]  ;;  %v7160_v10 = vld [vmem:[#allocation37_spill] sm:$0xff] }
 0x2c4   : > { %2242 = vst.msk [vmem:[#allocation2 + $0x38] sm:$0xff] %vm2234_vm4, %v2233_v63  ;;  %v6431_v37 = vadd.f32 %v1652_v11, %v1532_v2  ;;  %4605 = vmatprep.subr.bf16.mxu0 %v2826_v20  ;;  %4950 = vpow2.f32 %v2459_v32  ;;  %v1535_v46 = vmul.f32 %v6391_v36, %v6122_v15  ;;  %v2674_v23 = vmul.f32 0.125, %v2473_v40  ;;  %v4941_v7 = vpop.eup %4940  ;;  %v7149_v2 = vld [vmem:[#allocation28_spill] sm:$0xff] }
 0x2c5   : > { %2240 = vst.msk [vmem:[#allocation2 + $0x28] sm:$0xff] %vm2234_vm4, %v2231_v27  ;;  %4606 = vmatpush3.bf16.msra.mxu0 %v2826_v20  ;;  %v1538_v9 = vmul.f32 %v6127_v54, %v6305_v45  ;;  %v4943_v41 = vpop.eup %4942  ;;  %v2467_v25 = vmul.f32 1.442695, %v2438_v59  ;;  %v2471_v54 = vmul.f32 1.442695, %v2440_v26  ;;  %v2480_v40 = vsel %vm766_vm12, %v4941_v7, 0.0 }
 0x2c6   : > { %v6453_v51 = vpop.permute.xlu0 %1836  ;;  %4607 = vmatprep.subr.bf16.mxu0 %v2827_v30  ;;  %v4551_v38 = vpop.f32.mrb[24].mxu0  ;;  %v2465_v13 = vmul.f32 1.442695, %v2437_v34  ;;  %4952 = vpow2.f32 %v2469_v31  ;;  %v2680_v31 = vmul.f32 0.125, %v6442_v8 }
 0x2c7   : > { %v4591_v19 = vpop.f32.mrb[24].mxu1  ;;  %v6459_v63 = vadd.f32 %v4551_v38, %v1537_v60  ;;  %v1665_v43 = vpop.f32.mrb[25].mxu0  ;;  %2718 = vrot.lane.b32.xlu1 %v7149_v2, %s5246_s14  ;;  %4954 = vpow2.f32 %v2467_v25  ;;  %v2477_v60 = vsel %vm763_vm9, %v4939_v49, 0.0 }
 0x2c8   : > { %v2611_v55 = vpop.f32.mrb[25].mxu1  ;;  %v2692_v39 = vmul.f32 %v4591_v19, %v2676_v4  ;;  %v6463_v27 = vadd.f32 %v1665_v43, %v1535_v46  ;;  %v4552_v3 = vpop.f32.mrb[26].mxu0  ;;  %v2478_v19 = vsel %vm764_vm11, %v4943_v41, 0.0  ;;  %v7153_v4 = vld [vmem:[#allocation32_spill] sm:$0xff]  ;;  %4956 = vpow2.f32 %v2471_v54  ;;  %v7155_v41 = vld [vmem:[#allocation34_spill] sm:$0xff] }
 0x2c9   : > { %v4592_v56 = vpop.f32.mrb[26].mxu1  ;;  %v2690_v15 = vmul.f32 %v2674_v23, %v2611_v55  ;;  %v6469_v0 = vadd.f32 %v4552_v3, %v1538_v9  ;;  %4608 = vmatpush3.bf16.msra.mxu0 %v2827_v30  ;;  %v1668_v11 = vpop.f32.mrb[27].mxu0  ;;  %v2824_v55 = vld [vmem:[#allocation2 + $0x30] sm:$0xff]  ;;  %v2681_v23 = vmul.f32 0.125, %v2480_v40  ;;  %v2679_v7 = vmul.f32 0.125, %v2478_v19  ;;  %v7161_v40 = vld [vmem:[#allocation35_spill] sm:$0xff] }
 0x2ca   : > { %v2693_v5 = vmul.f32 %v4592_v56, %v2677_v21  ;;  %v2614_v57 = vpop.f32.mrb[27].mxu1  ;;  %v6467_v45 = vpop.permute.xlu0 %2708  ;;  %v2822_v20 = vld [vmem:[#allocation2 + $0x20] sm:$0xff]  ;;  %v6476_v42 = vadd.f32 %v1668_v11, %v1536_v47 }
 0x2cb   : > { %v2691_v36 = vmul.f32 %v2675_v61, %v2614_v57  ;;  %v2755_v32 = vsub.f32 %v7150_v52, %v6467_v45  ;;  %v2825_v29 = vld [vmem:[#allocation2 + $0x38] sm:$0xff]  ;;  %v4945_v6 = vpop.eup %4944  ;;  %2722 = vrot.lane.b32.xlu1 %v7153_v4, %s5246_s14  ;;  %v5116_v11 = vld [vmem:[%s5400_s29 + $0x20] sm:$0xff]  }
 0x2cc   : > { %v3024_v14 = vpack.c.bf16 %v2693_v5, %v2692_v39  ;;  %v2823_v22 = vld [vmem:[#allocation2 + $0x28] sm:$0xff]  ;;  %v4947_v21 = vpop.eup %4946  ;;  %v2829_v56 = vpack.c.bf16 %v2825_v29, %v2824_v55  ;;  %v2678_v5 = vmul.f32 0.125, %v2477_v60 }
 0x2cd   : > { %v3023_v18 = vpack.c.bf16 %v2691_v36, %v2690_v15  ;;  %v2828_v61 = vpack.c.bf16 %v2823_v22, %v2822_v20  ;;  %v2772_v34 = vmul.f32 1.442695, %v2755_v32  ;;  %v4949_v9 = vpop.eup %4948 }
 0x2ce   : > { %v4951_v43 = vpop.eup %4950  ;;  %v2484_v22 = vsel %vm770_vm0, %v4949_v9, 0.0 }
 0x2cf   : > { %v4595_v30 = vpop.f32.mrb[28].mxu1  ;;  %4645 = vmatprep.mubr.bf16.mxu1 %v3023_v18  ;;  %4609 = vmatprep.subr.bf16.mxu0 %v2828_v61  ;;  %4958 = vpow2.f32 %v2772_v34  ;;  %v4555_v25 = vpop.f32.mrb[28].mxu0  ;;  %v5109_v34 = vld [vmem:[%s5395_s17 + $0x48] sm:$0xff]  }
 0x2d0   : > { %v2627_v46 = vpop.f32.mrb[29].mxu1  ;;  %4646 = vmatmul.mubr.bf16.vlgmr.msra.gmra.mrb[40].mxu1 %v3024_v14  ;;  %4610 = vmatpush3.bf16.msra.mxu0 %v2828_v61  ;;  %4960 = vpow2.f32 %v2465_v13  ;;  %v2696_v39 = vmul.f32 %v4595_v30, %v2680_v31  ;;  %v6490_v36 = vadd.f32 %v4555_v25, %v6326_v62  ;;  %v1681_v3 = vpop.f32.mrb[29].mxu0  ;;  %v2483_v14 = vsel %vm769_vm14, %v4947_v21, 0.0  ;;  %v7158_v62 = vld [vmem:[#allocation26_spill] sm:$0xff]  ;;  %v7162_v61 = vld [vmem:[#allocation24_spill] sm:$0xff]  ;;  %v5110_v21 = vld [vmem:[%s5395_s17 + $0x50] sm:$0xff]  }
 0x2d1   : > { %v4596_v38 = vpop.f32.mrb[30].mxu1  ;;  %4611 = vmatprep.subr.bf16.mxu0 %v2829_v56  ;;  %2726 = vrot.lane.b32.xlu1 %v7155_v41, %s5246_s14  ;;  %v2694_v2 = vmul.f32 %v2678_v5, %v2627_v46  ;;  %v6492_v47 = vpop.f32.mrb[30].mxu0  ;;  %v6501_v32 = vadd.f32 %v1681_v3, %v6316_v33  ;;  %vm7159_vm5 = vcmp.le.s32.totalorder %v5737_v44, %v7158_v62  ;;  %v2684_v33 = vmul.f32 0.125, %v2483_v14  ;;  %v7178_v41 = vld [vmem:[#allocation40_spill] sm:$0xff] }
 0x2d2   : > { %v2697_v57 = vmul.f32 %v4596_v38, %v2681_v23  ;;  %v2630_v49 = vpop.f32.mrb[31].mxu1  ;;  %v6503_v18 = vpop.f32.mrb[31].mxu0  ;;  %v2482_v20 = vsel %vm7159_vm5, %v4951_v43, 0.0  ;;  %vm7163_vm6 = vcmp.le.s32.totalorder %v5737_v44, %v7162_v61  ;;  %v2685_v30 = vmul.f32 0.125, %v2484_v22 }
 0x2d3   : > { %v2695_v8 = vmul.f32 %v2679_v7, %v2630_v49  ;;  %v2481_v59 = vsel %vm7163_vm6, %v4945_v6, 0.0  ;;  %v4953_v19 = vpop.eup %4952  ;;  %v2683_v55 = vmul.f32 0.125, %v2482_v20  ;;  %v7164_v7 = vld [vmem:[#allocation36_spill] sm:$0xff] }
 0x2d4   : > { %v3026_v15 = vpack.c.bf16 %v2697_v57, %v2696_v39  ;;  %4612 = vmatpush3.bf16.msra.mxu0 %v2829_v56  ;;  %v4955_v26 = vpop.eup %4954  ;;  %v2682_v23 = vmul.f32 0.125, %v2481_v59  ;;  %v7165_v39 = vld [vmem:[#allocation38_spill] sm:$0xff]  ;;  %v5112_v59 = vld [vmem:[%s5395_s17 + $0x60] sm:$0xff]  }
 0x2d5   : > { %v3025_v13 = vpack.c.bf16 %v2695_v8, %v2694_v2  ;;  %4661 = vmatprep.subr.bf16.mxu0 %v7160_v10  ;;  %2730 = vrot.lane.b32.xlu1 %v7161_v40, %s5246_s14  ;;  %v4957_v31 = vpop.eup %4956  ;;  %v2487_v8 = vsel %vm773_vm2, %v4953_v19, 0.0  ;;  %v2486_v54 = vsel %vm772_vm15, %v4955_v26, 0.0  ;;  %v5111_v40 = vld [vmem:[%s5395_s17 + $0x58] sm:$0xff]  }
 0x2d6   : > { %v2488_v2 = vsel %vm774_vm13, %v4957_v31, 0.0  ;;  %v2688_v62 = vmul.f32 0.125, %v2487_v8  ;;  %v2687_v61 = vmul.f32 0.125, %v2486_v54  ;;  %v5113_v31 = vld [vmem:[%s5395_s17 + $0x68] sm:$0xff]  }
 0x2d7   : > { %v4599_v29 = vpop.f32.mrb[32].mxu1  ;;  %4614 = vmatmul.mubr.msk.bf16.vlgmr.msra.gmra.mrb[32].mxu0 %vm1072_vm3, %v5109_v34  ;;  %4649 = vmatprep.mubr.bf16.mxu1 %v3025_v13  ;;  %v7170_v13 = vld [vmem:[#allocation41_spill] sm:$0xff] }
 0x2d8   : > { %v2643_v4 = vpop.f32.mrb[33].mxu1  ;;  %4650 = vmatmul.mubr.bf16.gmra.mrb[44].mxu1 %v3026_v15  ;;  %4617 = vmatprep.mubr.msk.bf16.mxu0 %vm1072_vm3, %v5110_v21  ;;  %v2700_v46 = vmul.f32 %v4599_v29, %v2684_v33  ;;  %v7172_v21 = vld [vmem:[#allocation43_spill] sm:$0xff] }
 0x2d9   : > { %v4600_v60 = vpop.f32.mrb[34].mxu1  ;;  %4662 = vmatpush3.bf16.msra.mxu0 %v7160_v10  ;;  %v4959_v38 = vpop.eup %4958  ;;  %2734 = vrot.lane.b32.xlu1 %v7164_v7, %s5246_s14  ;;  %v2698_v49 = vmul.f32 %v2682_v23, %v2643_v4  ;;  %v2689_v10 = vmul.f32 0.125, %v2488_v2  ;;  %v7173_v23 = vld [vmem:[#allocation44_spill] sm:$0xff] }
 0x2da   : > { %v2701_v56 = vmul.f32 %v4600_v60, %v2685_v30  ;;  %v2646_v6 = vpop.f32.mrb[35].mxu1  ;;  %4663 = vmatprep.subr.bf16.mxu0 %v7165_v39  ;;  %v4961_v5 = vpop.eup %4960  ;;  %v2803_v57 = vmul.f32 0.125, %v4959_v38  ;;  %v7171_v30 = vld [vmem:[#allocation42_spill] sm:$0xff] }
 0x2db   : > { %v2699_v9 = vmul.f32 %v2683_v55, %v2646_v6  ;;  %v2485_v22 = vsel %vm771_vm1, %v4961_v5, 0.0  ;;  %v5115_v6 = vld [vmem:[%s5395_s17 + $0x78] sm:$0xff]   ;;  %v7177_v5 = vld [vmem:[#allocation49_spill] sm:$0xff] }
 0x2dc   : > { %v3028_v43 = vpack.c.bf16 %v2701_v56, %v2700_v46  ;;  %2934 = vperm.xlu0 %4772, %v2803_v57   ;;  %v2686_v44 = vmul.f32 0.125, %v2485_v22  ;;  %v5114_v46 = vld [vmem:[%s5395_s17 + $0x70] sm:$0xff]   ;;  %v7175_v38 = vld [vmem:[#allocation46_spill] sm:$0xff]  ;;  %v3586_v22 = vunpack.c.l.bf16 %v5116_v11 }
 0x2dd   : > { %v3027_v15 = vpack.c.bf16 %v2699_v9, %v2698_v49  ;;  %4664 = vmatpush3.bf16.msra.mxu0 %v7165_v39  ;;  %v7174_v56 = vld [vmem:[#allocation45_spill] sm:$0xff]  ;;  %v7176_v9 = vld [vmem:[#allocation19_spill] sm:$0xff] }
 0x2de   : > { %4665 = vmatprep.subr.bf16.mxu0 %v7170_v13 }
 0x2df   : > { %v4603_v14 = vpop.f32.mrb[36].mxu1  ;;  %4653 = vmatprep.mubr.bf16.mxu1 %v3027_v15  ;;  %4618 = vmatmul.mubr.msk.bf16.gmra.mrb[36].mxu0 %vm1072_vm3, %v5111_v40  ;;  %v7179_v15 = vld [vmem:[#allocation39_spill] sm:$0xff] }
 0x2e0   : > { %v2659_v20 = vpop.f32.mrb[37].mxu1  ;;  %4654 = vmatmul.mubr.bf16.gmra.mrb[48].mxu1 %v3028_v43  ;;  %4621 = vmatprep.mubr.msk.bf16.mxu0 %vm1072_vm3, %v5112_v59  ;;  %v2704_v19 = vmul.f32 %v4603_v14, %v2688_v62  ;;  %v5117_v62 = vld [vmem:[%s5400_s29 + $0x28] sm:$0xff]  }
 0x2e1   : > { %v4604_v29 = vpop.f32.mrb[38].mxu1  ;;  %4666 = vmatpush3.bf16.msra.mxu0 %v7170_v13  ;;  %v2702_v26 = vmul.f32 %v2686_v44, %v2659_v20  ;;  %v3587_v13 = vunpack.c.h.bf16 %v5116_v11  ;;  %v3588_v20 = vunpack.c.l.bf16 %v5117_v62 }
 0x2e2   : > { %v2705_v33 = vmul.f32 %v4604_v29, %v2689_v10  ;;  %v2662_v34 = vpop.f32.mrb[39].mxu1  ;;  %4667 = vmatprep.subr.bf16.mxu0 %v7171_v30  ;;  %v3589_v10 = vunpack.c.h.bf16 %v5117_v62 }
 0x2e3   : > { %v2703_v4 = vmul.f32 %v2687_v61, %v2662_v34 }
 0x2e4   : > { %v3030_v60 = vpack.c.bf16 %v2705_v33, %v2704_v19 }
 0x2e5   : > { %v3029_v55 = vpack.c.bf16 %v2703_v4, %v2702_v26  ;;  %4668 = vmatpush3.bf16.msra.mxu0 %v7171_v30 }
 0x2e6   : > { %4669 = vmatprep.subr.bf16.mxu0 %v7172_v21 }
 0x2e7   : > { %4657 = vmatprep.mubr.bf16.mxu1 %v3029_v55  ;;  %4622 = vmatmul.mubr.msk.bf16.gmra.mrb[40].mxu0 %vm1072_vm3, %v5113_v31 }
 0x2e8   : > { %4658 = vmatmul.mubr.bf16.gmra.mrb[52].mxu1 %v3030_v60  ;;  %4625 = vmatprep.mubr.msk.bf16.mxu0 %vm1072_vm3, %v5114_v46 }
 0x2e9   : > { %4670 = vmatpush3.bf16.msra.mxu0 %v7172_v21  ;;  %v5119_v21 = vld [vmem:[%s5400_s29 + $0x38] sm:$0xff]  }
 0x2ea   : > { %4671 = vmatprep.subr.bf16.mxu0 %v7173_v23  ;;  %v3592_v31 = vunpack.c.l.bf16 %v5119_v21  ;;  %v3593_v46 = vunpack.c.h.bf16 %v5119_v21 }
 0x2ed   : > { %4672 = vmatpush3.bf16.msra.mxu0 %v7173_v23 }
 0x2ee   : > { %4673 = vmatprep.subr.bf16.mxu0 %v7174_v56 }
 0x2ef   : > { %4626 = vmatmul.mubr.msk.bf16.gmra.mrb[44].mxu0 %vm1072_vm3, %v5115_v6 }
 0x2f1   : > { %4674 = vmatpush3.bf16.msra.mxu0 %v7174_v56 }
 0x2f2   : > { %4675 = vmatprep.subr.bf16.mxu0 %v7175_v38 }
 0x2f5   : > { %4676 = vmatpush3.bf16.msra.mxu0 %v7175_v38 }
 0x30d   : > { %v3597_v7 = vpop.permute.xlu1 %3596 }
 0x30e   : > { %v3602_v39 = vrot.slane %v3597_v7, %v7176_v9 }
 0x310   : > { %v3603_v57 = vsub.f32 %v7177_v5, %v3602_v39  ;;  %v6582_v5 = vpop.permute.xlu0 %2712 }
 0x311   : > { %v1515_v49 = vpop.permute.xlu1 %1514 }
 0x312   : > { %v3604_v43 = vmul.f32 1.442695, %v3603_v57  ;;  %v1540_v8 = vmul.f32 %v1515_v49, %v7178_v41 }
 0x314   : > { %4962 = vpow2.f32 %v3604_v43  ;;  %v6561_v25 = vadd.f32 %v6503_v18, %v1540_v8  ;;  %v5118_v18 = vld [vmem:[%s5400_s29 + $0x30] sm:$0xff]   ;;  %v6588_v43 = vpop.permute.xlu0 %2716 }
 0x315   : > { %v1525_v2 = vpop.permute.xlu1 %1524  ;;  %v3590_v61 = vunpack.c.l.bf16 %v5118_v18  ;;  %v3591_v59 = vunpack.c.h.bf16 %v5118_v18 }
 0x316   : > { %v1542_v3 = vmul.f32 %v7179_v15, %v1525_v2 }
 0x318   : > { %v6565_v54 = vadd.f32 %v6492_v47, %v1542_v3  ;;  %v6592_v8 = vpop.permute.xlu0 %2720  ;;  %v2757_v3 = vsub.f32 %v7150_v52, %v6582_v5 }
 0x319   : > { %v6567_v14 = vpop.permute.xlu1 %1810 }
 0x31c   : > { %v6604_v62 = vpop.permute.xlu0 %2724 }
 0x31d   : > { %v6571_v40 = vpop.permute.xlu1 %1814 }
 0x31e   : > { %v4963_v29 = vpop.eup %4962 }
 0x31f   : > { %v3610_v19 = vrot.slane %v4963_v29, %v7176_v9  ;;  %v5123_v9 = vld [vmem:[%s5416_s0 + $0x98] sm:$0xff] }
 0x321   : > { %v6575_v44 = vpop.permute.xlu1 %1818  ;;  %v3612_v47 = vmul.f32 %v3610_v19, %v3586_v22  ;;  %v3613_v33 = vmul.f32 %v3610_v19, %v3587_v13  ;;  %v3614_v34 = vmul.f32 %v3610_v19, %v3588_v20  ;;  %v3615_v4 = vmul.f32 %v3610_v19, %v3589_v10 }
 0x322   : > { %v3616_v30 = vmul.f32 %v3610_v19, %v3590_v61  ;;  %v3617_v26 = vmul.f32 %v3610_v19, %v3591_v59  ;;  %v3618_v6 = vmul.f32 %v3610_v19, %v3592_v31  ;;  %v3619_v38 = vmul.f32 %v3610_v19, %v3593_v46 }
 0x323   : > { %v3637_v60 = vpack.c.bf16 %v3613_v33, %v3612_v47  ;;  %v3638_v55 = vpack.c.bf16 %v3615_v4, %v3614_v34  ;;  %v2776_v20 = vmul.f32 1.442695, %v2757_v3  ;;  %v2759_v10 = vsub.f32 %v7150_v52, %v6588_v43  ;;  %v6614_v33 = vpop.permute.xlu0 %2728 }
 0x324   : > { %v3639_v56 = vpack.c.bf16 %v3617_v26, %v3616_v30  ;;  %v3640_v39 = vpack.c.bf16 %v3619_v38, %v3618_v6  ;;  %v2761_v19 = vsub.f32 %v7150_v52, %v6592_v8 }
 0x325   : > { %v6578_v23 = vpop.permute.xlu1 %1822  ;;  %4677 = vmatprep.mubr.bf16.mxu0 %v3637_v60  ;;  %v2780_v59 = vmul.f32 1.442695, %v2759_v10  ;;  %v2763_v60 = vsub.f32 %v7150_v52, %v6604_v62 }
 0x326   : > { %4678 = vmatmul.mubr.bf16.vlgmr.msra.gmra.mrb[48].mxu0 %v3638_v55  ;;  %v2784_v26 = vmul.f32 1.442695, %v2761_v19 }
 0x327   : > { %4681 = vmatprep.mubr.bf16.mxu0 %v3639_v56  ;;  %v6626_v56 = vpop.permute.xlu0 %2732  ;;  %v2788_v38 = vmul.f32 1.442695, %v2763_v60 }
 0x328   : > { %v2767_v10 = vsub.f32 %v7150_v52, %v6626_v56 }
 0x329   : > { %v6580_v7 = vpop.permute.xlu1 %1826 }
 0x32d   : > { %v6584_v57 = vpop.permute.xlu1 %1830 }
 0x32e   : > { %4682 = vmatmul.mubr.bf16.gmra.mrb[52].mxu0 %v3640_v39  ;;  %v2765_v39 = vsub.f32 %v7150_v52, %v6614_v33 }
 0x331   : > { %v6586_v49 = vpop.permute.xlu1 %1834 }
 0x335   : > { %v6590_v41 = vpop.permute.xlu1 %1838 }
 0x339   : > { %v6594_v2 = vpop.permute.xlu1 %2706 }
 0x33a   : > { %v2754_v15 = vsub.f32 %v7150_v52, %v6594_v2 }
 0x33c   : > { %v2770_v11 = vmul.f32 1.442695, %v2754_v15 }
 0x33d   : > { %v6600_v22 = vpop.permute.xlu1 %2710 }
 0x33e   : > { %4964 = vpow2.f32 %v2770_v11  ;;  %v2756_v13 = vsub.f32 %v7150_v52, %v6600_v22 }
 0x340   : > { %v2774_v29 = vmul.f32 1.442695, %v2756_v13 }
 0x341   : > { %v6608_v18 = vpop.permute.xlu1 %2714 }
 0x342   : > { %4966 = vpow2.f32 %v2774_v29  ;;  %v2758_v61 = vsub.f32 %v7150_v52, %v6608_v18 }
 0x343   : > { %4968 = vpow2.f32 %v2776_v20 }
 0x344   : > { %v2778_v47 = vmul.f32 1.442695, %v2758_v61  ;;  %v2792_v61 = vmul.f32 1.442695, %v2765_v39 }
 0x345   : > { %v6616_v34 = vpop.permute.xlu1 %2718 }
 0x346   : > { %4970 = vpow2.f32 %v2778_v47  ;;  %v2760_v4 = vsub.f32 %v7150_v52, %v6616_v34  ;;  %v6636_v47 = vpop.permute.xlu0 %2736 }
 0x347   : > { %4972 = vpow2.f32 %v2780_v59 }
 0x348   : > { %v4965_v30 = vpop.eup %4964  ;;  %v2782_v55 = vmul.f32 1.442695, %v2760_v4 }
 0x349   : > { %v2802_v21 = vmul.f32 0.125, %v4965_v30  ;;  %v6622_v31 = vpop.permute.xlu1 %2722 }
 0x34a   : > { %4974 = vpow2.f32 %v2782_v55  ;;  %v2762_v46 = vsub.f32 %v7150_v52, %v6622_v31  ;;  %v2796_v55 = vmul.f32 1.442695, %v2767_v10 }
 0x34b   : > { %2929 = vperm.xlu1 %4773, %v2802_v21   ;;  %4976 = vpow2.f32 %v2784_v26 }
 0x34c   : > { %v4967_v6 = vpop.eup %4966  ;;  %v2786_v15 = vmul.f32 1.442695, %v2762_v46  ;;  %v2769_v46 = vsub.f32 %v7150_v52, %v6636_v47 }
 0x34d   : > { %v2804_v3 = vmul.f32 0.125, %v4967_v6  ;;  %v6630_v11 = vpop.permute.xlu1 %2726  ;;  %v4969_v13 = vpop.eup %4968  ;;  %v5120_v6 = vld [vmem:[%s5416_s0 + $0x80] sm:$0xff] }
 0x34e   : > { %4978 = vpow2.f32 %v2786_v15  ;;  %v2764_v20 = vsub.f32 %v7150_v52, %v6630_v11  ;;  %v2805_v19 = vmul.f32 0.125, %v4969_v13 }
 0x34f   : > { %2939 = vperm.xlu1 %4773, %v2804_v3   ;;  %4980 = vpow2.f32 %v2788_v38  ;;  %v3208_v38 = vadd.f32 %v5120_v6, %v6594_v2  ;;  %v2800_v2 = vmul.f32 1.442695, %v2769_v46 }
 0x350   : > { %v4971_v29 = vpop.eup %4970  ;;  %v2790_v59 = vmul.f32 1.442695, %v2764_v20 }
 0x351   : > { %v2806_v4 = vmul.f32 0.125, %v4971_v29  ;;  %v6638_v30 = vpop.permute.xlu1 %2730  ;;  %v4973_v26 = vpop.eup %4972  ;;  %v5121_v29 = vld [vmem:[%s5416_s0 + $0x88] sm:$0xff] }
 0x352   : > { %4982 = vpow2.f32 %v2790_v59  ;;  %v2766_v60 = vsub.f32 %v7150_v52, %v6638_v30  ;;  %v2807_v15 = vmul.f32 0.125, %v4973_v26 }
 0x353   : > { %2944 = vperm.xlu1 %4773, %v2805_v19   ;;  %2949 = vperm.xlu0 %4772, %v2806_v4   ;;  %4984 = vpow2.f32 %v2792_v61  ;;  %v3209_v61 = vadd.f32 %v5121_v29, %v6467_v45  ;;  %v3224_v19 = vsub.f32 0.0, %v3208_v38  ;;  %v5122_v4 = vld [vmem:[%s5416_s0 + $0x90] sm:$0xff]  ;;  %v3211_v45 = vadd.f32 %v5123_v9, %v6582_v5 }
 0x354   : > { %v4975_v21 = vpop.eup %4974  ;;  %v2794_v39 = vmul.f32 1.442695, %v2766_v60  ;;  %v3210_v26 = vadd.f32 %v5122_v4, %v6600_v22 }
 0x355   : > { %v2808_v3 = vmul.f32 0.125, %v4975_v21  ;;  %v6646_v13 = vpop.permute.xlu1 %2734  ;;  %v4977_v20 = vpop.eup %4976  ;;  %v3240_v46 = vmul.f32 1.442695, %v3224_v19  ;;  %v5126_v19 = vld [vmem:[%s5416_s0 + $0xb0] sm:$0xff] }
 0x356   : > { %4986 = vpow2.f32 %v2794_v39  ;;  %v2768_v10 = vsub.f32 %v7150_v52, %v6646_v13  ;;  %v2809_v21 = vmul.f32 0.125, %v4977_v20  ;;  %v3225_v52 = vsub.f32 0.0, %v3209_v61  ;;  %v5125_v61 = vld [vmem:[%s5416_s0 + $0xa8] sm:$0xff] }
 0x357   : > { %4988 = vpow2.f32 %v2796_v55  ;;  %2954 = vperm.xlu1 %4773, %v2807_v15   ;;  %2959 = vperm.xlu0 %4772, %v2808_v3   ;;  %v3226_v38 = vsub.f32 0.0, %v3210_v26  ;;  %v5124_v15 = vld [vmem:[%s5416_s0 + $0xa0] sm:$0xff]  ;;  %v3213_v4 = vadd.f32 %v5125_v61, %v6588_v43  ;;  %v3214_v26 = vadd.f32 %v5126_v19, %v6616_v34 }
 0x358   : > { %v4979_v59 = vpop.eup %4978  ;;  %v2798_v60 = vmul.f32 1.442695, %v2768_v10  ;;  %v3212_v22 = vadd.f32 %v5124_v15, %v6608_v18  ;;  %v3242_v29 = vmul.f32 1.442695, %v3225_v52  ;;  %v5127_v52 = vld [vmem:[%s5416_s0 + $0xb8] sm:$0xff] }
 0x359   : > { %v2810_v6 = vmul.f32 0.125, %v4979_v59  ;;  %v4981_v39 = vpop.eup %4980  ;;  %v3227_v59 = vsub.f32 0.0, %v3211_v45  ;;  %v3244_v5 = vmul.f32 1.442695, %v3226_v38  ;;  %v3215_v43 = vadd.f32 %v5127_v52, %v6592_v8  ;;  %v5128_v38 = vld [vmem:[%s5416_s0 + $0xc0] sm:$0xff] }
 0x35a   : > { %4990 = vpow2.f32 %v2798_v60  ;;  %v2811_v3 = vmul.f32 0.125, %v4981_v39  ;;  %v3229_v39 = vsub.f32 0.0, %v3213_v4  ;;  %v3216_v34 = vadd.f32 %v5128_v38, %v6622_v31  ;;  %v5130_v4 = vld [vmem:[%s5416_s0 + $0xd0] sm:$0xff] }
 0x35b   : > { %2964 = vperm.xlu1 %4773, %v2809_v21   ;;  %2969 = vperm.xlu0 %4772, %v2810_v6   ;;  %4992 = vpow2.f32 %v2800_v2  ;;  %v3228_v2 = vsub.f32 0.0, %v3212_v22  ;;  %v3246_v6 = vmul.f32 1.442695, %v3227_v59 }
 0x35c   : > { %v4983_v55 = vpop.eup %4982  ;;  %4994 = vpow2.f32 %v3240_v46  ;;  %v3230_v46 = vsub.f32 0.0, %v3214_v26  ;;  %v3232_v61 = vsub.f32 0.0, %v3216_v34  ;;  %v5131_v26 = vld [vmem:[%s5416_s0 + $0xd8] sm:$0xff]  ;;  %v5134_v34 = vld [vmem:[%s5416_s0 + $0xf0] sm:$0xff] }
 0x35d   : > { %v2812_v20 = vmul.f32 0.125, %v4983_v55  ;;  %v4985_v10 = vpop.eup %4984  ;;  %4996 = vpow2.f32 %v3242_v29  ;;  %v3248_v55 = vmul.f32 1.442695, %v3228_v2  ;;  %v5129_v29 = vld [vmem:[%s5416_s0 + $0xc8] sm:$0xff] }
 0x35e   : > { %v2813_v60 = vmul.f32 0.125, %v4985_v10  ;;  %4998 = vpow2.f32 %v3244_v5  ;;  %v3231_v10 = vsub.f32 0.0, %v3215_v43  ;;  %v3217_v8 = vadd.f32 %v5129_v29, %v6604_v62 }
 0x35f   : > { %2974 = vperm.xlu1 %4773, %v2811_v3   ;;  %2979 = vperm.xlu0 %4772, %v2812_v20   ;;  %5000 = vpow2.f32 %v3246_v6  ;;  %v3250_v20 = vmul.f32 1.442695, %v3229_v39  ;;  %v3252_v59 = vmul.f32 1.442695, %v3230_v46  ;;  %v3256_v62 = vmul.f32 1.442695, %v3232_v61 }
 0x360   : > { %v4987_v9 = vpop.eup %4986  ;;  %5002 = vpow2.f32 %v3248_v55  ;;  %v3254_v2 = vmul.f32 1.442695, %v3231_v10  ;;  %v3233_v19 = vsub.f32 0.0, %v3217_v8  ;;  %v5133_v55 = vld [vmem:[%s5416_s0 + $0xe8] sm:$0xff] }
 0x361   : > { %v4989_v18 = vpop.eup %4988  ;;  %v2814_v21 = vmul.f32 0.125, %v4987_v9  ;;  %v3218_v9 = vadd.f32 %v5130_v4, %v6630_v11  ;;  %5004 = vpow2.f32 %v3250_v20  ;;  %v5248_v11 = vmov 64  }
 0x362   : > { %v2815_v15 = vmul.f32 0.125, %v4989_v18  ;;  %v3219_v18 = vadd.f32 %v5131_v26, %v6614_v33  ;;  %5006 = vpow2.f32 %v3252_v59  ;;  %v3258_v43 = vmul.f32 1.442695, %v3233_v19 }
 0x363   : > { %2984 = vperm.xlu1 %4773, %v2813_v60   ;;  %2989 = vperm.xlu0 %4772, %v2814_v21   ;;  %v3234_v60 = vsub.f32 0.0, %v3218_v9  ;;  %v5132_v21 = vld [vmem:[%s5416_s0 + $0xe0] sm:$0xff]  ;;  %5008 = vpow2.f32 %v3254_v2  ;;  %v3221_v33 = vadd.f32 %v5133_v55, %v6626_v56  ;;  %v5135_v56 = vld [vmem:[%s5416_s0 + $0xf8] sm:$0xff]  ;;  %v1714_v4 = vand.u32 2147483647, %v6368_v58  ;;  %s7187_s0 = sld [smem:[#allocation9_spill]] }
 0x364   : > { %v4991_v45 = vpop.eup %4990  ;;  %v3220_v6 = vadd.f32 %v5132_v21, %v6638_v30  ;;  %5010 = vpow2.f32 %v3256_v62  ;;  %v3222_v30 = vadd.f32 %v5134_v34, %v6646_v13  ;;  %v3223_v29 = vadd.f32 %v5135_v56, %v6636_v47  ;;  %v7180_v9 = vld [vmem:[#allocation50_spill] sm:$0xff]  ;;  %v7181_v62 = vld [vmem:[#allocation51_spill] sm:$0xff] }
 0x365   : > { %v2816_v22 = vmul.f32 0.125, %v4991_v45  ;;  %v4993_v3 = vpop.eup %4992  ;;  %v3235_v45 = vsub.f32 0.0, %v3219_v18  ;;  %v3260_v46 = vmul.f32 1.442695, %v3234_v60  ;;  %5012 = vpow2.f32 %v3258_v43 }
 0x366   : > { %v2817_v31 = vmul.f32 0.125, %v4993_v3  ;;  %v4995_v5 = vpop.eup %4994  ;;  %v3236_v38 = vsub.f32 0.0, %v3220_v6  ;;  %v1712_v3 = vand.u32 2147483647, %v6376_v17  ;;  %v3237_v10 = vsub.f32 0.0, %v3221_v33 }
 0x367   : > { %2994 = vperm.xlu1 %4773, %v2815_v15   ;;  %2999 = vperm.xlu0 %4772, %v2816_v22   ;;  %v4997_v39 = vpop.eup %4996  ;;  %v3262_v20 = vmul.f32 1.442695, %v3235_v45  ;;  %5014 = vpow2.f32 %v3260_v46  ;;  %v3238_v59 = vsub.f32 0.0, %v3222_v30  ;;  %v3239_v2 = vsub.f32 0.0, %v3223_v29 }
 0x368   : > { %v4999_v52 = vpop.eup %4998  ;;  %v3264_v8 = vmul.f32 1.442695, %v3236_v38  ;;  %v1715_v18 = vand.u32 2147483647, %v6381_v28  ;;  %v1858_v60 = vmax.f32 %v1714_v4, %v7181_v62  ;;  %v1719_v45 = vand.u32 2147483647, %v6428_v24 }
 0x369   : > { %v5001_v15 = vpop.eup %5000  ;;  %5016 = vpow2.f32 %v3262_v20  ;;  %v3268_v19 = vmul.f32 1.442695, %v3238_v59  ;;  %v3270_v6 = vmul.f32 1.442695, %v3239_v2  ;;  %v1718_v33 = vand.u32 2147483647, %v6411_v48 }
 0x36a   : > { %v5003_v22 = vpop.eup %5002  ;;  %5018 = vpow2.f32 %v3264_v8  ;;  %v1874_v55 = vadd.f32 1e-06, %v1858_v60  ;;  %v1723_v29 = vand.u32 2147483647, %v6469_v0  ;;  %v7182_v59 = vld [vmem:[#allocation52_spill] sm:$0xff]  ;;  %p4331_p1 = scmp.ne.s32.totalorder %s7187_s0, 1 }
 0x36b   : > { %3004 = vperm.xlu1 %4773, %v2817_v31   ;;  %3288 = vrot.lane.b32.xlu0 %v4995_v5, %s5247_s25  ;;  %v5005_v61 = vpop.eup %5004  ;;  %v1856_v31 = vmax.f32 %v1712_v3, %v7180_v9  ;;  %v3266_v5 = vmul.f32 1.442695, %v3237_v10  ;;  %v1716_v3 = vand.u32 2147483647, %v6418_v50  ;;  %s5249_s10 = smov (!%p4331_p1), 64   ;;  %vm3789_vm8 = vcmask (!%p4331_p1), 7168  }
 0x36c   : > { %4775 = vset.pattern.permute.xlu0 %v5248_v11  ;;  %v5007_v13 = vpop.eup %5006  ;;  %v1867_v4 = vmax.f32 %v1723_v29, %v6584_v57  ;;  %v1727_v57 = vand.u32 2147483647, %v6565_v54 }
 0x36d   : > { %v5009_v26 = vpop.eup %5008  ;;  %v1872_v21 = vadd.f32 1e-06, %v1856_v31  ;;  %5020 = vpow2.f32 %v3266_v5  ;;  %v1721_v31 = vand.u32 2147483647, %v6476_v42 }
 0x36e   : > { %v5011_v47 = vpop.eup %5010  ;;  %5022 = vpow2.f32 %v3268_v19  ;;  %v1720_v19 = vand.u32 2147483647, %v6463_v27 }
 0x36f   : > { %3290 = vrot.lane.b32.xlu1 %v4997_v39, %s5247_s25  ;;  %3292 = vrot.lane.b32.xlu0 %v4999_v52, %s5247_s25  ;;  %v5013_v39 = vpop.eup %5012  ;;  %v1713_v52 = vand.u32 2147483647, %v6384_v53  ;;  %5024 = vrcp.f32 %v1872_v21 }
 0x370   : > { %4774 = vset.pattern.permute.xlu1 %v5248_v11  ;;  %v1859_v11 = vmax.f32 %v1715_v18, %v6571_v40  ;;  %5026 = vpow2.f32 %v3270_v6  ;;  %v1863_v40 = vmax.f32 %v1719_v45, %v6578_v23  ;;  %v1864_v21 = vmax.f32 %v1720_v19, %v6378_v1 }
 0x371   : > { %v5015_v43 = vpop.eup %5014  ;;  %v1857_v46 = vmax.f32 %v1713_v52, %v6567_v14  ;;  %5028 = vrcp.f32 %v1874_v55  ;;  %v1726_v6 = vand.u32 2147483647, %v6490_v36  ;;  %v1724_v1 = vand.u32 2147483647, %v6501_v32 }
 0x372   : > { %v1875_v38 = vadd.f32 1e-06, %v1859_v11  ;;  %v1879_v10 = vadd.f32 1e-06, %v1863_v40  ;;  %v1871_v11 = vmax.f32 %v1727_v57, %v6590_v41 }
 0x373   : > { %3294 = vrot.lane.b32.xlu1 %v5001_v15, %s5247_s25  ;;  %3296 = vrot.lane.b32.xlu0 %v5003_v22, %s5247_s25  ;;  %v5017_v34 = vpop.eup %5016  ;;  %v1717_v15 = vand.u32 2147483647, %v6431_v37  ;;  %v1862_v22 = vmax.f32 %v1718_v33, %v6360_v12  ;;  %v1873_v20 = vadd.f32 1e-06, %v1857_v46  ;;  %v1722_v12 = vand.u32 2147483647, %v6459_v63 }
 0x374   : > { %v5019_v30 = vpop.eup %5018  ;;  %5030 = vrcp.f32 %v1875_v38  ;;  %v1870_v45 = vmax.f32 %v1726_v6, %v6453_v51  ;;  %v1887_v33 = vadd.f32 1e-06, %v1871_v11  ;;  %v1868_v40 = vmax.f32 %v1724_v1, %v6425_v16 }
 0x375   : > { %v1861_v14 = vmax.f32 %v1717_v15, %v6575_v44  ;;  %v1878_v8 = vadd.f32 1e-06, %v1862_v22  ;;  %5032 = vrcp.f32 %v1873_v20  ;;  %v1866_v2 = vmax.f32 %v1722_v12, %v6402_v35 }
 0x376   : > { %5034 = vrcp.f32 %v1879_v10  ;;  %v1886_v41 = vadd.f32 1e-06, %v1870_v45  ;;  %v1884_v15 = vadd.f32 1e-06, %v1868_v40 }
 0x377   : > { %3298 = vrot.lane.b32.xlu1 %v5005_v61, %s5247_s25  ;;  %3300 = vrot.lane.b32.xlu0 %v5007_v13, %s5247_s25  ;;  %v5021_v56 = vpop.eup %5020  ;;  %v1860_v61 = vmax.f32 %v1716_v3, %v7182_v59  ;;  %v1877_v13 = vadd.f32 1e-06, %v1861_v14  ;;  %5036 = vrcp.f32 %v1878_v8  ;;  %v1882_v60 = vadd.f32 1e-06, %v1866_v2  ;;  %v2935_v8 = vpop.permute.xlu0 %2934 }
 0x378   : > { %v5023_v23 = vpop.eup %5022 }
 0x379   : > { %v5025_v44 = vpop.eup %5024  ;;  %v1876_v5 = vadd.f32 1e-06, %v1860_v61  ;;  %5038 = vrcp.f32 %v1877_v13 }
 0x37a   : > { %v5027_v9 = vpop.eup %5026 }
 0x37b   : > { %3302 = vrot.lane.b32.xlu1 %v5009_v26, %s5247_s25  ;;  %3304 = vrot.lane.b32.xlu0 %v5011_v47, %s5247_s25  ;;  %v1865_v26 = vmax.f32 %v1721_v31, %v6580_v7  ;;  %v1883_v47 = vadd.f32 1e-06, %v1867_v4  ;;  %v5029_v18 = vpop.eup %5028  ;;  %5040 = vrcp.f32 %v1876_v5  ;;  %v1725_v7 = vand.u32 2147483647, %v6561_v25 }
 0x37d   : > { %v1881_v35 = vadd.f32 1e-06, %v1865_v26  ;;  %5042 = vrcp.f32 %v1883_v47  ;;  %v1869_v55 = vmax.f32 %v1725_v7, %v6586_v49 }
 0x37e   : > { %v5031_v62 = vpop.eup %5030  ;;  %5044 = vrcp.f32 %v1882_v60 }
 0x37f   : > { %3306 = vrot.lane.b32.xlu1 %v5013_v39, %s5247_s25  ;;  %3308 = vrot.lane.b32.xlu0 %v5015_v43, %s5247_s25  ;;  %v5033_v39 = vpop.eup %5032  ;;  %v1880_v43 = vadd.f32 1e-06, %v1864_v21  ;;  %5046 = vrcp.f32 %v1881_v35 }
 0x380   : > { %v5035_v52 = vpop.eup %5034 }
 0x381   : > { %v5037_v46 = vpop.eup %5036  ;;  %5048 = vrcp.f32 %v1880_v43 }
 0x382   : > { %5050 = vrcp.f32 %v1887_v33 }
 0x383   : > { %3310 = vrot.lane.b32.xlu1 %v5017_v34, %s5247_s25  ;;  %3312 = vrot.lane.b32.xlu0 %v5019_v30, %s5247_s25  ;;  %v5039_v38 = vpop.eup %5038  ;;  %v1885_v34 = vadd.f32 1e-06, %v1869_v55  ;;  %5052 = vrcp.f32 %v1886_v41 }
 0x385   : > { %v5041_v30 = vpop.eup %5040  ;;  %5054 = vrcp.f32 %v1885_v34 }
 0x386   : > { %5056 = vrcp.f32 %v1884_v15 }
 0x387   : > { %3314 = vrot.lane.b32.xlu1 %v5021_v56, %s5247_s25  ;;  %3316 = vrot.lane.b32.xlu0 %v5023_v23, %s5247_s25  ;;  %v5043_v51 = vpop.eup %5042 }
 0x388   : > { %v5045_v22 = vpop.eup %5044 }
 0x389   : > { %v5047_v49 = vpop.eup %5046 }
 0x38b   : > { %3318 = vrot.lane.b32.xlu1 %v5027_v9, %s5247_s25  ;;  %1906 = vperm.xlu0 %4775, %v5025_v44   ;;  %v5049_v10 = vpop.eup %5048 }
 0x38c   : > { %v5051_v16 = vpop.eup %5050 }
 0x38d   : > { %v5053_v23 = vpop.eup %5052 }
 0x38f   : > { %1916 = vperm.xlu1 %4774, %v5029_v18   ;;  %1921 = vperm.xlu0 %4775, %v5031_v62   ;;  %v5055_v29 = vpop.eup %5054 }
 0x390   : > { %v5057_v31 = vpop.eup %5056 }
 0x393   : > { %1911 = vperm.xlu1 %4774, %v5033_v39   ;;  %1941 = vperm.xlu0 %4775, %v5035_v52  }
 0x397   : > { %1936 = vperm.xlu1 %4774, %v5037_v46   ;;  %1931 = vperm.xlu0 %4775, %v5039_v38  }
 0x39b   : > { %1926 = vperm.xlu1 %4774, %v5041_v30   ;;  %1961 = vperm.xlu0 %4775, %v5043_v51  }
 0x39f   : > { %1956 = vperm.xlu1 %4774, %v5045_v22   ;;  %1951 = vperm.xlu0 %4775, %v5047_v49  }
 0x3a3   : > { %v4647_v3 = vpop.f32.mrb[40].mxu1  ;;  %1946 = vperm.xlu1 %4774, %v5049_v10   ;;  %1981 = vperm.xlu0 %4775, %v5051_v16  }
 0x3a4   : > { %v3113_v20 = vpop.f32.mrb[41].mxu1 }
 0x3a5   : > { %v4648_v14 = vpop.f32.mrb[42].mxu1 }
 0x3a6   : > { %v3116_v56 = vpop.f32.mrb[43].mxu1 }
 0x3a7   : > { %1976 = vperm.xlu1 %4774, %v5053_v23   ;;  %1971 = vperm.xlu0 %4775, %v5055_v29  }
 0x3aa   : > { %v4615_v59 = vpop.f32.mrb[32].mxu0 }
 0x3ab   : > { %v4651_v61 = vpop.f32.mrb[44].mxu1  ;;  %v2864_v12 = vpop.f32.mrb[33].mxu0  ;;  %1966 = vperm.xlu1 %4774, %v5057_v31  }
 0x3ac   : > { %v4616_v13 = vpop.f32.mrb[34].mxu0  ;;  %v3129_v4 = vpop.f32.mrb[45].mxu1 }
 0x3ad   : > { %v2867_v44 = vpop.f32.mrb[35].mxu0  ;;  %v4652_v9 = vpop.f32.mrb[46].mxu1 }
 0x3ae   : > { %v3008_v5 = vmul.f32 %v2935_v8, %v2867_v44  ;;  %v3132_v2 = vpop.f32.mrb[47].mxu1 }
 0x3b0   : > { %v6728_v19 = vadd.f32 %v3116_v56, %v3008_v5 }
 0x3b2   : > { %v4619_v26 = vpop.f32.mrb[36].mxu0 }
 0x3b3   : > { %v4655_v47 = vpop.f32.mrb[48].mxu1  ;;  %v2880_v18 = vpop.f32.mrb[37].mxu0 }
 0x3b4   : > { %v3145_v62 = vpop.f32.mrb[49].mxu1  ;;  %v4620_v57 = vpop.f32.mrb[38].mxu0 }
 0x3b5   : > { %v4656_v60 = vpop.f32.mrb[50].mxu1  ;;  %v2883_v21 = vpop.f32.mrb[39].mxu0 }
 0x3b6   : > { %v3148_v6 = vpop.f32.mrb[51].mxu1 }
 0x3ba   : > { %v4623_v35 = vpop.f32.mrb[40].mxu0 }
 0x3bb   : > { %v4659_v11 = vpop.f32.mrb[52].mxu1  ;;  %v2896_v39 = vpop.f32.mrb[41].mxu0 }
 0x3bc   : > { %v3161_v52 = vpop.f32.mrb[53].mxu1  ;;  %v4624_v7 = vpop.f32.mrb[42].mxu0 }
 0x3bd   : > { %v4660_v43 = vpop.f32.mrb[54].mxu1  ;;  %v2899_v45 = vpop.f32.mrb[43].mxu0 }
 0x3be   : > { %v3164_v1 = vpop.f32.mrb[55].mxu1 }
 0x3c2   : > { %v4627_v55 = vpop.f32.mrb[44].mxu0 }
 0x3c3   : > { %v2912_v33 = vpop.f32.mrb[45].mxu0 }
 0x3c4   : > { %v4628_v46 = vpop.f32.mrb[46].mxu0 }
 0x3c5   : > { %v2915_v38 = vpop.f32.mrb[47].mxu0 }
 0x3ca   : > { %v2930_v41 = vpop.permute.xlu1 %2929 }
 0x3cb   : > { %v3007_v40 = vmul.f32 %v2930_v41, %v2864_v12 }
 0x3cd   : > { %v6730_v34 = vadd.f32 %v3113_v20, %v3007_v40 }
 0x3ce   : > { %v2940_v30 = vpop.permute.xlu1 %2939 }
 0x3cf   : > { %v3009_v51 = vmul.f32 %v4615_v59, %v2940_v30 }
 0x3d1   : > { %v6732_v15 = vadd.f32 %v4647_v3, %v3009_v51 }
 0x3d2   : > { %v2950_v22 = vpop.permute.xlu0 %2949  ;;  %v2945_v49 = vpop.permute.xlu1 %2944 }
 0x3d3   : > { %v3010_v10 = vmul.f32 %v4616_v13, %v2945_v49  ;;  %v3011_v56 = vmul.f32 %v2950_v22, %v2880_v18 }
 0x3d5   : > { %v6734_v16 = vadd.f32 %v4648_v14, %v3010_v10  ;;  %v6736_v23 = vadd.f32 %v3129_v4, %v3011_v56 }
 0x3d6   : > { %v2960_v29 = vpop.permute.xlu0 %2959  ;;  %v2955_v8 = vpop.permute.xlu1 %2954 }
 0x3d7   : > { %v3013_v44 = vmul.f32 %v4619_v26, %v2960_v29  ;;  %v3012_v31 = vmul.f32 %v2955_v8, %v2883_v21 }
 0x3d9   : > { %v6738_v5 = vadd.f32 %v4651_v61, %v3013_v44  ;;  %v6740_v20 = vadd.f32 %v3132_v2, %v3012_v31  ;;  %v3195_v31 = vand.u32 2147483647, %v6734_v16 }
 0x3da   : > { %v2970_v12 = vpop.permute.xlu0 %2969  ;;  %v2965_v59 = vpop.permute.xlu1 %2964 }
 0x3db   : > { %v3014_v3 = vmul.f32 %v4620_v57, %v2965_v59  ;;  %v3015_v41 = vmul.f32 %v2970_v12, %v2896_v39 }
 0x3dd   : > { %v6742_v40 = vadd.f32 %v4652_v9, %v3014_v3  ;;  %v6744_v13 = vadd.f32 %v3145_v62, %v3015_v41 }
 0x3de   : > { %v2980_v14 = vpop.permute.xlu0 %2979  ;;  %v2975_v18 = vpop.permute.xlu1 %2974 }
 0x3df   : > { %v3017_v4 = vmul.f32 %v4623_v35, %v2980_v14  ;;  %v3016_v30 = vmul.f32 %v2975_v18, %v2899_v45  ;;  %v3198_v14 = vand.u32 2147483647, %v6738_v5 }
 0x3e1   : > { %v6746_v51 = vadd.f32 %v4655_v47, %v3017_v4  ;;  %v6748_v26 = vadd.f32 %v3148_v6, %v3016_v30  ;;  %v3192_v47 = vand.u32 2147483647, %v6730_v34 }
 0x3e2   : > { %v2990_v61 = vpop.permute.xlu0 %2989  ;;  %v2985_v21 = vpop.permute.xlu1 %2984 }
 0x3e3   : > { %v3018_v2 = vmul.f32 %v4624_v7, %v2985_v21  ;;  %v3019_v22 = vmul.f32 %v2990_v61, %v2912_v33 }
 0x3e5   : > { %v6750_v49 = vadd.f32 %v4656_v60, %v3018_v2  ;;  %v6752_v57 = vadd.f32 %v3161_v52, %v3019_v22  ;;  %v3194_v60 = vand.u32 2147483647, %v6732_v15  ;;  %v3193_v52 = vand.u32 2147483647, %v6728_v19 }
 0x3e6   : > { %v3000_v9 = vpop.permute.xlu0 %2999  ;;  %v2995_v39 = vpop.permute.xlu1 %2994 }
 0x3e7   : > { %v3021_v62 = vmul.f32 %v4627_v55, %v3000_v9  ;;  %v3020_v10 = vmul.f32 %v2995_v39, %v2915_v38  ;;  %v3199_v9 = vand.u32 2147483647, %v6742_v40  ;;  %v3197_v39 = vand.u32 2147483647, %v6740_v20 }
 0x3e9   : > { %v6754_v56 = vadd.f32 %v4659_v11, %v3021_v62  ;;  %v6756_v35 = vadd.f32 %v3164_v1, %v3020_v10 }
 0x3ea   : > { %v3289_v6 = vpop.permute.xlu0 %3288  ;;  %v3005_v45 = vpop.permute.xlu1 %3004 }
 0x3eb   : > { %v3336_v29 = vmax.f32 %v3192_v47, %v3289_v6  ;;  %v3022_v8 = vmul.f32 %v4628_v46, %v3005_v45 }
 0x3ed   : > { %v3352_v7 = vadd.f32 1e-06, %v3336_v29  ;;  %v6759_v33 = vadd.f32 %v4660_v43, %v3022_v8  ;;  %v3196_v43 = vand.u32 2147483647, %v6736_v23  ;;  %v3200_v8 = vand.u32 2147483647, %v6744_v13 }
 0x3ee   : > { %v3293_v44 = vpop.permute.xlu0 %3292  ;;  %v3291_v55 = vpop.permute.xlu1 %3290 }
 0x3ef   : > { %5058 = vrcp.f32 %v3352_v7  ;;  %v3338_v11 = vmax.f32 %v3194_v60, %v3293_v44  ;;  %v3337_v38 = vmax.f32 %v3193_v52, %v3291_v55  ;;  %v3202_v55 = vand.u32 2147483647, %v6746_v51 }
 0x3f1   : > { %v3354_v1 = vadd.f32 1e-06, %v3338_v11  ;;  %v3353_v3 = vadd.f32 1e-06, %v3337_v38 }
 0x3f2   : > { %v3297_v12 = vpop.permute.xlu0 %3296  ;;  %v3295_v59 = vpop.permute.xlu1 %3294 }
 0x3f3   : > { %5060 = vrcp.f32 %v3354_v1  ;;  %v3339_v46 = vmax.f32 %v3195_v31, %v3295_v59  ;;  %v3340_v30 = vmax.f32 %v3196_v43, %v3297_v12  ;;  %v3203_v43 = vand.u32 2147483647, %v6750_v49 }
 0x3f4   : > { %5062 = vrcp.f32 %v3353_v3 }
 0x3f5   : > { %v3355_v41 = vadd.f32 1e-06, %v3339_v46  ;;  %v3356_v47 = vadd.f32 1e-06, %v3340_v30 }
 0x3f6   : > { %v3301_v18 = vpop.permute.xlu0 %3300  ;;  %v3299_v4 = vpop.permute.xlu1 %3298 }
 0x3f7   : > { %v3342_v61 = vmax.f32 %v3198_v14, %v3301_v18  ;;  %5064 = vrcp.f32 %v3355_v41  ;;  %v3341_v29 = vmax.f32 %v3197_v39, %v3299_v4  ;;  %v3201_v14 = vand.u32 2147483647, %v6748_v26 }
 0x3f9   : > { %v5059_v21 = vpop.eup %5058  ;;  %v3358_v2 = vadd.f32 1e-06, %v3342_v61  ;;  %v6766_v22 = vpop.f32.mrb[48].mxu0  ;;  %v3357_v12 = vadd.f32 1e-06, %v3341_v29  ;;  %v7183_v29 = vld [vmem:[#allocation48_spill] sm:$0xff] }
 0x3fa   : > { %v3305_v62 = vpop.permute.xlu0 %3304  ;;  %v3303_v10 = vpop.permute.xlu1 %3302  ;;  %3386 = vperm.xlu0 %4775, %v5059_v21  }
 0x3fb   : > { %5066 = vrcp.f32 %v3358_v2  ;;  %v3343_v6 = vmax.f32 %v3199_v9, %v3303_v10  ;;  %v6770_v45 = vpop.f32.mrb[49].mxu0  ;;  %v3344_v1 = vmax.f32 %v3200_v8, %v3305_v62  ;;  %v3204_v9 = vand.u32 2147483647, %v6752_v57  ;;  %v7184_v8 = vld [vmem:[#allocation47_spill] sm:$0xff] }
 0x3fc   : > { %v6773_v7 = vpop.f32.mrb[50].mxu0  ;;  %5068 = vrcp.f32 %v3356_v47 }
 0x3fd   : > { %v5061_v60 = vpop.eup %5060  ;;  %v3359_v52 = vadd.f32 1e-06, %v3343_v6  ;;  %v6775_v44 = vpop.f32.mrb[51].mxu0  ;;  %v3360_v30 = vadd.f32 1e-06, %v3344_v1 }
 0x3fe   : > { %v3309_v11 = vpop.permute.xlu0 %3308  ;;  %v3307_v38 = vpop.permute.xlu1 %3306  ;;  %3396 = vperm.xlu1 %4774, %v5061_v60   ;;  %v3206_v6 = vand.u32 2147483647, %v6754_v56  ;;  %v3583_v60 = vsub.f32 %v7184_v8, %v7183_v29 }
 0x3ff   : > { %v3346_v31 = vmax.f32 %v3202_v55, %v3309_v11  ;;  %5070 = vrcp.f32 %v3359_v52  ;;  %v5063_v59 = vpop.eup %5062  ;;  %v3345_v2 = vmax.f32 %v3201_v14, %v3307_v38  ;;  %v3205_v11 = vand.u32 2147483647, %v6756_v35 }
 0x401   : > { %v3362_v3 = vadd.f32 1e-06, %v3346_v31  ;;  %v6778_v46 = vpop.f32.mrb[52].mxu0  ;;  %v5065_v41 = vpop.eup %5064  ;;  %v3361_v31 = vadd.f32 1e-06, %v3345_v2 }
 0x402   : > { %v3313_v18 = vpop.permute.xlu0 %3312  ;;  %v3311_v4 = vpop.permute.xlu1 %3310  ;;  %3391 = vperm.xlu1 %4774, %v5063_v59   ;;  %3401 = vperm.xlu0 %4775, %v5065_v41   ;;  %v3584_v41 = vmul.f32 1.442695, %v3583_v60 }
 0x403   : > { %5072 = vrcp.f32 %v3362_v3  ;;  %v3347_v61 = vmax.f32 %v3203_v43, %v3311_v4  ;;  %v6782_v21 = vpop.f32.mrb[53].mxu0  ;;  %v3348_v38 = vmax.f32 %v3204_v9, %v3313_v18  ;;  %v3207_v4 = vand.u32 2147483647, %v6759_v33 }
 0x404   : > { %5074 = vrcp.f32 %v3357_v12  ;;  %v6785_v39 = vpop.f32.mrb[54].mxu0 }
 0x405   : > { %v5067_v62 = vpop.eup %5066  ;;  %v3363_v10 = vadd.f32 1e-06, %v3347_v61  ;;  %v6787_v47 = vpop.f32.mrb[55].mxu0  ;;  %5076 = vrcp.f32 %v3360_v30  ;;  %v3364_v29 = vadd.f32 1e-06, %v3348_v38 }
 0x406   : > { %v3317_v52 = vpop.permute.xlu0 %3316  ;;  %v3315_v55 = vpop.permute.xlu1 %3314  ;;  %3416 = vperm.xlu1 %4774, %v5067_v62  }
 0x407   : > { %v3350_v1 = vmax.f32 %v3206_v6, %v3317_v52  ;;  %5078 = vrcp.f32 %v3363_v10  ;;  %v3349_v12 = vmax.f32 %v3205_v11, %v3315_v55  ;;  %v5069_v59 = vpop.eup %5068 }
 0x409   : > { %v3366_v3 = vadd.f32 1e-06, %v3350_v1  ;;  %v5071_v43 = vpop.eup %5070  ;;  %v3365_v18 = vadd.f32 1e-06, %v3349_v12 }
 0x40a   : > { %v3319_v14 = vpop.permute.xlu1 %3318  ;;  %v1907_v61 = vpop.permute.xlu0 %1906  ;;  %3406 = vperm.xlu1 %4774, %v5069_v59   ;;  %3421 = vperm.xlu0 %4775, %v5071_v43  }
 0x40b   : > { %5080 = vrcp.f32 %v3366_v3  ;;  %v1984_v62 = vmul.f32 %v1907_v61, %v6376_v17  ;;  %v3351_v30 = vmax.f32 %v3207_v4, %v3319_v14 }
 0x40c   : > { %5082 = vrcp.f32 %v3361_v31 }
 0x40d   : > { %v5073_v2 = vpop.eup %5072  ;;  %v4340_v9 = vpack.c.bf16 %v1984_v62, %v1984_v62  ;;  %5084 = vpow2.f32 %v3584_v41  ;;  %v3367_v52 = vadd.f32 1e-06, %v3351_v30 }
 0x40e   : > { %v5075_v10 = vpop.eup %5074  ;;  %v1917_v6 = vpop.permute.xlu1 %1916  ;;  %3436 = vperm.xlu1 %4774, %v5073_v2   ;;  %5086 = vrcp.f32 %v3364_v29 }
 0x40f   : > { %v1922_v8 = vpop.permute.xlu0 %1921  ;;  %2065 = vst.msk [vmem:[%s5435_s30] sm:$0xf] %vm2064_vm7, %v4340_v9  ;;  %v1986_v60 = vmul.f32 %v1917_v6, %v6368_v58  ;;  %3411 = vperm.xlu0 %4775, %v5075_v10   ;;  %5088 = vrcp.f32 %v3365_v18  ;;  %v5077_v55 = vpop.eup %5076 }
 0x410   : > { %v1987_v17 = vmul.f32 %v1922_v8, %v6381_v28  ;;  %5090 = vrcp.f32 %v3367_v52  ;;  %v7185_v8 = vld [vmem:[#allocation19_spill] sm:$0xff] }
 0x411   : > { %v4342_v11 = vpack.c.bf16 %v1986_v60, %v1986_v60  ;;  %v5079_v1 = vpop.eup %5078 }
 0x412   : > { %v4343_v38 = vpack.c.bf16 %v1987_v17, %v1987_v17  ;;  %v1912_v31 = vpop.permute.xlu1 %1911  ;;  %3426 = vperm.xlu1 %4774, %v5077_v55  }
 0x413   : > { %v1942_v12 = vpop.permute.xlu0 %1941  ;;  %2067 = vst.msk [vmem:[%s5435_s30 + $0x8] sm:$0xf] %vm2064_vm7, %v4342_v11  ;;  %v1985_v58 = vmul.f32 %v1912_v31, %v6384_v53  ;;  %3441 = vperm.xlu0 %4775, %v5079_v1   ;;  %v7186_v11 = vmov 0  }
 0x414   : > { %2068 = vst.msk [vmem:[%s5435_s30 + $0xc] sm:$0xf] %vm2064_vm7, %v4343_v38  ;;  %v1991_v28 = vmul.f32 %v1942_v12, %v6428_v24 }
 0x415   : > { %v5081_v59 = vpop.eup %5080  ;;  %v4341_v3 = vpack.c.bf16 %v1985_v58, %v1985_v58 }
 0x416   : > { %v4347_v43 = vpack.c.bf16 %v1991_v28, %v1991_v28  ;;  %v5083_v41 = vpop.eup %5082  ;;  %v1937_v14 = vpop.permute.xlu1 %1936  ;;  %3456 = vperm.xlu1 %4774, %v5081_v59  }
 0x417   : > { %v1932_v4 = vpop.permute.xlu0 %1931  ;;  %2066 = vst.msk [vmem:[%s5435_s30 + $0x4] sm:$0xf] %vm2064_vm7, %v4341_v3  ;;  %v1990_v61 = vmul.f32 %v1937_v14, %v6411_v48  ;;  %3431 = vperm.xlu0 %4775, %v5083_v41   ;;  %v5085_v24 = vpop.eup %5084 }
 0x418   : > { %2072 = vst.msk [vmem:[%s5435_s30 + $0x1c] sm:$0xf] %vm2064_vm7, %v4347_v43  ;;  %v1989_v53 = vmul.f32 %v1932_v4, %v6431_v37  ;;  %v5087_v29 = vpop.eup %5086  ;;  %v3624_v60 = vrot.slane %v5085_v24, %v7185_v8 }
 0x419   : > { %v4346_v62 = vpack.c.bf16 %v1990_v61, %v1990_v61  ;;  %v5089_v30 = vpop.eup %5088 }
 0x41a   : > { %v4345_v18 = vpack.c.bf16 %v1989_v53, %v1989_v53  ;;  %v1927_v2 = vpop.permute.xlu1 %1926  ;;  %3446 = vperm.xlu1 %4774, %v5087_v29   ;;  %v5091_v17 = vpop.eup %5090 }
 0x41b   : > { %v1962_v9 = vpop.permute.xlu0 %1961  ;;  %2071 = vst.msk [vmem:[%s5435_s30 + $0x18] sm:$0xf] %vm2064_vm7, %v4346_v62  ;;  %v1988_v10 = vmul.f32 %v1927_v2, %v6418_v50  ;;  %3451 = vperm.xlu0 %4775, %v5089_v30  }
 0x41c   : > { %2070 = vst.msk [vmem:[%s5435_s30 + $0x14] sm:$0xf] %vm2064_vm7, %v4345_v18  ;;  %v1995_v48 = vmul.f32 %v1962_v9, %v6469_v0 }
 0x41d   : > { %v4344_v37 = vpack.c.bf16 %v1988_v10, %v1988_v10 }
 0x41e   : > { %v4351_v6 = vpack.c.bf16 %v1995_v48, %v1995_v48  ;;  %v1957_v52 = vpop.permute.xlu1 %1956  ;;  %4776 = vset.pattern.permute.xlu1 %v7186_v11 }
 0x41f   : > { %v1952_v55 = vpop.permute.xlu0 %1951  ;;  %2069 = vst.msk [vmem:[%s5435_s30 + $0x10] sm:$0xf] %vm2064_vm7, %v4344_v37  ;;  %v1994_v50 = vmul.f32 %v1957_v52, %v6459_v63  ;;  %3461 = vperm.xlu0 %4775, %v5091_v17   ;;  %3626 = vperm.xlu1 %4776, %v3624_v60  }
 0x420   : > { %2076 = vst.msk [vmem:[%s5435_s30 + $0x2c] sm:$0xf] %vm2064_vm7, %v4351_v6  ;;  %v1993_v0 = vmul.f32 %v1952_v55, %v6476_v42 }
 0x421   : > { %v4350_v38 = vpack.c.bf16 %v1994_v50, %v1994_v50 }
 0x422   : > { %v4349_v1 = vpack.c.bf16 %v1993_v0, %v1993_v0  ;;  %v1947_v31 = vpop.permute.xlu1 %1946 }
 0x423   : > { %v1982_v12 = vpop.permute.xlu0 %1981  ;;  %2075 = vst.msk [vmem:[%s5435_s30 + $0x28] sm:$0xf] %vm2064_vm7, %v4350_v38  ;;  %v1992_v58 = vmul.f32 %v1947_v31, %v6463_v27  ;;  %4777 = vset.pattern.permute.xlu0 %v7186_v11 }
 0x424   : > { %2074 = vst.msk [vmem:[%s5435_s30 + $0x24] sm:$0xf] %vm2064_vm7, %v4349_v1  ;;  %v1999_v63 = vmul.f32 %v1982_v12, %v6565_v54 }
 0x425   : > { %v4348_v42 = vpack.c.bf16 %v1992_v58, %v1992_v58 }
 0x426   : > { %v4355_v28 = vpack.c.bf16 %v1999_v63, %v1999_v63  ;;  %v1977_v59 = vpop.permute.xlu1 %1976 }
 0x427   : > { %v1972_v3 = vpop.permute.xlu0 %1971  ;;  %2073 = vst.msk [vmem:[%s5435_s30 + $0x20] sm:$0xf] %vm2064_vm7, %v4348_v42  ;;  %v1998_v43 = vmul.f32 %v1977_v59, %v6490_v36 }
 0x428   : > { %2080 = vst.msk [vmem:[%s5435_s30 + $0x3c] sm:$0xf] %vm2064_vm7, %v4355_v28  ;;  %v1997_v41 = vmul.f32 %v1972_v3, %v6561_v25 }
 0x429   : > { %v4354_v14 = vpack.c.bf16 %v1998_v43, %v1998_v43 }
 0x42a   : > { %v4353_v27 = vpack.c.bf16 %v1997_v41, %v1997_v41  ;;  %v1967_v54 = vpop.permute.xlu1 %1966 }
 0x42b   : > { %2079 = vst.msk [vmem:[%s5435_s30 + $0x38] sm:$0xf] %vm2064_vm7, %v4354_v14  ;;  %v1996_v4 = vmul.f32 %v1967_v54, %v6501_v32  ;;  %v5136_v14 = vld [vmem:[#allocation2] sm:$0xff]  ;;  %v5137_v54 = vld [vmem:[#allocation2 + $0x8] sm:$0xff] }
 0x42c   : > { %2078 = vst.msk [vmem:[%s5435_s30 + $0x34] sm:$0xf] %vm2064_vm7, %v4353_v27 }
 0x42d   : > { %v4352_v61 = vpack.c.bf16 %v1996_v4, %v1996_v4 }
 0x42f   : > { %2077 = vst.msk [vmem:[%s5435_s30 + $0x30] sm:$0xf] %vm2064_vm7, %v4352_v61 }
 0x479   : > { %v3387_v53 = vpop.permute.xlu0 %3386 }
 0x47a   : > { %v3464_v24 = vmul.f32 %v3387_v53, %v6730_v34  ;;  %v5139_v53 = vld [vmem:[#allocation2 + $0x18] sm:$0xff] }
 0x47c   : > { %v4356_v36 = vpack.c.bf16 %v3464_v24, %v3464_v24 }
 0x47d   : > { %v3397_v25 = vpop.permute.xlu1 %3396 }
 0x47e   : > { %4315 = vst.msk [vmem:[%s5435_s30 + $0x40] sm:$0xf] %vm2064_vm7, %v4356_v36  ;;  %v3466_v29 = vmul.f32 %v3397_v25, %v6732_v15  ;;  %v5141_v25 = vld [vmem:[#allocation2 + $0x28] sm:$0xff] }
 0x480   : > { %v4358_v62 = vpack.c.bf16 %v3466_v29, %v3466_v29 }
 0x481   : > { %v3392_v18 = vpop.permute.xlu1 %3391  ;;  %v3402_v30 = vpop.permute.xlu0 %3401 }
 0x482   : > { %4317 = vst.msk [vmem:[%s5435_s30 + $0x48] sm:$0xf] %vm2064_vm7, %v4358_v62  ;;  %v3465_v32 = vmul.f32 %v3392_v18, %v6728_v19  ;;  %v3467_v2 = vmul.f32 %v3402_v30, %v6734_v16  ;;  %v5142_v62 = vld [vmem:[#allocation2 + $0x30] sm:$0xff]  ;;  %v5143_v30 = vld [vmem:[#allocation2 + $0x38] sm:$0xff] }
 0x484   : > { %v4357_v9 = vpack.c.bf16 %v3465_v32, %v3465_v32  ;;  %v4359_v34 = vpack.c.bf16 %v3467_v2, %v3467_v2 }
 0x485   : > { %v3417_v10 = vpop.permute.xlu1 %3416 }
 0x486   : > { %4316 = vst.msk [vmem:[%s5435_s30 + $0x44] sm:$0xf] %vm2064_vm7, %v4357_v9  ;;  %v3470_v48 = vmul.f32 %v3417_v10, %v6738_v5  ;;  %4318 = vst.msk [vmem:[%s5435_s30 + $0x4c] sm:$0xf] %vm2064_vm7, %v4359_v34 }
 0x488   : > { %v4362_v15 = vpack.c.bf16 %v3470_v48, %v3470_v48 }
 0x489   : > { %v3407_v37 = vpop.permute.xlu1 %3406  ;;  %v3422_v6 = vpop.permute.xlu0 %3421 }
 0x48a   : > { %4321 = vst.msk [vmem:[%s5435_s30 + $0x58] sm:$0xf] %vm2064_vm7, %v4362_v15  ;;  %v3468_v19 = vmul.f32 %v3407_v37, %v6736_v23  ;;  %v3471_v16 = vmul.f32 %v3422_v6, %v6742_v40 }
 0x48c   : > { %v4360_v8 = vpack.c.bf16 %v3468_v19, %v3468_v19  ;;  %v4363_v60 = vpack.c.bf16 %v3471_v16, %v3471_v16 }
 0x48d   : > { %v3437_v17 = vpop.permute.xlu1 %3436 }
 0x48e   : > { %4319 = vst.msk [vmem:[%s5435_s30 + $0x50] sm:$0xf] %vm2064_vm7, %v4360_v8  ;;  %v3474_v5 = vmul.f32 %v3437_v17, %v6746_v51  ;;  %v3412_v52 = vpop.permute.xlu0 %3411  ;;  %4322 = vst.msk [vmem:[%s5435_s30 + $0x5c] sm:$0xf] %vm2064_vm7, %v4363_v60 }
 0x48f   : > { %v3469_v55 = vmul.f32 %v3412_v52, %v6740_v20 }
 0x490   : > { %v4366_v11 = vpack.c.bf16 %v3474_v5, %v3474_v5 }
 0x491   : > { %v4361_v23 = vpack.c.bf16 %v3469_v55, %v3469_v55  ;;  %v3427_v50 = vpop.permute.xlu1 %3426 }
 0x492   : > { %4325 = vst.msk [vmem:[%s5435_s30 + $0x68] sm:$0xf] %vm2064_vm7, %v4366_v11  ;;  %v3472_v40 = vmul.f32 %v3427_v50, %v6744_v13  ;;  %v3442_v0 = vpop.permute.xlu0 %3441 }
 0x493   : > { %4320 = vst.msk [vmem:[%s5435_s30 + $0x54] sm:$0xf] %vm2064_vm7, %v4361_v23  ;;  %v3475_v51 = vmul.f32 %v3442_v0, %v6750_v49 }
 0x494   : > { %v4364_v38 = vpack.c.bf16 %v3472_v40, %v3472_v40 }
 0x495   : > { %v4367_v1 = vpack.c.bf16 %v3475_v51, %v3475_v51  ;;  %v3457_v31 = vpop.permute.xlu1 %3456 }
 0x496   : > { %4323 = vst.msk [vmem:[%s5435_s30 + $0x60] sm:$0xf] %vm2064_vm7, %v4364_v38  ;;  %v3478_v20 = vmul.f32 %v3457_v31, %v6754_v56  ;;  %v3432_v12 = vpop.permute.xlu0 %3431 }
 0x497   : > { %4326 = vst.msk [vmem:[%s5435_s30 + $0x6c] sm:$0xf] %vm2064_vm7, %v4367_v1  ;;  %v3473_v13 = vmul.f32 %v3432_v12, %v6748_v26 }
 0x498   : > { %v4370_v58 = vpack.c.bf16 %v3478_v20, %v3478_v20 }
 0x499   : > { %v4365_v63 = vpack.c.bf16 %v3473_v13, %v3473_v13  ;;  %v3447_v42 = vpop.permute.xlu1 %3446 }
 0x49a   : > { %4329 = vst.msk [vmem:[%s5435_s30 + $0x78] sm:$0xf] %vm2064_vm7, %v4370_v58  ;;  %v3476_v49 = vmul.f32 %v3447_v42, %v6752_v57  ;;  %v3452_v28 = vpop.permute.xlu0 %3451  ;;  %v5138_v57 = vld [vmem:[#allocation2 + $0x10] sm:$0xff] }
 0x49b   : > { %4324 = vst.msk [vmem:[%s5435_s30 + $0x64] sm:$0xf] %vm2064_vm7, %v4365_v63  ;;  %v3477_v59 = vmul.f32 %v3452_v28, %v6756_v35  ;;  %v5140_v35 = vld [vmem:[#allocation2 + $0x20] sm:$0xff] }
 0x49c   : > { %v4368_v3 = vpack.c.bf16 %v3476_v49, %v3476_v49 }
 0x49d   : > { %v4369_v56 = vpack.c.bf16 %v3477_v59, %v3477_v59 }
 0x49e   : > { %4327 = vst.msk [vmem:[%s5435_s30 + $0x70] sm:$0xf] %vm2064_vm7, %v4368_v3  ;;  %v3462_v43 = vpop.permute.xlu0 %3461  ;;  %v3627_v41 = vpop.permute.xlu1 %3626 }
 0x49f   : > { %4328 = vst.msk [vmem:[%s5435_s30 + $0x74] sm:$0xf] %vm2064_vm7, %v4369_v56  ;;  %v3479_v26 = vmul.f32 %v3462_v43, %v6759_v33  ;;  %v3629_v27 = vmul.f32 %v5136_v14, %v3627_v41  ;;  %v3630_v4 = vmul.f32 %v5137_v54, %v3627_v41  ;;  %v3631_v61 = vmul.f32 %v5138_v57, %v3627_v41 }
 0x4a0   : > { %v3632_v24 = vmul.f32 %v5139_v53, %v3627_v41  ;;  %v3633_v36 = vmul.f32 %v5140_v35, %v3627_v41  ;;  %v3634_v29 = vmul.f32 %v5141_v25, %v3627_v41  ;;  %v3635_v18 = vmul.f32 %v5142_v62, %v3627_v41 }
 0x4a1   : > { %v4371_v32 = vpack.c.bf16 %v3479_v26, %v3479_v26  ;;  %v3636_v2 = vmul.f32 %v5143_v30, %v3627_v41  ;;  %v3706_v33 = vadd.f32 %v6770_v45, %v3629_v27  ;;  %v3707_v9 = vadd.f32 %v6775_v44, %v3630_v4  ;;  %3732 = sbr.rel (%p4331_p1) target bundleno = 1325 (0x52d), region = 60 }
 0x4a2   : > { %v3708_v34 = vadd.f32 %v6766_v22, %v3631_v61  ;;  %v3709_v10 = vadd.f32 %v6773_v7, %v3632_v24  ;;  %v3710_v48 = vadd.f32 %v6782_v21, %v3633_v36  ;;  %v3711_v15 = vadd.f32 %v6787_v47, %v3634_v29 }
 0x4a3   : > { %4330 = vst.msk [vmem:[%s5435_s30 + $0x7c] sm:$0xf] %vm2064_vm7, %v4371_v32  ;;  %v3712_v37 = vadd.f32 %v6778_v46, %v3635_v18  ;;  %v3713_v19 = vadd.f32 %v6785_v39, %v3636_v2 }
 0x4a4   : > { %3714 = vst.msk [vmem:[#allocation2] sm:$0xff] %vm2234_vm4, %v3706_v33  ;;  %3715 = vst.msk [vmem:[#allocation2 + $0x8] sm:$0xff] %vm2234_vm4, %v3707_v9 }
 0x4a5   : > { %3716 = vst.msk [vmem:[#allocation2 + $0x10] sm:$0xff] %vm2234_vm4, %v3708_v34  ;;  %3717 = vst.msk [vmem:[#allocation2 + $0x18] sm:$0xff] %vm2234_vm4, %v3709_v10 }
 0x4a6   : > { %3718 = vst.msk [vmem:[#allocation2 + $0x20] sm:$0xff] %vm2234_vm4, %v3710_v48  ;;  %3719 = vst.msk [vmem:[#allocation2 + $0x28] sm:$0xff] %vm2234_vm4, %v3711_v15 }
 0x4a7   : > { %3720 = vst.msk [vmem:[#allocation2 + $0x30] sm:$0xff] %vm2234_vm4, %v3712_v37  ;;  %3721 = vst.msk [vmem:[#allocation2 + $0x38] sm:$0xff] %vm2234_vm4, %v3713_v19 }
 0x4ab   : > { %v3749_v45 = vld [vmem:[#allocation2] sm:$0xff]  ;;  %v3750_v44 = vld [vmem:[#allocation2 + $0x8] sm:$0xff] }
 0x4ac   : > { %v3751_v22 = vld [vmem:[#allocation2 + $0x10] sm:$0xff]  ;;  %v3752_v7 = vld [vmem:[#allocation2 + $0x18] sm:$0xff]  ;;  %3765 = vrot.lane.b32.xlu0 %v3749_v45, %s5249_s10  ;;  %3741 = vst.msk [vmem:[%s5448_s21] sm:$0xff] %vm1072_vm3, %v3749_v45  ;;  %3742 = vst.msk [vmem:[%s5448_s21 + $0x8] sm:$0xff] %vm1072_vm3, %v3750_v44 }
 0x4ad   : > { %3769 = vrot.lane.b32.xlu1 %v3751_v22, %s5249_s10  ;;  %v3754_v46 = vld [vmem:[#allocation2 + $0x28] sm:$0xff]  ;;  %v3753_v21 = vld [vmem:[#allocation2 + $0x20] sm:$0xff]  ;;  %3743 = vst.msk [vmem:[%s5448_s21 + $0x10] sm:$0xff] %vm1072_vm3, %v3751_v22  ;;  %3744 = vst.msk [vmem:[%s5448_s21 + $0x18] sm:$0xff] %vm1072_vm3, %v3752_v7 }
 0x4ae   : > { %v3756_v39 = vld [vmem:[#allocation2 + $0x38] sm:$0xff]  ;;  %v3755_v47 = vld [vmem:[#allocation2 + $0x30] sm:$0xff]  ;;  %3745 = vst.msk [vmem:[%s5448_s21 + $0x20] sm:$0xff] %vm1072_vm3, %v3753_v21  ;;  %3746 = vst.msk [vmem:[%s5448_s21 + $0x28] sm:$0xff] %vm1072_vm3, %v3754_v46 }
 0x4af   : > { %3747 = vst.msk [vmem:[%s5448_s21 + $0x30] sm:$0xff] %vm1072_vm3, %v3755_v47  ;;  %3748 = vst.msk [vmem:[%s5448_s21 + $0x38] sm:$0xff] %vm1072_vm3, %v3756_v39 }
 0x4b0   : > { %3767 = vrot.lane.b32.xlu0 %v3750_v44, %s5249_s10 }
 0x4b1   : > { %3771 = vrot.lane.b32.xlu1 %v3752_v7, %s5249_s10 }
 0x4b4   : > { %3773 = vrot.lane.b32.xlu0 %v3753_v21, %s5249_s10 }
 0x4b5   : > { %3775 = vrot.lane.b32.xlu1 %v3754_v46, %s5249_s10 }
 0x4b8   : > { %3777 = vrot.lane.b32.xlu0 %v3755_v47, %s5249_s10 }
 0x4b9   : > { %3779 = vrot.lane.b32.xlu1 %v3756_v39, %s5249_s10 }
 0x51e   : > { %v3766_v16 = vpop.permute.xlu0 %3765 }
 0x51f   : > { %v3770_v6 = vpop.permute.xlu1 %3769  ;;  %3790 = vst.msk [vmem:[%s5440_s9] sm:$0xff] %vm3789_vm8, %v3766_v16 }
 0x520   : > { %3792 = vst.msk [vmem:[%s5440_s9 + $0x10] sm:$0xff] %vm3789_vm8, %v3770_v6 }
 0x522   : > { %v3768_v60 = vpop.permute.xlu0 %3767 }
 0x523   : > { %v3772_v8 = vpop.permute.xlu1 %3771  ;;  %3791 = vst.msk [vmem:[%s5440_s9 + $0x8] sm:$0xff] %vm3789_vm8, %v3768_v60 }
 0x524   : > { %3793 = vst.msk [vmem:[%s5440_s9 + $0x18] sm:$0xff] %vm3789_vm8, %v3772_v8 }
 0x526   : > { %v3774_v5 = vpop.permute.xlu0 %3773 }
 0x527   : > { %v3776_v17 = vpop.permute.xlu1 %3775  ;;  %3794 = vst.msk [vmem:[%s5440_s9 + $0x20] sm:$0xff] %vm3789_vm8, %v3774_v5 }
 0x528   : > { %3795 = vst.msk [vmem:[%s5440_s9 + $0x28] sm:$0xff] %vm3789_vm8, %v3776_v17 }
 0x52a   : > { %v3778_v55 = vpop.permute.xlu0 %3777 }
 0x52b   : > { %v3780_v52 = vpop.permute.xlu1 %3779  ;;  %3796 = vst.msk [vmem:[%s5440_s9 + $0x30] sm:$0xff] %vm3789_vm8, %v3778_v55 }
 0x52c   : > { %3797 = vst.msk [vmem:[%s5440_s9 + $0x38] sm:$0xff] %vm3789_vm8, %v3780_v52 }
 0x52d PF: > { %s7188_s17 = sld [smem:[#allocation10_spill]]  ;;  %s7189_s20 = sld [smem:[#allocation7_spill]] }
 0x52e   : > { %s7191_s16 = sld [smem:[#allocation58_spill]]  ;;  %s3834_s28 = sshll.u32 %s5448_s21, 4  ;;  %s6949_s28 = int_to_ptr.vmem [resolvable:$true] %s3834_s28 }
 0x52f   : > { %s5145_s22 = scalar_lea.vmem %s6949_s28, 1024  ;;  %s5250_s30 = smov [#allocation3]  }
 0x530   : > { %p5146_p2 = scmp.ne.s32.totalorder %s6949_s28, %s5145_s22  ;;  %s5149_s13 = sshll.u32 %s5250_s30, 4  ;;  %s5150_s13 = int_to_ptr.vmem [resolvable:$false] %s5149_s13 }
 0x531   : > { %s5151_s15 = scalar_lea.vmem %s5150_s13, 2048  ;;  %p5152_p6 = scmp.lt.s32.totalorder %s6949_s28, %s5150_s13 }
 0x532   : > { %p5147_p4 = pnand %p5146_p2, %p5362_p3  ;;  %p5153_p7 = scmp.lt.s32.totalorder %s5151_s15, %s5145_s22 }
 0x533   : > { %s4372_s26 = sshll.u32 %s7188_s17, 10  ;;  %s7192_s11 = sand.u32 1, %s7189_s20  }
 0x534   : > { %s6946_s23 = scalar_lea.hbm %s7191_s16, %s4372_s26  ;;  %s6953_s27 = scalar_lea.sflag [#allocation4], %s7192_s11 }
 0x535   : > { %p5148_p5 = pneg %p5147_p4  ;;  %p5154_p8 = por %p5153_p7, %p5152_p6 }
 0x537   : > { %p5155_p10 = pnand %p5154_p8, %p5148_p5 }
 0x539   : > { %5158 = shalt.err (!%p5155_p10)
}
 0x53a   : > { %s5159_s9 = scalar_lea.hbm %s6946_s23, 1024  ;;  %s5163_s21 = scalar_lea.hbm %s7191_s16, 4096 }
 0x53b   : > { %p5160_p11 = scmp.ne.s32.totalorder %s6946_s23, %s5159_s9  ;;  %p5164_p0 = scmp.lt.u32.totalorder %s6946_s23, %s7191_s16 }
 0x53c   : > { %p5165_p1 = scmp.lt.u32.totalorder %s5163_s21, %s5159_s9  ;;  %p5167_p4 = scmp.lt.u32.totalorder %s5159_s9, %s6946_s23 }
 0x53d   : > { %p5161_p12 = pnand %p5160_p11, %p5362_p3 }
 0x53e   : > { %p5166_p2 = por %p5165_p1, %p5164_p0 }
 0x53f   : > { %p5162_p13 = pneg %p5161_p12 }
 0x540   : > { %p5168_p5 = por %p5167_p4, %p5166_p2 }
 0x542   : > { %p5169_p6 = pnand %p5168_p5, %p5162_p13 }
 0x544   : > { %5172 = shalt.err (!%p5169_p6)
}
 0x545   : > { %s5251_s3 = smov 128   ;;  %s5252_s4 = smov 8  }
 0x546   : > { %4685 = dma.vmem_to_hbm [thread:$0]  (%p5362_p3), %s6949_s28, 1024, %s6946_s23, %s6953_s27, %s5251_s3, %s5251_s3, %s5252_s4  }
 0x547 PF: > { %s7193_s14 = sld [smem:[#allocation13_spill]]  ;;  %s7194_s25 = sld [smem:[#allocation6_spill]] }
 0x54d   : > { %p4691_p7 = scmp.ge.s32.totalorder %s7193_s14, 2  ;;  %s3868_s10 = sand.u32 1, %s7194_s25  }
 0x54e   : > { %s3869_s17 = scalar_lea.sflag [#allocation4], %s3868_s10 }
 0x54f   : > { %p4688_p8 = pnand %p4691_p7, %p5372_p9 }
 0x551   : > { %5206 = dma.done.wait (!%p4688_p8), %s3869_s17, 1024  }
 0x552   : > { %5208 = vsyncadd (!%p4688_p8), %s3869_s17, 4294966272  ;;  %s25_s24 = sadd.s32 1, %s7193_s14   ;;  %s7196_s17 = sld [smem:[#allocation7_spill]] }
 0x553   : > { %p22_p10 = scmp.ge.s32.totalorder %s25_s24, 10   ;;  %s7197_s18 = sld [smem:[#allocation8_spill]] }
 0x554   : > { %s7198_s19 = sld [smem:[#allocation18_spill]]  ;;  %s7199_s20 = sld [smem:[#allocation11_spill]] }
 0x555   : > { %s7200_s21 = sld [smem:[#allocation12_spill]]  ;;  %s7201_s22 = sld [smem:[#allocation14_spill]] }
 0x556   : > { %s7202_s23 = sld [smem:[#allocation16_spill]]  ;;  %24 = sbr.rel (!%p22_p10) target bundleno = 14 (0xe), region = 158 }
 0x55d   :  { %3888 = vsyncpa [#allocation4], 1 }
 0x55e   :  { %3890 = vsyncpa [#allocation4 + $0x1], 1 }

</bundles_post_ra>
